<compile_context>
chip_gen: v6e
topology: v6e:2x2x1
jax: 0.10.0
libtpu: 0.0.40
codegen_flags: <defaults>
</compile_context>

<pallas_src>
import functools

import jax
import jax.numpy as jnp
from jax import lax
from jax.experimental import pallas as pl
from jax.experimental.pallas import tpu as pltpu


def _round_up(a, b):
    return (a + b - 1) // b * b


def _resblock_pams_kernel(TH, H, W, CP, with_f1, compute_dtype,
                          params_ref,            # SMEM (6,) [a1, s1, 1/s1, a2, s2, prelu_a]
                          xpad_ref,              # ANY/HBM (B, Hp + 4, W, CP) f32
                          w1_ref, w2_ref,        # VMEM (9*CP, CP) compute_dtype, tap-major K
                          bn_ref,                # VMEM (4, CP)  [bn1_s, bn1_b, bn2_s*rs, bn2_b*rs]
                          *refs):
    if with_f1:
        out_ref, f1_ref, xbuf, sem = refs
    else:
        out_ref, xbuf, sem = refs
        f1_ref = None

    b = pl.program_id(0)
    i = pl.program_id(1)
    n_i = pl.num_programs(1)
    slot = i & 1

    # scalar reads before any DMA wait (keeps SMEM sst->sld forwarding intact)
    a1 = params_ref[0]
    s1 = params_ref[1]
    inv_s1 = params_ref[2]
    a2 = params_ref[3]
    s2 = params_ref[4]
    prelu_a = params_ref[5]

    row_start = pl.multiple_of(i * TH, TH)

    # ---- double-buffered halo DMA: TH output rows need TH+4 padded input rows ----
    @pl.when(i == 0)
    def _():                                                   # prime this image's pipeline
        pltpu.make_async_copy(xpad_ref.at[b, pl.ds(row_start, TH + 4)],
                              xbuf.at[slot], sem.at[slot]).start()

    @pl.when(i + 1 < n_i)
    def _():                                                   # prefetch next row tile
        nxt = pl.multiple_of((i + 1) * TH, TH)
        pltpu.make_async_copy(xpad_ref.at[b, pl.ds(nxt, TH + 4)],
                              xbuf.at[1 - slot], sem.at[1 - slot]).start()

    pltpu.make_async_copy(xpad_ref.at[b, pl.ds(row_start, TH + 4)],
                          xbuf.at[slot], sem.at[slot]).wait()

    xb = xbuf[slot]                                            # (TH+4, W, CP) f32

    # hoisted W-border masks, shared by all 6 shifted taps of both convs
    wid = lax.broadcasted_iota(jnp.int32, (1, W, CP), 1)
    mask_l = (wid > 0).astype(jnp.float32)                     # zero at col 0     (left tap)
    mask_r = (wid < W - 1).astype(jnp.float32)                 # zero at col W-1   (right tap)

    def conv3x3(v, w_ref, rows_out):
        # v: (rows_out + 2, W, CP) f32 -> one fused (rows_out*W, 9*CP) x (9*CP, CP) matmul.
        # Taps = cheap leading-dim row slices + f32 XLU rolls along W with hoisted masks.
        taps = []
        for dy in range(3):
            rows = v[dy:dy + rows_out]
            taps.append((pltpu.roll(rows, shift=1, axis=1) * mask_l)
                        .astype(compute_dtype))                # kx = 0 (input col w-1)
            taps.append(rows.astype(compute_dtype))            # kx = 1 (center)
            taps.append((pltpu.roll(rows, shift=W - 1, axis=1) * mask_r)
                        .astype(compute_dtype))                # kx = 2 (input col w+1)
        patch = jnp.concatenate(taps, axis=-1).reshape(rows_out * W, 9 * CP)
        out = jnp.dot(patch, w_ref[...], preferred_element_type=jnp.float32)
        return out.reshape(rows_out, W, CP)
        # TODO(synk): optional per-dy split into three K=3*CP matmuls if the fused
        # patch ever outgrows the VMEM budget at very large W (v7x).

    # residual = quant_act1(x): round(clip(x)*s1) * (1/s1)  (scalar reciprocal multiply)
    residual = jnp.round(jnp.clip(xb[2:TH + 2], -a1, a1) * s1) * inv_s1     # (TH, W, CP)

    # conv1 over TH+2 rows (extra top/bottom rows are conv2's input halo), BN1, PReLU
    r = conv3x3(xb, w1_ref, TH + 2)                            # (TH+2, W, CP) f32
    r = r * bn_ref[0:1, :] + bn_ref[1:2, :]                    # folded BN1
    r = jnp.where(r >= 0.0, r, prelu_a * r)                    # PReLU

    # quant_act2 -> integer codes (exact in bf16); 1/s2 is folded into w2 by the wrapper
    r = jnp.round(jnp.clip(r, -a2, a2) * s2)

    # rows of r outside the real image act as conv2's zero padding
    hidx = (i * TH - 1) + lax.broadcasted_iota(jnp.int32, r.shape, 0)
    r = jnp.where((hidx >= 0) & (hidx < H), r, 0.0)

    y = conv3x3(r, w2_ref, TH)                                 # (TH, W, CP) = f1 (pre-BN2)

    if with_f1:
        f1_ref[...] = y.astype(f1_ref.dtype)
    # res_scale is folded into bn2 scale/bias by the wrapper
    out_ref[...] = y * bn_ref[2:3, :] + bn_ref[3:4, :] + residual


def resblock_pams_forward(x_nchw, f, p, loss_kdf=False,
                          compute_dtype=jnp.bfloat16, tile_h=32,
                          vmem_budget_bytes=28 << 20):
    """x_nchw: (B, C, H, W) f32; f: None or (n, B, C, H, W). Returns [res, f]."""
    B, C, H, W = x_nchw.shape
    CP = _round_up(max(C, 128), 128)                           # lane-dense channel dim
    cd_bytes = jnp.dtype(compute_dtype).itemsize

    def est_vmem(th):                                          # per-step VMEM estimate
        xbuf = 2 * (th + 4) * W * CP * 4                       # double-buffered halo tile
        wbuf = 2 * 2 * 9 * CP * CP * cd_bytes                  # two weights, double-buffered
        outs = 2 * th * W * CP * (4 + (cd_bytes if loss_kdf else 0))
        patch = ((th + 2) + th) * W * 9 * CP * cd_bytes        # the two im2col patches
        work = 6 * (th + 2) * W * CP * 4                       # r / residual / temporaries
        return xbuf + wbuf + outs + patch + work

    TH = min(_round_up(max(tile_h, 8), 8), _round_up(H, 8))    # multiple of 8
    while TH > 8 and est_vmem(TH) > vmem_budget_bytes:
        TH -= 8
    nI = pl.cdiv(H, TH)
    Hp = nI * TH

    # NCHW -> NHWC plus channel / row zero padding (see TODO(synk) in the header).
    x = jnp.transpose(x_nchw, (0, 2, 3, 1))
    x_pad = jnp.pad(x, ((0, 0), (2, 2 + Hp - H), (0, 0), (0, CP - C)))

    def stacked_w(w):                                          # (O,I,3,3) -> (9*CP, CP)
        wt = jnp.transpose(w, (2, 3, 1, 0))                    # (ky,kx,Cin,Cout)
        wt = jnp.pad(wt, ((0, 0), (0, 0), (0, CP - C), (0, CP - C)))
        return wt.reshape(9 * CP, CP).astype(compute_dtype)

    inv_s2 = p["alpha2"] / p["qmax"]                           # fold quant_act2 dequant into w2
    w1 = stacked_w(p["w1"])
    w2 = stacked_w(p["w2"] * inv_s2)

    rs = p["res_scale"]                                        # fold res_scale into BN2 affine
    padc = lambda v: jnp.pad(v, (0, CP - C))
    bn = jnp.stack([padc(p["bn1_scale"]), padc(p["bn1_bias"]),
                    padc(p["bn2_scale"] * rs), padc(p["bn2_bias"] * rs)]).astype(jnp.float32)

    params = jnp.array([p["alpha1"], p["qmax"] / p["alpha1"], p["alpha1"] / p["qmax"],
                        p["alpha2"], p["qmax"] / p["alpha2"], p["prelu_a"]], jnp.float32)

    kernel = functools.partial(_resblock_pams_kernel, TH, H, W, CP,
                               loss_kdf, compute_dtype)

    out_shape = [jax.ShapeDtypeStruct((B, Hp, W, CP), jnp.float32)]
    out_specs = [pl.BlockSpec((None, TH, W, CP), lambda b, i: (b, i, 0, 0))]
    if loss_kdf:
        out_shape.append(jax.ShapeDtypeStruct((B, Hp, W, CP), compute_dtype))
        out_specs.append(pl.BlockSpec((None, TH, W, CP), lambda b, i: (b, i, 0, 0)))

    vmem_limit = int(min(max(2 * est_vmem(TH), 32 << 20), 60 << 20))
    cost = pl.CostEstimate(
        flops=int(2 * 2 * B * Hp * W * 9 * CP * CP),
        transcendentals=0,
        bytes_accessed=int(x_pad.size * 4
                           + B * Hp * W * CP * (4 + (cd_bytes if loss_kdf else 0))
                           + 2 * 9 * CP * CP * cd_bytes))

    outs = pl.pallas_call(
        kernel,
        grid=(B, nI),
        out_shape=tuple(out_shape),
        in_specs=[
            pl.BlockSpec(memory_space=pltpu.MemorySpace.SMEM),    # scalar params
            pl.BlockSpec(memory_space=pl.ANY),                    # x_pad stays in HBM
            pl.BlockSpec((9 * CP, CP), lambda b, i: (0, 0)),      # w1 (VMEM resident)
            pl.BlockSpec((9 * CP, CP), lambda b, i: (0, 0)),      # w2 (VMEM resident)
            pl.BlockSpec((4, CP), lambda b, i: (0, 0)),           # folded BN params
        ],
        out_specs=tuple(out_specs),
        scratch_shapes=[pltpu.VMEM((2, TH + 4, W, CP), jnp.float32),  # halo double buffer
                        pltpu.SemaphoreType.DMA((2,))],
        compiler_params=pltpu.CompilerParams(
            dimension_semantics=("parallel", "arbitrary"),
            vmem_limit_bytes=vmem_limit),
        cost_estimate=cost,
    )(params, x_pad, w1, w2, bn)

    res = jnp.transpose(outs[0][:, :H, :, :C], (0, 3, 1, 2))          # NHWC -> NCHW
    if loss_kdf:
        f1 = jnp.transpose(outs[1][:, :H, :, :C], (0, 3, 1, 2)).astype(jnp.float32)
        f = f1[None] if f is None else jnp.concatenate([f, f1[None]], axis=0)
    else:
        f = None
    return [res, f]


def init_params(key, n_feats=4, k_bits=8, eps=1e-5):
    ks = jax.random.split(key, 8)
    qmax = 2.0 ** (k_bits - 1) - 1.0

    def quant_w(w):  # PAMS weight quantization (symmetric, max-abs scale) -- wrapper glue
        s = qmax / jnp.max(jnp.abs(w))
        return jnp.round(w * s) / s

    w1 = quant_w(0.1 * jax.random.normal(ks[0], (n_feats, n_feats, 3, 3), jnp.float32))
    w2 = quant_w(0.1 * jax.random.normal(ks[1], (n_feats, n_feats, 3, 3), jnp.float32))

    def bn_fold(kg, kb, km, kv):
        gamma = 1.0 + 0.1 * jax.random.normal(kg, (n_feats,), jnp.float32)
        beta = 0.1 * jax.random.normal(kb, (n_feats,), jnp.float32)
        mean = 0.1 * jax.random.normal(km, (n_feats,), jnp.float32)
        var = jnp.abs(1.0 + 0.1 * jax.random.normal(kv, (n_feats,), jnp.float32))
        scale = gamma / jnp.sqrt(var + eps)
        bias = beta - mean * scale
        return scale, bias

    bn1_scale, bn1_bias = bn_fold(ks[2], ks[3], ks[4], ks[5])
    bn2_scale, bn2_bias = bn_fold(ks[6], ks[7], ks[2], ks[3])

    return dict(w1=w1, w2=w2,
                bn1_scale=bn1_scale, bn1_bias=bn1_bias,
                bn2_scale=bn2_scale, bn2_bias=bn2_bias,
                alpha1=jnp.float32(2.0), alpha2=jnp.float32(1.5),
                prelu_a=jnp.float32(0.25), res_scale=jnp.float32(1.0),
                qmax=jnp.float32(qmax))


def reference_forward(x, p):
    """Pure-JAX reference (mirrors the PyTorch forward, NCHW, f32)."""
    qmax = p["qmax"]

    def qact(v, alpha):
        s = qmax / alpha
        return jnp.round(jnp.clip(v, -alpha, alpha) * s) / s

    dn = ("NCHW", "OIHW", "NCHW")
    residual = qact(x, p["alpha1"])
    r = lax.conv_general_dilated(x, p["w1"], (1, 1), "SAME", dimension_numbers=dn)
    r = r * p["bn1_scale"][None, :, None, None] + p["bn1_bias"][None, :, None, None]
    r = jnp.where(r >= 0, r, p["prelu_a"] * r)
    r = qact(r, p["alpha2"])
    r = lax.conv_general_dilated(r, p["w2"], (1, 1), "SAME", dimension_numbers=dn)
    f1 = r
    res = (r * p["bn2_scale"][None, :, None, None] + p["bn2_bias"][None, :, None, None]) \
        * p["res_scale"] + residual
    return res, f1


if __name__ == "__main__":
    # TODO(synk): training-time EMA update of quant_act_pams alpha (epoch <= ema_epoch)
    # is a training-only statistics path and is not reproduced here.
    B, C, H, W = 2, 4, 16, 16
    key = jax.random.PRNGKey(0)
    kx, kp = jax.random.split(key)
    x = jax.random.normal(kx, (B, C, H, W), jnp.float32)
    p = init_params(kp, n_feats=C, k_bits=8)

    ref, ref_f1 = reference_forward(x, p)

    # default path: bf16 MXU with f32 accumulate / epilogue (relaxed tolerance)
    out, f = resblock_pams_forward(x, None, p, loss_kdf=False)
    out = jax.block_until_ready(out)
    assert f is None
    assert float(jnp.max(jnp.abs(out - ref))) < 1e-1, float(jnp.max(jnp.abs(out - ref)))

    # f32 MXU path, loss_kdf=True, tile_h=8 -> 2 row tiles per image, which exercises
    # the double-buffered halo prefetch; exact-precision check
    out2, f2 = resblock_pams_forward(x, None, p, loss_kdf=True,
                                     compute_dtype=jnp.float32, tile_h=8)
    jax.block_until_ready(out2)
    assert f2.shape == (1, B, C, H, W)
    assert float(jnp.max(jnp.abs(out2 - ref))) < 1e-3
    assert float(jnp.max(jnp.abs(f2[0] - ref_f1))) < 1e-3

    # feature-map concatenation path (f is not None)
    out3, f3 = resblock_pams_forward(x, f2, p, loss_kdf=True,
                                     compute_dtype=jnp.float32, tile_h=8)
    jax.block_until_ready(out3)
    assert f3.shape == (2, B, C, H, W)
    assert float(jnp.max(jnp.abs(out3 - ref))) < 1e-3

    # f32 path at the default tile size (single row tile per image)
    out4, _ = resblock_pams_forward(x, None, p, loss_kdf=False,
                                    compute_dtype=jnp.float32)
    jax.block_until_ready(out4)
    assert float(jnp.max(jnp.abs(out4 - ref))) < 1e-3

    print("KERNEL_OK")
</pallas_src>

<mosaic_0001>
module attributes {stable_mosaic.version = 11 : i64} {
  func.func @_resblock_pams_kernel(%arg0: i32, %arg1: i32, %arg2: memref<6xf32, #tpu.memory_space<smem>>, %arg3: memref<2x20x16x128xf32, #tpu.memory_space<any>>, %arg4: memref<1152x128xbf16, #tpu.memory_space<vmem>>, %arg5: memref<1152x128xbf16, #tpu.memory_space<vmem>>, %arg6: memref<4x128xf32, #tpu.memory_space<vmem>>, %arg7: memref<1x16x16x128xf32, #tpu.memory_space<vmem>>, %arg8: memref<2x20x16x128xf32, #tpu.memory_space<vmem>>, %arg9: memref<2x!tpu.dma_semaphore, #tpu.memory_space<semaphore_mem>>) attributes {dimension_semantics = [#tpu.dimension_semantics<parallel>, #tpu.dimension_semantics<arbitrary>], iteration_bounds = array<i64: 2, 1>, scalar_prefetch = 0 : i64, scratch_operands = 2 : i64, tpu.core_type = #tpu.core_type<tc>, window_params = [{transform_indices = @transform_0, window_bounds = array<i64: 6>}, {}, {pipeline_mode = #tpu.pipeline_mode<synchronous>, transform_indices = @transform_2, window_bounds = array<i64: 1152, 128>}, {pipeline_mode = #tpu.pipeline_mode<synchronous>, transform_indices = @transform_3, window_bounds = array<i64: 1152, 128>}, {pipeline_mode = #tpu.pipeline_mode<synchronous>, transform_indices = @transform_4, window_bounds = array<i64: 4, 128>}, {transform_indices = @transform_5, window_bounds = array<i64: 1, 16, 16, 128>}]} {
    %c1_i32 = arith.constant 1 : i32
    %0 = arith.andi %arg1, %c1_i32 : i32
    %c0 = arith.constant 0 : index
    %1 = memref.load %arg2[%c0] : memref<6xf32, #tpu.memory_space<smem>>
    %c1 = arith.constant 1 : index
    %2 = memref.load %arg2[%c1] : memref<6xf32, #tpu.memory_space<smem>>
    %c2 = arith.constant 2 : index
    %3 = memref.load %arg2[%c2] : memref<6xf32, #tpu.memory_space<smem>>
    %c3 = arith.constant 3 : index
    %4 = memref.load %arg2[%c3] : memref<6xf32, #tpu.memory_space<smem>>
    %c4 = arith.constant 4 : index
    %5 = memref.load %arg2[%c4] : memref<6xf32, #tpu.memory_space<smem>>
    %c5 = arith.constant 5 : index
    %6 = memref.load %arg2[%c5] : memref<6xf32, #tpu.memory_space<smem>>
    %c16_i32 = arith.constant 16 : i32
    %7 = arith.muli %arg1, %c16_i32 : i32
    %8 = tpu.assume_multiple %7, 16 : i32
    %c0_i32 = arith.constant 0 : i32
    %9 = arith.cmpi eq, %arg1, %c0_i32 : i32
    %10 = arith.extui %9 : i1 to i32
    %c0_i32_0 = arith.constant 0 : i32
    %11 = arith.cmpi ne, %10, %c0_i32_0 : i32
    scf.if %11 {
      %c0_i32_50 = arith.constant 0 : i32
      %c0_i32_51 = arith.constant 0 : i32
      %160 = tpu.memref_slice %arg3[%arg0, %8, %c0_i32_50, %c0_i32_51] : memref<2x20x16x128xf32, #tpu.memory_space<any>> -> memref<1x20x16x128xf32, #tpu.memory_space<any>>
      %161 = tpu.memref_squeeze %160 : memref<1x20x16x128xf32, #tpu.memory_space<any>> -> memref<20x16x128xf32, #tpu.memory_space<any>>
      %c0_i32_52 = arith.constant 0 : i32
      %c0_i32_53 = arith.constant 0 : i32
      %c0_i32_54 = arith.constant 0 : i32
      %162 = tpu.memref_slice %arg8[%0, %c0_i32_52, %c0_i32_53, %c0_i32_54] : memref<2x20x16x128xf32, #tpu.memory_space<vmem>> -> memref<1x20x16x128xf32, #tpu.memory_space<vmem>>
      %163 = tpu.memref_squeeze %162 : memref<1x20x16x128xf32, #tpu.memory_space<vmem>> -> memref<20x16x128xf32, #tpu.memory_space<vmem>>
      %164 = tpu.memref_slice %arg9[%0] : memref<2x!tpu.dma_semaphore, #tpu.memory_space<semaphore_mem>> -> memref<1x!tpu.dma_semaphore, #tpu.memory_space<semaphore_mem>>
      %165 = tpu.memref_squeeze %164 : memref<1x!tpu.dma_semaphore, #tpu.memory_space<semaphore_mem>> -> memref<!tpu.dma_semaphore, #tpu.memory_space<semaphore_mem>>
      tpu.enqueue_dma source(%161 : memref<20x16x128xf32, #tpu.memory_space<any>>) target(%163 : memref<20x16x128xf32, #tpu.memory_space<vmem>>) target_semaphore(%165 : memref<!tpu.dma_semaphore, #tpu.memory_space<semaphore_mem>>)
    } else {
    }
    %c1_i32_1 = arith.constant 1 : i32
    %12 = arith.addi %arg1, %c1_i32_1 : i32
    %c1_i32_2 = arith.constant 1 : i32
    %13 = arith.cmpi slt, %12, %c1_i32_2 : i32
    %14 = arith.extui %13 : i1 to i32
    %c0_i32_3 = arith.constant 0 : i32
    %15 = arith.cmpi ne, %14, %c0_i32_3 : i32
    scf.if %15 {
      %c1_i32_50 = arith.constant 1 : i32
      %160 = arith.addi %arg1, %c1_i32_50 : i32
      %c16_i32_51 = arith.constant 16 : i32
      %161 = arith.muli %160, %c16_i32_51 : i32
      %162 = tpu.assume_multiple %161, 16 : i32
      %c1_i32_52 = arith.constant 1 : i32
      %163 = arith.subi %c1_i32_52, %0 : i32
      %c1_i32_53 = arith.constant 1 : i32
      %164 = arith.subi %c1_i32_53, %0 : i32
      %c0_i32_54 = arith.constant 0 : i32
      %c0_i32_55 = arith.constant 0 : i32
      %165 = tpu.memref_slice %arg3[%arg0, %162, %c0_i32_54, %c0_i32_55] : memref<2x20x16x128xf32, #tpu.memory_space<any>> -> memref<1x20x16x128xf32, #tpu.memory_space<any>>
      %166 = tpu.memref_squeeze %165 : memref<1x20x16x128xf32, #tpu.memory_space<any>> -> memref<20x16x128xf32, #tpu.memory_space<any>>
      %c0_i32_56 = arith.constant 0 : i32
      %c0_i32_57 = arith.constant 0 : i32
      %c0_i32_58 = arith.constant 0 : i32
      %167 = tpu.memref_slice %arg8[%163, %c0_i32_56, %c0_i32_57, %c0_i32_58] : memref<2x20x16x128xf32, #tpu.memory_space<vmem>> -> memref<1x20x16x128xf32, #tpu.memory_space<vmem>>
      %168 = tpu.memref_squeeze %167 : memref<1x20x16x128xf32, #tpu.memory_space<vmem>> -> memref<20x16x128xf32, #tpu.memory_space<vmem>>
      %169 = tpu.memref_slice %arg9[%164] : memref<2x!tpu.dma_semaphore, #tpu.memory_space<semaphore_mem>> -> memref<1x!tpu.dma_semaphore, #tpu.memory_space<semaphore_mem>>
      %170 = tpu.memref_squeeze %169 : memref<1x!tpu.dma_semaphore, #tpu.memory_space<semaphore_mem>> -> memref<!tpu.dma_semaphore, #tpu.memory_space<semaphore_mem>>
      tpu.enqueue_dma source(%166 : memref<20x16x128xf32, #tpu.memory_space<any>>) target(%168 : memref<20x16x128xf32, #tpu.memory_space<vmem>>) target_semaphore(%170 : memref<!tpu.dma_semaphore, #tpu.memory_space<semaphore_mem>>)
    } else {
    }
    %c0_i32_4 = arith.constant 0 : i32
    %c0_i32_5 = arith.constant 0 : i32
    %16 = tpu.memref_slice %arg3[%arg0, %8, %c0_i32_4, %c0_i32_5] : memref<2x20x16x128xf32, #tpu.memory_space<any>> -> memref<1x20x16x128xf32, #tpu.memory_space<any>>
    %17 = tpu.memref_squeeze %16 : memref<1x20x16x128xf32, #tpu.memory_space<any>> -> memref<20x16x128xf32, #tpu.memory_space<any>>
    %c0_i32_6 = arith.constant 0 : i32
    %c0_i32_7 = arith.constant 0 : i32
    %c0_i32_8 = arith.constant 0 : i32
    %18 = tpu.memref_slice %arg8[%0, %c0_i32_6, %c0_i32_7, %c0_i32_8] : memref<2x20x16x128xf32, #tpu.memory_space<vmem>> -> memref<1x20x16x128xf32, #tpu.memory_space<vmem>>
    %19 = tpu.memref_squeeze %18 : memref<1x20x16x128xf32, #tpu.memory_space<vmem>> -> memref<20x16x128xf32, #tpu.memory_space<vmem>>
    %20 = tpu.memref_slice %arg9[%0] : memref<2x!tpu.dma_semaphore, #tpu.memory_space<semaphore_mem>> -> memref<1x!tpu.dma_semaphore, #tpu.memory_space<semaphore_mem>>
    %21 = tpu.memref_squeeze %20 : memref<1x!tpu.dma_semaphore, #tpu.memory_space<semaphore_mem>> -> memref<!tpu.dma_semaphore, #tpu.memory_space<semaphore_mem>>
    tpu.wait_dma2 semaphore(%21 : memref<!tpu.dma_semaphore, #tpu.memory_space<semaphore_mem>>) src(%17 : memref<20x16x128xf32, #tpu.memory_space<any>>) dst(%19 : memref<20x16x128xf32, #tpu.memory_space<vmem>>)
    %22 = arith.index_cast %0 : i32 to index
    %c0_9 = arith.constant 0 : index
    %c0_10 = arith.constant 0 : index
    %c0_11 = arith.constant 0 : index
    %23 = vector.load %arg8[%22, %c0_9, %c0_10, %c0_11] : memref<2x20x16x128xf32, #tpu.memory_space<vmem>>, vector<1x20x16x128xf32>
    %24 = vector.shape_cast %23 : vector<1x20x16x128xf32> to vector<20x16x128xf32>
    %25 = tpu.iota {dimensions = array<i32: 1>} : vector<1x16x128xi32>
    %c0_i32_12 = arith.constant 0 : i32
    %26 = vector.broadcast %c0_i32_12 : i32 to vector<1x16x128xi32>
    %27 = arith.cmpi sgt, %25, %26 : vector<1x16x128xi32>
    %28 = arith.extui %27 : vector<1x16x128xi1> to vector<1x16x128xi32>
    %29 = arith.sitofp %28 : vector<1x16x128xi32> to vector<1x16x128xf32>
    %c15_i32 = arith.constant 15 : i32
    %30 = vector.broadcast %c15_i32 : i32 to vector<1x16x128xi32>
    %31 = arith.cmpi slt, %25, %30 : vector<1x16x128xi32>
    %32 = arith.extui %31 : vector<1x16x128xi1> to vector<1x16x128xi32>
    %33 = arith.sitofp %32 : vector<1x16x128xi32> to vector<1x16x128xf32>
    %34 = vector.extract_strided_slice %24 {offsets = [2, 0, 0], sizes = [16, 16, 128], strides = [1, 1, 1]} : vector<20x16x128xf32> to vector<16x16x128xf32>
    %cst = arith.constant 0.000000e+00 : f32
    %35 = arith.subf %cst, %1 : f32
    %36 = vector.broadcast %35 : f32 to vector<16x16x128xf32>
    %37 = arith.maximumf %36, %34 : vector<16x16x128xf32>
    %38 = vector.broadcast %1 : f32 to vector<16x16x128xf32>
    %39 = arith.minimumf %38, %37 : vector<16x16x128xf32>
    %40 = vector.broadcast %2 : f32 to vector<16x16x128xf32>
    %41 = arith.mulf %39, %40 : vector<16x16x128xf32>
    %42 = math.roundeven %41 : vector<16x16x128xf32>
    %43 = vector.broadcast %3 : f32 to vector<16x16x128xf32>
    %44 = arith.mulf %42, %43 : vector<16x16x128xf32>
    %45 = vector.extract_strided_slice %24 {offsets = [0, 0, 0], sizes = [18, 16, 128], strides = [1, 1, 1]} : vector<20x16x128xf32> to vector<18x16x128xf32>
    %c1_i32_13 = arith.constant 1 : i32
    %46 = tpu.dynamic_rotate %45 by %c1_i32_13 dim 1 : vector<18x16x128xf32>, i32 -> vector<18x16x128xf32>
    %47 = vector.broadcast %29 : vector<1x16x128xf32> to vector<18x16x128xf32>
    %48 = arith.mulf %46, %47 : vector<18x16x128xf32>
    %49 = arith.truncf %48 : vector<18x16x128xf32> to vector<18x16x128xbf16>
    %50 = arith.truncf %45 : vector<18x16x128xf32> to vector<18x16x128xbf16>
    %c15_i32_14 = arith.constant 15 : i32
    %51 = tpu.dynamic_rotate %45 by %c15_i32_14 dim 1 : vector<18x16x128xf32>, i32 -> vector<18x16x128xf32>
    %52 = vector.broadcast %33 : vector<1x16x128xf32> to vector<18x16x128xf32>
    %53 = arith.mulf %51, %52 : vector<18x16x128xf32>
    %54 = arith.truncf %53 : vector<18x16x128xf32> to vector<18x16x128xbf16>
    %55 = vector.extract_strided_slice %24 {offsets = [1, 0, 0], sizes = [18, 16, 128], strides = [1, 1, 1]} : vector<20x16x128xf32> to vector<18x16x128xf32>
    %c1_i32_15 = arith.constant 1 : i32
    %56 = tpu.dynamic_rotate %55 by %c1_i32_15 dim 1 : vector<18x16x128xf32>, i32 -> vector<18x16x128xf32>
    %57 = vector.broadcast %29 : vector<1x16x128xf32> to vector<18x16x128xf32>
    %58 = arith.mulf %56, %57 : vector<18x16x128xf32>
    %59 = arith.truncf %58 : vector<18x16x128xf32> to vector<18x16x128xbf16>
    %60 = arith.truncf %55 : vector<18x16x128xf32> to vector<18x16x128xbf16>
    %c15_i32_16 = arith.constant 15 : i32
    %61 = tpu.dynamic_rotate %55 by %c15_i32_16 dim 1 : vector<18x16x128xf32>, i32 -> vector<18x16x128xf32>
    %62 = vector.broadcast %33 : vector<1x16x128xf32> to vector<18x16x128xf32>
    %63 = arith.mulf %61, %62 : vector<18x16x128xf32>
    %64 = arith.truncf %63 : vector<18x16x128xf32> to vector<18x16x128xbf16>
    %65 = vector.extract_strided_slice %24 {offsets = [2, 0, 0], sizes = [18, 16, 128], strides = [1, 1, 1]} : vector<20x16x128xf32> to vector<18x16x128xf32>
    %c1_i32_17 = arith.constant 1 : i32
    %66 = tpu.dynamic_rotate %65 by %c1_i32_17 dim 1 : vector<18x16x128xf32>, i32 -> vector<18x16x128xf32>
    %67 = vector.broadcast %29 : vector<1x16x128xf32> to vector<18x16x128xf32>
    %68 = arith.mulf %66, %67 : vector<18x16x128xf32>
    %69 = arith.truncf %68 : vector<18x16x128xf32> to vector<18x16x128xbf16>
    %70 = arith.truncf %65 : vector<18x16x128xf32> to vector<18x16x128xbf16>
    %c15_i32_18 = arith.constant 15 : i32
    %71 = tpu.dynamic_rotate %65 by %c15_i32_18 dim 1 : vector<18x16x128xf32>, i32 -> vector<18x16x128xf32>
    %72 = vector.broadcast %33 : vector<1x16x128xf32> to vector<18x16x128xf32>
    %73 = arith.mulf %71, %72 : vector<18x16x128xf32>
    %74 = arith.truncf %73 : vector<18x16x128xf32> to vector<18x16x128xbf16>
    %75 = tpu.concatenate %49, %50, %54, %59, %60, %64, %69, %70, %74 in 2 : vector<18x16x128xbf16>, vector<18x16x128xbf16>, vector<18x16x128xbf16>, vector<18x16x128xbf16>, vector<18x16x128xbf16>, vector<18x16x128xbf16>, vector<18x16x128xbf16>, vector<18x16x128xbf16>, vector<18x16x128xbf16> -> vector<18x16x1152xbf16>
    %76 = vector.shape_cast %75 : vector<18x16x1152xbf16> to vector<288x1152xbf16>
    %c0_19 = arith.constant 0 : index
    %c0_20 = arith.constant 0 : index
    %77 = vector.load %arg4[%c0_19, %c0_20] : memref<1152x128xbf16, #tpu.memory_space<vmem>>, vector<1152x128xbf16>
    %cst_21 = arith.constant dense<0.000000e+00> : vector<288x128xf32>
    %78 = tpu.matmul %76, %77, %cst_21 {dimension_numbers = #tpu.dot_dimension_numbers<[1], [0], [0], [1], [0, 0, 1, 1], [], []>} : vector<288x1152xbf16>, vector<1152x128xbf16>, vector<288x128xf32> -> vector<288x128xf32>
    %79 = vector.shape_cast %78 : vector<288x128xf32> to vector<18x16x128xf32>
    %c0_22 = arith.constant 0 : index
    %c0_23 = arith.constant 0 : index
    %80 = vector.load %arg6[%c0_22, %c0_23] : memref<4x128xf32, #tpu.memory_space<vmem>>, vector<1x128xf32>
    %81 = vector.shape_cast %80 : vector<1x128xf32> to vector<1x1x128xf32>
    %82 = vector.broadcast %81 : vector<1x1x128xf32> to vector<18x16x128xf32>
    %83 = arith.mulf %79, %82 : vector<18x16x128xf32>
    %c1_24 = arith.constant 1 : index
    %c0_25 = arith.constant 0 : index
    %84 = vector.load %arg6[%c1_24, %c0_25] : memref<4x128xf32, #tpu.memory_space<vmem>>, vector<1x128xf32>
    %85 = vector.shape_cast %84 : vector<1x128xf32> to vector<1x1x128xf32>
    %86 = vector.broadcast %85 : vector<1x1x128xf32> to vector<18x16x128xf32>
    %87 = arith.addf %83, %86 : vector<18x16x128xf32>
    %cst_26 = arith.constant 0.000000e+00 : f32
    %88 = vector.broadcast %cst_26 : f32 to vector<18x16x128xf32>
    %89 = arith.cmpf oge, %87, %88 : vector<18x16x128xf32>
    %90 = vector.broadcast %6 : f32 to vector<18x16x128xf32>
    %91 = arith.mulf %90, %87 : vector<18x16x128xf32>
    %92 = arith.select %89, %87, %91 : vector<18x16x128xi1>, vector<18x16x128xf32>
    %cst_27 = arith.constant 0.000000e+00 : f32
    %93 = arith.subf %cst_27, %4 : f32
    %94 = vector.broadcast %93 : f32 to vector<18x16x128xf32>
    %95 = arith.maximumf %94, %92 : vector<18x16x128xf32>
    %96 = vector.broadcast %4 : f32 to vector<18x16x128xf32>
    %97 = arith.minimumf %96, %95 : vector<18x16x128xf32>
    %98 = vector.broadcast %5 : f32 to vector<18x16x128xf32>
    %99 = arith.mulf %97, %98 : vector<18x16x128xf32>
    %100 = math.roundeven %99 : vector<18x16x128xf32>
    %c16_i32_28 = arith.constant 16 : i32
    %101 = arith.muli %arg1, %c16_i32_28 : i32
    %c1_i32_29 = arith.constant 1 : i32
    %102 = arith.subi %101, %c1_i32_29 : i32
    %103 = tpu.iota {dimensions = array<i32: 0>} : vector<18x16x128xi32>
    %104 = vector.broadcast %102 : i32 to vector<18x16x128xi32>
    %105 = arith.addi %104, %103 : vector<18x16x128xi32>
    %c0_i32_30 = arith.constant 0 : i32
    %106 = vector.broadcast %c0_i32_30 : i32 to vector<18x16x128xi32>
    %107 = arith.cmpi sge, %105, %106 : vector<18x16x128xi32>
    %c16_i32_31 = arith.constant 16 : i32
    %108 = vector.broadcast %c16_i32_31 : i32 to vector<18x16x128xi32>
    %109 = arith.cmpi slt, %105, %108 : vector<18x16x128xi32>
    %110 = arith.andi %107, %109 : vector<18x16x128xi1>
    %cst_32 = arith.constant 0.000000e+00 : f32
    %111 = vector.broadcast %cst_32 : f32 to vector<18x16x128xf32>
    %112 = arith.select %110, %100, %111 : vector<18x16x128xi1>, vector<18x16x128xf32>
    %113 = vector.extract_strided_slice %112 {offsets = [0, 0, 0], sizes = [16, 16, 128], strides = [1, 1, 1]} : vector<18x16x128xf32> to vector<16x16x128xf32>
    %c1_i32_33 = arith.constant 1 : i32
    %114 = tpu.dynamic_rotate %113 by %c1_i32_33 dim 1 : vector<16x16x128xf32>, i32 -> vector<16x16x128xf32>
    %115 = vector.broadcast %29 : vector<1x16x128xf32> to vector<16x16x128xf32>
    %116 = arith.mulf %114, %115 : vector<16x16x128xf32>
    %117 = arith.truncf %116 : vector<16x16x128xf32> to vector<16x16x128xbf16>
    %118 = arith.truncf %113 : vector<16x16x128xf32> to vector<16x16x128xbf16>
    %c15_i32_34 = arith.constant 15 : i32
    %119 = tpu.dynamic_rotate %113 by %c15_i32_34 dim 1 : vector<16x16x128xf32>, i32 -> vector<16x16x128xf32>
    %120 = vector.broadcast %33 : vector<1x16x128xf32> to vector<16x16x128xf32>
    %121 = arith.mulf %119, %120 : vector<16x16x128xf32>
    %122 = arith.truncf %121 : vector<16x16x128xf32> to vector<16x16x128xbf16>
    %123 = vector.extract_strided_slice %112 {offsets = [1, 0, 0], sizes = [16, 16, 128], strides = [1, 1, 1]} : vector<18x16x128xf32> to vector<16x16x128xf32>
    %c1_i32_35 = arith.constant 1 : i32
    %124 = tpu.dynamic_rotate %123 by %c1_i32_35 dim 1 : vector<16x16x128xf32>, i32 -> vector<16x16x128xf32>
    %125 = vector.broadcast %29 : vector<1x16x128xf32> to vector<16x16x128xf32>
    %126 = arith.mulf %124, %125 : vector<16x16x128xf32>
    %127 = arith.truncf %126 : vector<16x16x128xf32> to vector<16x16x128xbf16>
    %128 = arith.truncf %123 : vector<16x16x128xf32> to vector<16x16x128xbf16>
    %c15_i32_36 = arith.constant 15 : i32
    %129 = tpu.dynamic_rotate %123 by %c15_i32_36 dim 1 : vector<16x16x128xf32>, i32 -> vector<16x16x128xf32>
    %130 = vector.broadcast %33 : vector<1x16x128xf32> to vector<16x16x128xf32>
    %131 = arith.mulf %129, %130 : vector<16x16x128xf32>
    %132 = arith.truncf %131 : vector<16x16x128xf32> to vector<16x16x128xbf16>
    %133 = vector.extract_strided_slice %112 {offsets = [2, 0, 0], sizes = [16, 16, 128], strides = [1, 1, 1]} : vector<18x16x128xf32> to vector<16x16x128xf32>
    %c1_i32_37 = arith.constant 1 : i32
    %134 = tpu.dynamic_rotate %133 by %c1_i32_37 dim 1 : vector<16x16x128xf32>, i32 -> vector<16x16x128xf32>
    %135 = vector.broadcast %29 : vector<1x16x128xf32> to vector<16x16x128xf32>
    %136 = arith.mulf %134, %135 : vector<16x16x128xf32>
    %137 = arith.truncf %136 : vector<16x16x128xf32> to vector<16x16x128xbf16>
    %138 = arith.truncf %133 : vector<16x16x128xf32> to vector<16x16x128xbf16>
    %c15_i32_38 = arith.constant 15 : i32
    %139 = tpu.dynamic_rotate %133 by %c15_i32_38 dim 1 : vector<16x16x128xf32>, i32 -> vector<16x16x128xf32>
    %140 = vector.broadcast %33 : vector<1x16x128xf32> to vector<16x16x128xf32>
    %141 = arith.mulf %139, %140 : vector<16x16x128xf32>
    %142 = arith.truncf %141 : vector<16x16x128xf32> to vector<16x16x128xbf16>
    %143 = tpu.concatenate %117, %118, %122, %127, %128, %132, %137, %138, %142 in 2 : vector<16x16x128xbf16>, vector<16x16x128xbf16>, vector<16x16x128xbf16>, vector<16x16x128xbf16>, vector<16x16x128xbf16>, vector<16x16x128xbf16>, vector<16x16x128xbf16>, vector<16x16x128xbf16>, vector<16x16x128xbf16> -> vector<16x16x1152xbf16>
    %144 = vector.shape_cast %143 : vector<16x16x1152xbf16> to vector<256x1152xbf16>
    %c0_39 = arith.constant 0 : index
    %c0_40 = arith.constant 0 : index
    %145 = vector.load %arg5[%c0_39, %c0_40] : memref<1152x128xbf16, #tpu.memory_space<vmem>>, vector<1152x128xbf16>
    %cst_41 = arith.constant dense<0.000000e+00> : vector<256x128xf32>
    %146 = tpu.matmul %144, %145, %cst_41 {dimension_numbers = #tpu.dot_dimension_numbers<[1], [0], [0], [1], [0, 0, 1, 1], [], []>} : vector<256x1152xbf16>, vector<1152x128xbf16>, vector<256x128xf32> -> vector<256x128xf32>
    %147 = vector.shape_cast %146 : vector<256x128xf32> to vector<16x16x128xf32>
    %c2_42 = arith.constant 2 : index
    %c0_43 = arith.constant 0 : index
    %148 = vector.load %arg6[%c2_42, %c0_43] : memref<4x128xf32, #tpu.memory_space<vmem>>, vector<1x128xf32>
    %149 = vector.shape_cast %148 : vector<1x128xf32> to vector<1x1x128xf32>
    %150 = vector.broadcast %149 : vector<1x1x128xf32> to vector<16x16x128xf32>
    %151 = arith.mulf %147, %150 : vector<16x16x128xf32>
    %c3_44 = arith.constant 3 : index
    %c0_45 = arith.constant 0 : index
    %152 = vector.load %arg6[%c3_44, %c0_45] : memref<4x128xf32, #tpu.memory_space<vmem>>, vector<1x128xf32>
    %153 = vector.shape_cast %152 : vector<1x128xf32> to vector<1x1x128xf32>
    %154 = vector.broadcast %153 : vector<1x1x128xf32> to vector<16x16x128xf32>
    %155 = arith.addf %151, %154 : vector<16x16x128xf32>
    %156 = arith.addf %155, %44 : vector<16x16x128xf32>
    %c0_46 = arith.constant 0 : index
    %c0_47 = arith.constant 0 : index
    %c0_48 = arith.constant 0 : index
    %c0_49 = arith.constant 0 : index
    %157 = vector.load %arg7[%c0_46, %c0_47, %c0_48, %c0_49] : memref<1x16x16x128xf32, #tpu.memory_space<vmem>>, vector<1x16x16x128xf32>
    %158 = vector.shape_cast %157 : vector<1x16x16x128xf32> to vector<16x16x128xf32>
    %159 = vector.shape_cast %156 : vector<16x16x128xf32> to vector<1x16x16x128xf32>
    tpu.vector_store %arg7[%c0_46, %c0_47, %c0_48, %c0_49], %159 {strides = array<i32>} : memref<1x16x16x128xf32, #tpu.memory_space<vmem>>, vector<1x16x16x128xf32>,
    return
  }
  func.func @transform_0(%arg0: i32, %arg1: i32) -> i32 {
    %c0_i32 = arith.constant 0 : i32
    %c0_i32_0 = arith.constant 0 : i32
    return %c0_i32 : i32
  }
  func.func @transform_2(%arg0: i32, %arg1: i32) -> (i32, i32) {
    %c0_i32 = arith.constant 0 : i32
    %c0_i32_0 = arith.constant 0 : i32
    %c0_i32_1 = arith.constant 0 : i32
    return %c0_i32, %c0_i32_0 : i32, i32
  }
  func.func @transform_3(%arg0: i32, %arg1: i32) -> (i32, i32) {
    %c0_i32 = arith.constant 0 : i32
    %c0_i32_0 = arith.constant 0 : i32
    %c0_i32_1 = arith.constant 0 : i32
    return %c0_i32, %c0_i32_0 : i32, i32
  }
  func.func @transform_4(%arg0: i32, %arg1: i32) -> (i32, i32) {
    %c0_i32 = arith.constant 0 : i32
    %c0_i32_0 = arith.constant 0 : i32
    %c0_i32_1 = arith.constant 0 : i32
    return %c0_i32, %c0_i32_0 : i32, i32
  }
  func.func @transform_5(%arg0: i32, %arg1: i32) -> (i32, i32, i32, i32) {
    %c0_i32 = arith.constant 0 : i32
    %c0_i32_0 = arith.constant 0 : i32
    %c0_i32_1 = arith.constant 0 : i32
    return %arg0, %arg1, %c0_i32, %c0_i32_0 : i32, i32, i32, i32
  }
}

</mosaic_0001>

<bundles_post_ra>
// kernel: tpu_custom_call.1
= control target key start
LH: loop header
LB: loop body
LE: loop exit
PB: predicated region body
PF: predicated region fallthrough
CT: control target
= control target key end

     0   :  { %s10014_s0 = inlined_call_operand.hbm [shape: f32[6], index: 0, kind: input, shape index: {}]   ;;  %s10015_s1 = inlined_call_operand.hbm [shape: f32[2,20,16,128], index: 1, kind: input, shape index: {}]   ;;  %s10016_s2 = inlined_call_operand.hbm [shape: bf16[1152,128], index: 2, kind: input, shape index: {}]   ;;  %s10017_s3 = inlined_call_operand.hbm [shape: bf16[1152,128], index: 3, kind: input, shape index: {}]   ;;  %s10018_s4 = inlined_call_operand.vmem [shape: f32[4,128], index: 4, kind: input, shape index: {}]   ;;  %s10019_s5 = inlined_call_operand.hbm [shape: f32[2,16,16,128], index: 5, kind: output, shape index: {}]  }
   0x1   :  { %10067 = sst [smem:[#allocation82_spill]] %s10014_s0 }
   0x2   :  { %10068 = sst [smem:[#allocation83_spill]] %s10016_s2 }
   0x3   :  { %10069 = sst [smem:[#allocation84_spill]] %s10017_s3 }
   0x4   :  { %10 = vsyncpa [#allocation7], 0 }
   0x5   :  { %11 = vsyncpa [#allocation5], 0 }
   0x6   :  { %12 = vsyncpa [#allocation10], 0 }
   0x7   :  { %13 = vsyncpa [#allocation6], 0 }
   0x8   :  { %15 = vsyncpa [#allocation6 + $0x1], 0  ;;  %s6443_s18 = smov 0   ;;  %s6445_s19 = smov 0  }
   0x9   :  { %s6447_s20 = smov 0   ;;  %s6449_s21 = smov 0  }
   0xa   :  { %s6451_s22 = smov 0   ;;  %s6453_s23 = smov 0  }
   0xb LB: > { %10070 = sst [smem:[#allocation23_spill]] %s6395_s22  ;;  %s4664_s24 = sadd.s32 4294967295, %s6399_s23   ;;  %s6399_s23 = sphi %s6453_s23, %s21_s23   ;;  %s6395_s22 = sphi %s6451_s22, %s10427_s22   ;;  %s6391_s21 = sphi %s6449_s21, %s10426_s21   ;;  %s6387_s20 = sphi %s6447_s20, %s10430_s20   ;;  %s6383_s19 = sphi %s6445_s19, %s10429_s19   ;;  %s6379_s18 = sphi %s6443_s18, %s10428_s18  }
   0xc   : > { %s4665_s25 = sadd.s32 4294967294, %s6399_s23   ;;  %s33_s26 = sadd.s32 1, %s6395_s22 }
   0xd   : > { %s126_s27 = sadd.s32 1, %s6387_s20  ;;  %p35_p0 = scmp.ge.s32.totalorder %s33_s26, 2 }
   0xe   : > { %p136_p1 = scmp.ne.s32.totalorder %s6387_s20, %s6383_s19  ;;  %p137_p2 = scmp.eq.s32.totalorder %s4664_s24, 1 }
   0xf   : > { %p142_p3 = scmp.ne.s32.totalorder %s6383_s19, %s6379_s18  ;;  %s10432_s26 = smov (%p35_p0, %s33_s26), 0 }
  0x10   : > { %10071 = sst [smem:[#allocation24_spill]] %s10432_s26  ;;  %p6483_p4 = por %p137_p2, %p136_p1 }
  0x11   : > { %p143_p5 = scmp.eq.s32.totalorder %s4665_s25, 1  ;;  %s121_s29 = ssub.s32 %s6395_s22, %s10432_s26 }
  0x12   : > { %p4666_p6 = scmp.ge.s32.totalorder %s6399_s23, 1  ;;  %p124_p7 = scmp.eq.s32.totalorder %s121_s29, 0 }
  0x13   : > { %p6490_p8 = por %p143_p5, %p142_p3  ;;  %p150_p9 = scmp.lt.s32.totalorder %s6399_s23, 3 }
  0x14   : > { %s6496_s6 = scalar_select %p124_p7, %s6387_s20, %s126_s27  }
  0x15   : > { %s10073_s30 = scalar_select %p6490_p8, 1, 0 }
  0x16   : > { %p6498_p10 = pnand %p4666_p6, %p150_p9  ;;  %p6502_p11 = scmp.eq.s32.totalorder %s4664_s24, 0 }
  0x17   : > { %s6401_s9 = smov [#allocation8]   ;;  %s6402_s12 = smov [#allocation9]  }
  0x18   : > { %p5965_p12 = pneg %p6498_p10  ;;  %s171_s10 = sshll.u32 %s6401_s9, 4  ;;  %s172_s10 = int_to_ptr.vmem [resolvable:$true] %s171_s10 }
  0x19   : > { %s184_s13 = sshll.u32 %s6402_s12, 4  ;;  %s6403_s14 = smov [#allocation4]   ;;  %s185_s13 = int_to_ptr.vmem [resolvable:$true] %s184_s13 }
  0x1a   : > { %p6510_p13 = pnand %p6502_p11, %p5965_p12  ;;  %s10077_s0 = sld [smem:[#allocation82_spill]] }
  0x1b   : > { %s6246_s17 = scalar_lea.vmem %s172_s10, 9216  ;;  %p6254_p5 = scmp.lt.s32.totalorder %s172_s10, %s172_s10 }
  0x1c   : > { %p6237_p0 = pneg %p6510_p13  ;;  %p6247_p1 = scmp.ne.s32.totalorder %s172_s10, %s6246_s17 }
  0x1d   : > { %p6255_p6 = scmp.lt.s32.totalorder %s6246_s17, %s6246_s17 }
  0x1e   : > { %p6249_p2 = pnand %p6247_p1, %p6237_p0 }
  0x1f   : > { %p6256_p7 = por %p6255_p6, %p6254_p5 }
  0x20   : > { %5968 = dma.hbm_to_smem (!%p6510_p13), %s10077_s0, 16, %s6403_s14, [#allocation7]  }
  0x21   : > { %p6250_p3 = pneg %p6249_p2 }
  0x23   : > { %p6257_p9 = pnand %p6256_p7, %p6250_p3 }
  0x25   : > { %6260 = shalt.err (!%p6257_p9)
}
  0x26   : > { %s6404_s24 = smov 64   ;;  %s6405_s25 = smov 4  }
  0x27   : > { %s10078_s2 = sld [smem:[#allocation83_spill]]  ;;  %s6272_s9 = scalar_lea.vmem %s185_s13, 9216 }
  0x28   : > { %p6273_p12 = scmp.ne.s32.totalorder %s185_s13, %s6272_s9  ;;  %p6280_p8 = scmp.lt.s32.totalorder %s185_s13, %s185_s13 }
  0x29   : > { %p6281_p5 = scmp.lt.s32.totalorder %s6272_s9, %s6272_s9 }
  0x2a   : > { %p6275_p1 = pnand %p6273_p12, %p6237_p0 }
  0x2b   : > { %p6282_p3 = por %p6281_p5, %p6280_p8 }
  0x2c   : > { %p6276_p2 = pneg %p6275_p1 }
  0x2d   : > { %5971 = dma.hbm_to_vmem [thread:$0]  (!%p6510_p13), %s10078_s2, 9216, %s172_s10, [#allocation5], %s6404_s24, %s6404_s24, %s6405_s25  }
  0x2e   : > { %p6283_p6 = pnand %p6282_p3, %p6276_p2 }
  0x30   : > { %6286 = shalt.err (!%p6283_p6)
}
  0x31   : > { %s10079_s3 = sld [smem:[#allocation84_spill]] }
  0x33   : > { %203 = sbr.rel (%p6498_p10) target bundleno = 1255 (0x4e7), region = 36 }
  0x37   : > { %5974 = dma.hbm_to_vmem [thread:$0]  (!%p6510_p13), %s10079_s3, 9216, %s185_s13, [#allocation10], %s6404_s24, %s6404_s24, %s6405_s25  }
  0x38   : > { %6360 = dma.done.wait (%p6502_p11), [#allocation7], 16  }
  0x39   : > { %6362 = vsyncadd (%p6502_p11), [#allocation7], 4294967280 }
  0x3a   : > { %6364 = dma.done.wait (%p6502_p11), [#allocation5], 9216  }
  0x3b   : > { %6366 = vsyncadd (%p6502_p11), [#allocation5], 4294958080 }
  0x3c   : > { %6368 = dma.done.wait (%p6502_p11), [#allocation10], 9216  }
  0x3d   : > { %6370 = vsyncadd (%p6502_p11), [#allocation10], 4294958080 }
  0x3e   : > { %217 = sfence }
  0x3f   : > { %s10020_s7 = sand.u32 1, %s6383_s19   ;;  %s6552_s10 = sld [smem:[#allocation4]] }
  0x40   : > { %s4674_s11 = sshll.u32 %s10020_s7, 8  ;;  %s6556_s13 = sld [smem:[#allocation4 + $0x1]] }
  0x41   : > { %s6558_s15 = sld [smem:[#allocation4 + $0x2]]  ;;  %s4839_s17 = smul.u32 5120, %s6391_s21 }
  0x42   : > { %s6560_s16 = sld [smem:[#allocation4 + $0x3]]  ;;  %s6406_s9 = smov [#allocation2]  }
  0x43   : > { %s6563_s24 = sld [smem:[#allocation4 + $0x4]]  ;;  %s251_s29 = scalar_lea.hbm %s10015_s1, %s4839_s17 }
  0x44   : > { %s6565_s8 = sld [smem:[#allocation4 + $0x5]]  ;;  %s262_s12 = sshll.u32 %s6406_s9, 4  ;;  %s263_s12 = int_to_ptr.vmem [resolvable:$true] %s262_s12 }
  0x45   : > { %s6287_s14 = scalar_lea.hbm %s251_s29, 5120  ;;  %s6289_s2 = scalar_lea.hbm %s10015_s1, 10240 }
  0x46   : > { %p6288_p8 = scmp.ne.s32.totalorder %s251_s29, %s6287_s14  ;;  %p6290_p10 = scmp.lt.s32.totalorder %s251_s29, %s10015_s1 }
  0x47   : > { %p6291_p11 = scmp.lt.s32.totalorder %s6289_s2, %s6287_s14 }
  0x49   : > { %p6292_p13 = por %p6291_p11, %p6290_p10 }
  0x4b   : > { %p6293_p0 = pnand %p6292_p13, %p6288_p8 }
  0x4d   : > { %6296 = shalt.err (!%p6293_p0)  }
  0x4e   : > { %s6297_s22 = scalar_lea.vmem %s263_s12, 5120  ;;  %s6301_s17 = scalar_lea.vmem %s263_s12, 10240 }
  0x4f   : > { %p6298_p7 = scmp.ne.s32.totalorder %s263_s12, %s6297_s22  ;;  %p6302_p9 = scmp.lt.s32.totalorder %s263_s12, %s263_s12 }
  0x50   : > { %p6303_p12 = scmp.lt.s32.totalorder %s6301_s17, %s6297_s22 }
  0x52   : > { %p6304_p1 = por %p6303_p12, %p6302_p9 }
  0x54   : > { %p6305_p2 = pnand %p6304_p1, %p6298_p7 }
  0x56   : > { %6308 = shalt.err (!%p6305_p2)  }
  0x57   : > { %265 = dma.hbm_to_vmem [thread:$0]  %s251_s29, 5120, %s263_s12, [#allocation3] }
  0x58   : > { %s6576_s25 = scalar_lea.vmem [#allocation11], %s4674_s11 }
  0x59   : > { %6371 = dma.done.wait [#allocation3], 5120 }
  0x5a   : > { %6372 = vsyncadd [#allocation3], 4294962176  ;;  %v6407_v0 = vmov 0   ;;  %v6045_v1 = vld [vmem:[#allocation8 + $0x38] sm:$0xff]   ;;  %v6047_v3 = vld [vmem:[#allocation8 + $0x30] sm:$0xff]   ;;  %v339_v15 = vlaneseq  ;;  %v10023_v27 = vmov 0.0  }
  0x5b   : > { %1397 = vmatprep.subr.bf16.mxu0 %v6407_v0  ;;  %1574 = vmatprep.subr.bf16.mxu1 %v6407_v0  ;;  %v6046_v2 = vld [vmem:[#allocation8 + $0xb8] sm:$0xff]   ;;  %v6048_v4 = vld [vmem:[#allocation8 + $0xb0] sm:$0xff]   ;;  %v6049_v5 = vld [vmem:[#allocation8 + $0x28] sm:$0xff]   ;;  %s2473_s26 = ssub.f32 0.0, %s6560_s16  ;;  %s4840_s29 = sshll.u32 %s6391_s21, 12 }
  0x5c   : > { %1398 = vmatpush1.bf16.msra.mxu0 %v6045_v1  ;;  %1575 = vmatpush1.bf16.msra.mxu1 %v6046_v2  ;;  %v6050_v6 = vld [vmem:[#allocation8 + $0xa8] sm:$0xff]   ;;  %v6051_v7 = vld [vmem:[#allocation8 + $0x20] sm:$0xff]   ;;  %v6053_v9 = vld [vmem:[#allocation8 + $0x18] sm:$0xff]   ;;  %v6593_v18 = vshrl.u32 %v339_v15, 7  ;;  %s4536_s9 = sshll.u32 %s6576_s25, 4  ;;  %s9961_s17 = scalar_lea.hbm %s10019_s5, %s4840_s29  ;;  %s9963_s9 = int_to_ptr.vmem [resolvable:$true] %s4536_s9 }
  0x5d   : > { %1399 = vmatprep.subr.bf16.mxu0 %v6407_v0  ;;  %1576 = vmatprep.subr.bf16.mxu1 %v6407_v0  ;;  %v6052_v8 = vld [vmem:[#allocation8 + $0xa0] sm:$0xff]   ;;  %v6054_v10 = vld [vmem:[#allocation8 + $0x98] sm:$0xff]   ;;  %v6055_v11 = vld [vmem:[#allocation8 + $0x10] sm:$0xff]   ;;  %s10424_s0 = sand.u32 1, %s6383_s19   ;;  %s6309_s2 = scalar_lea.vmem %s9963_s9, 4096 }
  0x5e   : > { %v6056_v12 = vld [vmem:[#allocation8 + $0x90] sm:$0xff]   ;;  %v6057_v13 = vld [vmem:[#allocation8 + $0x8] sm:$0xff]   ;;  %v6059_v16 = vld [vmem:[#allocation8] sm:$0xff]   ;;  %vm342_vm0 = vcmp.gt.s32.totalorder %v6593_v18, 0  ;;  %vm555_vm1 = vcmp.lt.s32.totalorder %v6593_v18, 1  ;;  %v341_v43 = vadd.s32 8, %v6593_v18  ;;  %p6310_p5 = scmp.ne.s32.totalorder %s9963_s9, %s6309_s2 }
  0x5f   : > { %v6058_v14 = vld [vmem:[#allocation8 + $0x88] sm:$0xff]   ;;  %v6060_v17 = vld [vmem:[#allocation8 + $0x80] sm:$0xff]   ;;  %v6061_v19 = vld [vmem:[#allocation8 + $0x78] sm:$0xff]   ;;  %v6611_v28 = vsel %vm342_vm0, 1.0, %v10023_v27  ;;  %vm700_vm2 = vcmp.lt.s32.totalorder %v6593_v18, 7  ;;  %s9969_s21 = scalar_lea.sflag [#allocation6], %s10424_s0 }
  0x60   : > { %1400 = vmatpush1.bf16.msra.mxu0 %v6047_v3  ;;  %1577 = vmatpush1.bf16.msra.mxu1 %v6048_v4  ;;  %v6062_v20 = vld [vmem:[#allocation8 + $0xf8] sm:$0xff]   ;;  %v6599_v21 = vld [vmem:[#allocation2] sm:$0xff]  ;;  %v6601_v22 = vld [vmem:[#allocation2 + $0x8] sm:$0xff]  ;;  %vm349_vm3 = vcmp.lt.s32.totalorder %v341_v43, 15  ;;  %p6311_p3 = pnand %p6310_p5, %p6483_p4  ;;  %s6410_s3 = smov [#allocation11]  }
  0x61   : > { %1401 = vmatprep.subr.bf16.mxu0 %v6407_v0  ;;  %1578 = vmatprep.subr.bf16.mxu1 %v6407_v0  ;;  %v6603_v23 = vld [vmem:[#allocation2 + $0x10] sm:$0xff]  ;;  %v646_v24 = vpack.c.bf16 %v6601_v22, %v6599_v21  ;;  %v6607_v25 = vld [vmem:[#allocation2 + $0x18] sm:$0xff]  ;;  %v6065_v35 = vld [vmem:[#allocation8 + $0x68] sm:$0xff]   ;;  %v519_v47 = vrot.slane %v6599_v21, 7  ;;  %v537_v48 = vrot.slane %v6601_v22, 7  ;;  %v664_v49 = vrot.slane %v6599_v21, 1 }
  0x62   : > { %v6063_v26 = vld [vmem:[#allocation8 + $0x70] sm:$0xff]   ;;  %v520_v29 = vrot.slane %v6603_v23, 7  ;;  %v538_v30 = vrot.slane %v6607_v25, 7  ;;  %v6066_v36 = vld [vmem:[#allocation8 + $0xe8] sm:$0xff]   ;;  %v6067_v38 = vld [vmem:[#allocation8 + $0x60] sm:$0xff]   ;;  %v682_v50 = vrot.slane %v6601_v22, 1  ;;  %p6312_p6 = pneg %p6311_p3 }
  0x63   : > { %v6064_v31 = vld [vmem:[#allocation8 + $0xf0] sm:$0xff]   ;;  %1429 = vmatprep.mubr.bf16.mxu0 %v646_v24  ;;  %v6068_v39 = vld [vmem:[#allocation8 + $0xe0] sm:$0xff]   ;;  %v6069_v40 = vld [vmem:[#allocation8 + $0x58] sm:$0xff]   ;;  %v574_v54 = vsel %vm555_vm1, %v537_v48, %v519_v47  ;;  %v6649_v56 = vsel %vm349_vm3, 1.0, %v10023_v27  ;;  %v556_v63 = vsel %vm555_vm1, %v519_v47, %v537_v48  ;;  %s6313_s22 = sshll.u32 %s6410_s3, 4  ;;  %s6314_s22 = int_to_ptr.vmem [resolvable:$false] %s6313_s22 }
  0x64   : > { %1402 = vmatpush1.bf16.msra.mxu0 %v6049_v5  ;;  %1579 = vmatpush1.bf16.msra.mxu1 %v6050_v6  ;;  %v557_v32 = vsel %vm555_vm1, %v520_v29, %v538_v30  ;;  %v575_v33 = vsel %vm555_vm1, %v538_v30, %v520_v29  ;;  %v6070_v41 = vld [vmem:[#allocation8 + $0xd8] sm:$0xff]   ;;  %v6071_v42 = vld [vmem:[#allocation8 + $0x50] sm:$0xff]   ;;  %v6632_v45 = vld [vmem:[#allocation2 + $0x20] sm:$0xff]  ;;  %v719_v57 = vsel %vm700_vm2, %v682_v50, %v664_v49  ;;  %v665_v5 = vrot.slane %v6603_v23, 1  ;;  %p6316_p8 = scmp.lt.s32.totalorder %s9963_s9, %s6314_s22 }
  0x65   : > { %1403 = vmatprep.subr.bf16.mxu0 %v6407_v0  ;;  %1580 = vmatprep.subr.bf16.mxu1 %v6407_v0  ;;  %v594_v34 = vmul.f32 %v6611_v28, %v575_v33  ;;  %v6072_v44 = vld [vmem:[#allocation8 + $0xd0] sm:$0xff]   ;;  %v6634_v46 = vld [vmem:[#allocation2 + $0x28] sm:$0xff]  ;;  %v521_v51 = vrot.slane %v6632_v45, 7  ;;  %v6075_v58 = vld [vmem:[#allocation8 + $0x40] sm:$0xff]   ;;  %v592_v60 = vmul.f32 %v6611_v28, %v574_v54  ;;  %v738_v1 = vmul.f32 %v6649_v56, %v719_v57 }
  0x66   : > { %v539_v52 = vrot.slane %v6634_v46, 7  ;;  %v6073_v53 = vld [vmem:[#allocation8 + $0x48] sm:$0xff]   ;;  %v6657_v61 = vld [vmem:[#allocation2 + $0x30] sm:$0xff]  ;;  %v6659_v62 = vld [vmem:[#allocation2 + $0x38] sm:$0xff]  ;;  %v701_v3 = vsel %vm700_vm2, %v664_v49, %v682_v50  ;;  %v683_v6 = vrot.slane %v6607_v25, 1 }
  0x67   : > { %v6623_v37 = vpack.c.bf16 %v557_v32, %v594_v34  ;;  %v6074_v55 = vld [vmem:[#allocation8 + $0xc8] sm:$0xff]   ;;  %v6076_v2 = vld [vmem:[#allocation8 + $0xc0] sm:$0xff]   ;;  %v6088_v32 = vld [vmem:[#allocation8 + $0x1b0] sm:$0xff]   ;;  %v6709_v34 = vpack.c.bf16 %v6634_v46, %v6632_v45  ;;  %v685_v47 = vrot.slane %v6659_v62, 1 }
  0x68   : > { %1404 = vmatpush1.bf16.msra.mxu0 %v6051_v7  ;;  %1581 = vmatpush1.bf16.msra.mxu1 %v6052_v8  ;;  %v576_v59 = vsel %vm555_vm1, %v539_v52, %v521_v51  ;;  %v558_v7 = vsel %vm555_vm1, %v521_v51, %v539_v52  ;;  %v522_v8 = vrot.slane %v6657_v61, 7  ;;  %v720_v15 = vsel %vm700_vm2, %v683_v6, %v665_v5  ;;  %v6080_v48 = vld [vmem:[#allocation8 + $0x120] sm:$0xff]   ;;  %v6081_v54 = vld [vmem:[#allocation8 + $0x118] sm:$0xff]  }
  0x69   : > { %1405 = vmatprep.subr.bf16.mxu0 %v6407_v0  ;;  %1582 = vmatprep.subr.bf16.mxu1 %v6407_v0  ;;  %v596_v4 = vmul.f32 %v6611_v28, %v576_v59  ;;  %v702_v21 = vsel %vm700_vm2, %v665_v5, %v683_v6  ;;  %v740_v22 = vmul.f32 %v6649_v56, %v720_v15  ;;  %v6091_v51 = vld [vmem:[#allocation8 + $0x1a0] sm:$0xff]   ;;  %v6191_v18 = vld [vmem:[#allocation9 + $0x238] sm:$0xff]  }
  0x6a   : > { %1606 = vmatprep.mubr.bf16.mxu1 %v6623_v37  ;;  %v6751_v59 = vld [vmem:[#allocation2 + $0x60] sm:$0xff] }
  0x6b   : > { %v6705_v33 = vpack.c.bf16 %v740_v22, %v702_v21  ;;  %v525_v5 = vrot.slane %v6751_v59, 7  ;;  %v6083_v21 = vld [vmem:[#allocation8 + $0x108] sm:$0xff]  }
  0x6c   : > { %1406 = vmatpush1.bf16.msra.mxu0 %v6053_v9  ;;  %1583 = vmatpush1.bf16.msra.mxu1 %v6054_v10  ;;  %v540_v9 = vrot.slane %v6659_v62, 7  ;;  %v628_v10 = vpack.c.bf16 %v556_v63, %v592_v60  ;;  %v6753_v60 = vld [vmem:[#allocation2 + $0x68] sm:$0xff] }
  0x6d   : > { %1407 = vmatprep.subr.bf16.mxu0 %v6407_v0  ;;  %1584 = vmatprep.subr.bf16.mxu1 %v6407_v0  ;;  %v543_v6 = vrot.slane %v6753_v60, 7 }
  0x6e   : > { %v559_v30 = vsel %vm555_vm1, %v522_v8, %v540_v9 }
  0x70   : > { %1408 = vmatpush1.bf16.msra.mxu0 %v6055_v11  ;;  %1585 = vmatpush1.bf16.msra.mxu1 %v6056_v12  ;;  %v773_v11 = vpack.c.bf16 %v738_v1, %v701_v3  ;;  %v6077_v12 = vld [vmem:[#allocation8 + $0x138] sm:$0xff]   ;;  %v6082_v1 = vld [vmem:[#allocation8 + $0x110] sm:$0xff]  }
  0x71   : > { %1409 = vmatprep.subr.bf16.mxu0 %v6407_v0  ;;  %1586 = vmatprep.subr.bf16.mxu1 %v6407_v0 }
  0x74   : > { %1410 = vmatpush1.bf16.msra.mxu0 %v6057_v13  ;;  %1587 = vmatpush1.bf16.msra.mxu1 %v6058_v14  ;;  %v6678_v13 = vpack.c.bf16 %v6607_v25, %v6603_v23  ;;  %v6680_v14 = vpack.c.bf16 %v558_v7, %v596_v4  ;;  %v6078_v23 = vld [vmem:[#allocation8 + $0x130] sm:$0xff]   ;;  %v666_v25 = vrot.slane %v6632_v45, 1  ;;  %v667_v45 = vrot.slane %v6657_v61, 1  ;;  %v6767_v7 = vld [vmem:[#allocation2 + $0x78] sm:$0xff] }
  0x75   : > { %1411 = vmatprep.subr.bf16.mxu0 %v6407_v0  ;;  %1588 = vmatprep.subr.bf16.mxu1 %v6407_v0 }
  0x76   : > { %v722_v57 = vsel %vm700_vm2, %v685_v47, %v667_v45 }
  0x77   : > { %v744_v3 = vmul.f32 %v6649_v56, %v722_v57  ;;  %v6828_v57 = vld [vmem:[#allocation2 + $0xb8] sm:$0xff] }
  0x78   : > { %1412 = vmatpush1.bf16.msra.mxu0 %v6059_v16  ;;  %1589 = vmatpush1.bf16.msra.mxu1 %v6060_v17  ;;  %v6684_v16 = vld [vmem:[#allocation2 + $0x40] sm:$0xff]  ;;  %v577_v17 = vsel %vm555_vm1, %v540_v9, %v522_v8  ;;  %v704_v9 = vsel %vm700_vm2, %v667_v45, %v685_v47  ;;  %v689_v45 = vrot.slane %v6767_v7, 1 }
  0x79   : > { %1413 = vmatprep.subr.bf16.mxu0 %v6407_v0  ;;  %1590 = vmatprep.subr.bf16.mxu1 %v6407_v0  ;;  %v598_v24 = vmul.f32 %v6611_v28, %v577_v17  ;;  %v523_v29 = vrot.slane %v6684_v16, 7  ;;  %v668_v63 = vrot.slane %v6684_v16, 1  ;;  %v6769_v8 = vld [vmem:[#allocation2 + $0x80] sm:$0xff]  ;;  %v6780_v17 = vld [vmem:[#allocation2 + $0x88] sm:$0xff]  ;;  %v6783_v22 = vpack.c.bf16 %v744_v3, %v704_v9  ;;  %v6098_v9 = vld [vmem:[#allocation8 + $0x1f8] sm:$0xff]  }
  0x7c   : > { %1414 = vmatpush2.bf16.msra.mxu0 %v6061_v19  ;;  %1591 = vmatpush2.bf16.msra.mxu1 %v6062_v20  ;;  %v6688_v19 = vld [vmem:[#allocation2 + $0x48] sm:$0xff]  ;;  %v6087_v20 = vld [vmem:[#allocation8 + $0x1b8] sm:$0xff]  }
  0x7d   : > { %1415 = vmatprep.subr.bf16.mxu0 %v6407_v0  ;;  %1592 = vmatprep.subr.bf16.mxu1 %v6407_v0 }
  0x80   : > { %1416 = vmatpush2.bf16.msra.mxu0 %v6063_v26  ;;  %1593 = vmatpush2.bf16.msra.mxu1 %v6064_v31  ;;  %v684_v26 = vrot.slane %v6634_v46, 1  ;;  %v541_v31 = vrot.slane %v6688_v19, 7 }
  0x81   : > { %1417 = vmatprep.subr.bf16.mxu0 %v6407_v0  ;;  %1594 = vmatprep.subr.bf16.mxu1 %v6407_v0 }
  0x82   : > { %v703_v43 = vsel %vm700_vm2, %v666_v25, %v684_v26  ;;  %v560_v50 = vsel %vm555_vm1, %v523_v29, %v541_v31 }
  0x84   : > { %1418 = vmatpush2.bf16.msra.mxu0 %v6065_v35  ;;  %1595 = vmatpush2.bf16.msra.mxu1 %v6066_v36  ;;  %v6079_v35 = vld [vmem:[#allocation8 + $0x128] sm:$0xff]   ;;  %v6711_v36 = vpack.c.bf16 %v559_v30, %v598_v24  ;;  %v544_v30 = vrot.slane %v6767_v7, 7 }
  0x85   : > { %1419 = vmatprep.subr.bf16.mxu0 %v6407_v0  ;;  %1596 = vmatprep.subr.bf16.mxu1 %v6407_v0 }
  0x88   : > { %1420 = vmatpush2.bf16.msra.mxu0 %v6067_v38  ;;  %1597 = vmatpush2.bf16.msra.mxu1 %v6068_v39  ;;  %v721_v38 = vsel %vm700_vm2, %v684_v26, %v666_v25  ;;  %v6716_v39 = vld [vmem:[#allocation2 + $0x50] sm:$0xff] }
  0x89   : > { %1421 = vmatprep.subr.bf16.mxu0 %v6407_v0  ;;  %1598 = vmatprep.subr.bf16.mxu1 %v6407_v0  ;;  %v6793_v26 = vld [vmem:[#allocation2 + $0x90] sm:$0xff] }
  0x8c   : > { %1422 = vmatpush2.bf16.msra.mxu0 %v6069_v40  ;;  %1599 = vmatpush2.bf16.msra.mxu1 %v6070_v41  ;;  %v578_v40 = vsel %vm555_vm1, %v541_v31, %v523_v29  ;;  %v6720_v41 = vld [vmem:[#allocation2 + $0x58] sm:$0xff]  ;;  %v670_v31 = vrot.slane %v6751_v59, 1 }
  0x8d   : > { %1423 = vmatprep.subr.bf16.mxu0 %v6407_v0  ;;  %1600 = vmatprep.subr.bf16.mxu1 %v6407_v0  ;;  %v600_v46 = vmul.f32 %v6611_v28, %v578_v40  ;;  %v542_v49 = vrot.slane %v6720_v41, 7  ;;  %v6795_v29 = vld [vmem:[#allocation2 + $0x98] sm:$0xff]  ;;  %v6807_v40 = vld [vmem:[#allocation2 + $0xa0] sm:$0xff] }
  0x8e   : > { %v529_v3 = vrot.slane %v6807_v40, 7 }
  0x90   : > { %1424 = vmatpush2.bf16.msra.mxu0 %v6071_v42  ;;  %1601 = vmatpush2.bf16.msra.mxu1 %v6072_v44  ;;  %v6090_v42 = vld [vmem:[#allocation8 + $0x1a8] sm:$0xff]   ;;  %v742_v44 = vmul.f32 %v6649_v56, %v721_v38  ;;  %v6084_v38 = vld [vmem:[#allocation8 + $0x100] sm:$0xff]  }
  0x91   : > { %1425 = vmatprep.subr.bf16.mxu0 %v6407_v0  ;;  %1602 = vmatprep.subr.bf16.mxu1 %v6407_v0 }
  0x92   : > { %v6738_v52 = vpack.c.bf16 %v742_v44, %v703_v43 }
  0x94   : > { %1426 = vmatpush2.bf16.msra.mxu0 %v6073_v53  ;;  %1603 = vmatpush2.bf16.msra.mxu1 %v6074_v55  ;;  %v6742_v53 = vpack.c.bf16 %v6659_v62, %v6657_v61  ;;  %v6745_v55 = vpack.c.bf16 %v560_v50, %v600_v46  ;;  %v6757_v61 = vld [vmem:[#allocation2 + $0x70] sm:$0xff]  ;;  %v686_v62 = vrot.slane %v6688_v19, 1  ;;  %v6814_v46 = vld [vmem:[#allocation2 + $0xa8] sm:$0xff]  ;;  %v562_v50 = vsel %vm555_vm1, %v525_v5, %v543_v6 }
  0x95   : > { %1427 = vmatprep.subr.bf16.mxu0 %v6407_v0  ;;  %1604 = vmatprep.subr.bf16.mxu1 %v6407_v0  ;;  %v526_v15 = vrot.slane %v6757_v61, 7  ;;  %v671_v44 = vrot.slane %v6757_v61, 1 }
  0x96   : > { %v723_v25 = vsel %vm700_vm2, %v686_v62, %v668_v63  ;;  %v705_v47 = vsel %vm700_vm2, %v668_v63, %v686_v62  ;;  %v6085_v63 = vld [vmem:[#allocation8 + $0x178] sm:$0xff]  }
  0x97   : > { %v746_v43 = vmul.f32 %v6649_v56, %v723_v25 }
  0x98   : > { %1428 = vmatpush2.bf16.msra.mxu0 %v6075_v58  ;;  %1605 = vmatpush2.bf16.msra.mxu1 %v6076_v2  ;;  %v6092_v2 = vld [vmem:[#allocation8 + $0x198] sm:$0xff]  }
  0x99   : > { %1751 = vmatprep.subr.bf16.mxu0 %v6407_v0  ;;  %1928 = vmatprep.subr.bf16.mxu1 %v6407_v0  ;;  %v6831_v62 = vpack.c.bf16 %v746_v43, %v705_v47  ;;  %v674_v43 = vrot.slane %v6807_v40, 1  ;;  %v692_v47 = vrot.slane %v6814_v46, 1 }
  0x9b   : > { %1430 = vmatmul.mubr.bf16.vlgmr.msra.gmra.mxu0 %v628_v10  ;;  %1607 = vmatmul.mubr.bf16.vlgmr.msra.gmra.mxu1 %v773_v11  ;;  %v669_v11 = vrot.slane %v6716_v39, 1 }
  0x9c   : > { %1752 = vmatpush1.bf16.msra.mxu0 %v6077_v12  ;;  %1437 = vmatprep.mubr.bf16.mxu0 %v6678_v13  ;;  %v687_v12 = vrot.slane %v6720_v41, 1 }
  0x9d   : > { %1614 = vmatprep.mubr.bf16.mxu1 %v6680_v14  ;;  %1753 = vmatprep.subr.bf16.mxu0 %v6407_v0 }
  0x9e   : > { %1929 = vmatpush1.bf16.msra.mxu1 %v6087_v20  ;;  %v6094_v20 = vld [vmem:[#allocation8 + $0x190] sm:$0xff]  }
  0x9f   : > { %1930 = vmatprep.subr.bf16.mxu1 %v6407_v0 }
  0xa0   : > { %1754 = vmatpush1.bf16.msra.mxu0 %v6078_v23  ;;  %v6787_v23 = vpack.c.bf16 %v6688_v19, %v6684_v16  ;;  %v527_v16 = vrot.slane %v6769_v8, 7  ;;  %v580_v19 = vsel %vm555_vm1, %v543_v6, %v525_v5  ;;  %v724_v5 = vsel %vm700_vm2, %v687_v12, %v669_v11 }
  0xa1   : > { %1755 = vmatprep.subr.bf16.mxu0 %v6407_v0  ;;  %v547_v6 = vrot.slane %v6814_v46, 7 }
  0xa2   : > { %1931 = vmatpush1.bf16.msra.mxu1 %v6088_v32  ;;  %v688_v32 = vrot.slane %v6753_v60, 1 }
  0xa3   : > { %1438 = vmatmul.mubr.bf16.gmra.mxu0 %v6623_v37  ;;  %1615 = vmatmul.mubr.bf16.gmra.mxu1 %v6705_v33  ;;  %v524_v37 = vrot.slane %v6716_v39, 7 }
  0xa4   : > { %1445 = vmatprep.mubr.bf16.mxu0 %v6709_v34  ;;  %1622 = vmatprep.mubr.bf16.mxu1 %v6711_v36 }
  0xa5   : > { %1756 = vmatpush1.bf16.msra.mxu0 %v6079_v35  ;;  %1932 = vmatprep.subr.bf16.mxu1 %v6407_v0  ;;  %v579_v58 = vsel %vm555_vm1, %v542_v49, %v524_v37  ;;  %v561_v10 = vsel %vm555_vm1, %v524_v37, %v542_v49  ;;  %v545_v35 = vrot.slane %v6780_v17, 7  ;;  %v528_v37 = vrot.slane %v6793_v26, 7 }
  0xa6   : > { %1757 = vmatprep.subr.bf16.mxu0 %v6407_v0  ;;  %1933 = vmatpush1.bf16.msra.mxu1 %v6090_v42  ;;  %v602_v4 = vmul.f32 %v6611_v28, %v579_v58  ;;  %v6095_v42 = vld [vmem:[#allocation8 + $0x188] sm:$0xff]   ;;  %v546_v49 = vrot.slane %v6795_v29, 7  ;;  %v6097_v58 = vld [vmem:[#allocation8 + $0x180] sm:$0xff]  }
  0xa7   : > { %1934 = vmatprep.subr.bf16.mxu1 %v6407_v0 }
  0xa8   : > { %v6789_v24 = vpack.c.bf16 %v561_v10, %v602_v4  ;;  %v581_v10 = vsel %vm555_vm1, %v544_v30, %v526_v15 }
  0xa9   : > { %1758 = vmatpush1.bf16.msra.mxu0 %v6080_v48  ;;  %v604_v48 = vmul.f32 %v6611_v28, %v580_v19  ;;  %v548_v19 = vrot.slane %v6828_v57, 7 }
  0xaa   : > { %1759 = vmatprep.subr.bf16.mxu0 %v6407_v0  ;;  %1935 = vmatpush1.bf16.msra.mxu1 %v6091_v51  ;;  %v672_v51 = vrot.slane %v6769_v8, 1 }
  0xab   : > { %1446 = vmatmul.mubr.bf16.gmra.mxu0 %v6680_v14  ;;  %1623 = vmatmul.mubr.bf16.gmra.mxu1 %v6738_v52  ;;  %v6840_v4 = vpack.c.bf16 %v562_v50, %v604_v48  ;;  %v706_v48 = vsel %vm700_vm2, %v669_v11, %v687_v12  ;;  %v606_v50 = vmul.f32 %v6611_v28, %v581_v10 }
  0xac   : > { %1453 = vmatprep.mubr.bf16.mxu0 %v6742_v53  ;;  %1630 = vmatprep.mubr.bf16.mxu1 %v6745_v55  ;;  %v6886_v11 = vpack.c.bf16 %v6753_v60, %v6751_v59  ;;  %v6924_v60 = vld [vmem:[#allocation2 + $0xc0] sm:$0xff]  ;;  %v6926_v59 = vld [vmem:[#allocation2 + $0xc8] sm:$0xff] }
  0xad   : > { %1760 = vmatpush1.bf16.msra.mxu0 %v6081_v54  ;;  %1936 = vmatprep.subr.bf16.mxu1 %v6407_v0  ;;  %v6826_v54 = vld [vmem:[#allocation2 + $0xb0] sm:$0xff] }
  0xae   : > { %1761 = vmatprep.subr.bf16.mxu0 %v6407_v0  ;;  %1937 = vmatpush1.bf16.msra.mxu1 %v6092_v2  ;;  %v690_v2 = vrot.slane %v6780_v17, 1  ;;  %v530_v25 = vrot.slane %v6826_v54, 7 }
  0xaf   : > { %1938 = vmatprep.subr.bf16.mxu1 %v6407_v0 }
  0xb1   : > { %1762 = vmatpush1.bf16.msra.mxu0 %v6082_v1  ;;  %v6835_v1 = vpack.c.bf16 %v6720_v41, %v6716_v39  ;;  %v6089_v41 = vld [vmem:[#allocation8 + $0x168] sm:$0xff]  }
  0xb2   : > { %1763 = vmatprep.subr.bf16.mxu0 %v6407_v0  ;;  %1939 = vmatpush1.bf16.msra.mxu1 %v6094_v20  ;;  %v673_v20 = vrot.slane %v6793_v26, 1 }
  0xb3   : > { %1454 = vmatmul.mubr.bf16.gmra.mxu0 %v6711_v36  ;;  %1631 = vmatmul.mubr.bf16.gmra.mxu1 %v6783_v22 }
  0xb4   : > { %1461 = vmatprep.mubr.bf16.mxu0 %v6787_v23  ;;  %1638 = vmatprep.mubr.bf16.mxu1 %v6789_v24 }
  0xb5   : > { %1764 = vmatpush1.bf16.msra.mxu0 %v6083_v21  ;;  %1940 = vmatprep.subr.bf16.mxu1 %v6407_v0  ;;  %v691_v21 = vrot.slane %v6795_v29, 1 }
  0xb6   : > { %1765 = vmatprep.subr.bf16.mxu0 %v6407_v0  ;;  %1941 = vmatpush1.bf16.msra.mxu1 %v6095_v42  ;;  %v748_v42 = vmul.f32 %v6649_v56, %v724_v5  ;;  %v563_v5 = vsel %vm555_vm1, %v526_v15, %v544_v30  ;;  %v725_v15 = vsel %vm700_vm2, %v688_v32, %v670_v31  ;;  %v6101_v30 = vld [vmem:[#allocation8 + $0x1e8] sm:$0xff]  }
  0xb7   : > { %1942 = vmatprep.subr.bf16.mxu1 %v6407_v0  ;;  %v6889_v12 = vpack.c.bf16 %v563_v5, %v606_v50  ;;  %v750_v10 = vmul.f32 %v6649_v56, %v725_v15  ;;  %v564_v50 = vsel %vm555_vm1, %v527_v16, %v545_v35  ;;  %v6099_v15 = vld [vmem:[#allocation8 + $0x150] sm:$0xff]  }
  0xb8   : > { %v6882_v39 = vpack.c.bf16 %v748_v42, %v706_v48  ;;  %v6103_v48 = vld [vmem:[#allocation8 + $0x1e0] sm:$0xff]  }
  0xb9   : > { %1766 = vmatpush1.bf16.msra.mxu0 %v6084_v38  ;;  %v6086_v38 = vld [vmem:[#allocation8 + $0x170] sm:$0xff]  }
  0xba   : > { %1767 = vmatprep.subr.bf16.mxu0 %v6407_v0  ;;  %1943 = vmatpush1.bf16.msra.mxu1 %v6097_v58  ;;  %v6100_v58 = vld [vmem:[#allocation8 + $0x1f0] sm:$0xff]  }
  0xbb   : > { %1462 = vmatmul.mubr.bf16.gmra.mxu0 %v6745_v55  ;;  %1639 = vmatmul.mubr.bf16.gmra.mxu1 %v6831_v62 }
  0xbc   : > { %1469 = vmatprep.mubr.bf16.mxu0 %v6835_v1  ;;  %1646 = vmatprep.mubr.bf16.mxu1 %v6840_v4 }
  0xbd   : > { %1768 = vmatpush2.bf16.msra.mxu0 %v6085_v63  ;;  %1944 = vmatprep.subr.bf16.mxu1 %v6407_v0  ;;  %v582_v63 = vsel %vm555_vm1, %v545_v35, %v527_v16  ;;  %v726_v16 = vsel %vm700_vm2, %v689_v45, %v671_v44  ;;  %v6104_v35 = vld [vmem:[#allocation8 + $0x1d8] sm:$0xff]  }
  0xbe   : > { %1769 = vmatprep.subr.bf16.mxu0 %v6407_v0  ;;  %1945 = vmatpush2.bf16.msra.mxu1 %v6098_v9  ;;  %v6093_v9 = vld [vmem:[#allocation8 + $0x160] sm:$0xff]   ;;  %v608_v42 = vmul.f32 %v6611_v28, %v582_v63  ;;  %v531_v63 = vrot.slane %v6924_v60, 7 }
  0xbf   : > { %1946 = vmatprep.subr.bf16.mxu1 %v6407_v0 }
  0xc0   : > { %v6935_v5 = vpack.c.bf16 %v564_v50, %v608_v42  ;;  %v6105_v42 = vld [vmem:[#allocation8 + $0x1d0] sm:$0xff]   ;;  %v584_v50 = vsel %vm555_vm1, %v547_v6, %v529_v3 }
  0xc1   : > { %1770 = vmatpush2.bf16.msra.mxu0 %v6086_v38  ;;  %v707_v38 = vsel %vm700_vm2, %v670_v31, %v688_v32  ;;  %v6096_v31 = vld [vmem:[#allocation8 + $0x158] sm:$0xff]  }
  0xc2   : > { %1771 = vmatprep.subr.bf16.mxu0 %v6407_v0  ;;  %1947 = vmatpush2.bf16.msra.mxu1 %v6100_v58  ;;  %v6928_v32 = vpack.c.bf16 %v750_v10, %v707_v38  ;;  %v6932_v58 = vpack.c.bf16 %v6767_v7, %v6757_v61  ;;  %v708_v10 = vsel %vm700_vm2, %v671_v44, %v689_v45  ;;  %v6102_v7 = vld [vmem:[#allocation8 + $0x148] sm:$0xff]  }
  0xc3   : > { %1470 = vmatmul.mubr.bf16.gmra.mxu0 %v6789_v24  ;;  %1647 = vmatmul.mubr.bf16.gmra.mxu1 %v6882_v39  ;;  %v6976_v44 = vpack.c.bf16 %v6780_v17, %v6769_v8  ;;  %v7020_v17 = vpack.c.bf16 %v6795_v29, %v6793_v26  ;;  %v729_v26 = vsel %vm700_vm2, %v692_v47, %v674_v43 }
  0xc4   : > { %1477 = vmatprep.mubr.bf16.mxu0 %v6886_v11  ;;  %1654 = vmatprep.mubr.bf16.mxu1 %v6889_v12 }
  0xc5   : > { %1772 = vmatpush2.bf16.msra.mxu0 %v6089_v41  ;;  %1948 = vmatprep.subr.bf16.mxu1 %v6407_v0  ;;  %v583_v41 = vsel %vm555_vm1, %v546_v49, %v528_v37 }
  0xc6   : > { %1773 = vmatprep.subr.bf16.mxu0 %v6407_v0  ;;  %1949 = vmatpush2.bf16.msra.mxu1 %v6101_v30  ;;  %v752_v30 = vmul.f32 %v6649_v56, %v726_v16  ;;  %v610_v38 = vmul.f32 %v6611_v28, %v583_v41  ;;  %v709_v41 = vsel %vm700_vm2, %v672_v51, %v690_v2 }
  0xc7   : > { %1950 = vmatprep.subr.bf16.mxu1 %v6407_v0 }
  0xc8   : > { %v6972_v61 = vpack.c.bf16 %v752_v30, %v708_v10  ;;  %v6108_v30 = vld [vmem:[#allocation8 + $0x1c0] sm:$0xff]   ;;  %v566_v10 = vsel %vm555_vm1, %v529_v3, %v547_v6  ;;  %v585_v3 = vsel %vm555_vm1, %v548_v19, %v530_v25  ;;  %v710_v6 = vsel %vm700_vm2, %v673_v20, %v691_v21 }
  0xc9   : > { %1774 = vmatpush2.bf16.msra.mxu0 %v6093_v9  ;;  %v549_v9 = vrot.slane %v6926_v59, 7 }
  0xca   : > { %1775 = vmatprep.subr.bf16.mxu0 %v6407_v0  ;;  %1951 = vmatpush2.bf16.msra.mxu1 %v6103_v48  ;;  %v565_v48 = vsel %vm555_vm1, %v528_v37, %v546_v49  ;;  %v727_v37 = vsel %vm700_vm2, %v690_v2, %v672_v51  ;;  %v6107_v49 = vld [vmem:[#allocation8 + $0x1c8] sm:$0xff]   ;;  %v728_v2 = vsel %vm700_vm2, %v691_v21, %v673_v20  ;;  %v7070_v20 = vld [vmem:[#allocation2 + $0xd0] sm:$0xff] }
  0xcb   : > { %1478 = vmatmul.mubr.bf16.gmra.mxu0 %v6840_v4  ;;  %1655 = vmatmul.mubr.bf16.gmra.mxu1 %v6928_v32  ;;  %v6979_v45 = vpack.c.bf16 %v565_v48, %v610_v38  ;;  %v754_v16 = vmul.f32 %v6649_v56, %v727_v37  ;;  %v614_v38 = vmul.f32 %v6611_v28, %v585_v3  ;;  %v694_v3 = vrot.slane %v6926_v59, 1 }
  0xcc   : > { %1485 = vmatprep.mubr.bf16.mxu0 %v6932_v58  ;;  %1662 = vmatprep.mubr.bf16.mxu1 %v6935_v5  ;;  %v586_v21 = vsel %vm555_vm1, %v549_v9, %v531_v63  ;;  %v711_v37 = vsel %vm700_vm2, %v674_v43, %v692_v47  ;;  %v7106_v43 = vpack.c.bf16 %v6828_v57, %v6826_v54 }
  0xcd   : > { %1776 = vmatpush2.bf16.msra.mxu0 %v6096_v31  ;;  %1952 = vmatprep.subr.bf16.mxu1 %v6407_v0  ;;  %v6106_v31 = vld [vmem:[#allocation8 + $0x140] sm:$0xff]   ;;  %v7016_v8 = vpack.c.bf16 %v754_v16, %v709_v41  ;;  %v568_v16 = vsel %vm555_vm1, %v531_v63, %v549_v9  ;;  %v7117_v9 = vld [vmem:[#allocation2 + $0xe8] sm:$0xff] }
  0xce   : > { %1777 = vmatprep.subr.bf16.mxu0 %v6407_v0  ;;  %1953 = vmatpush2.bf16.msra.mxu1 %v6104_v35  ;;  %v6998_v35 = vld [vmem:[#allocation8 + $0x238] sm:$0xff]   ;;  %v7115_v63 = vld [vmem:[#allocation2 + $0xe0] sm:$0xff] }
  0xcf   : > { %1954 = vmatprep.subr.bf16.mxu1 %v6407_v0 }
  0xd1   : > { %1778 = vmatpush2.bf16.msra.mxu0 %v6099_v15  ;;  %v612_v15 = vmul.f32 %v6611_v28, %v584_v50  ;;  %v675_v50 = vrot.slane %v6826_v54, 1 }
  0xd2   : > { %1779 = vmatprep.subr.bf16.mxu0 %v6407_v0  ;;  %1955 = vmatpush2.bf16.msra.mxu1 %v6105_v42  ;;  %v567_v42 = vsel %vm555_vm1, %v530_v25, %v548_v19  ;;  %v7078_v25 = vld [vmem:[#allocation2 + $0xd8] sm:$0xff]  ;;  %v758_v19 = vmul.f32 %v6649_v56, %v729_v26  ;;  %v7136_v26 = vpack.c.bf16 %v6926_v59, %v6924_v60 }
  0xd3   : > { %1486 = vmatmul.mubr.bf16.gmra.mxu0 %v6889_v12  ;;  %1663 = vmatmul.mubr.bf16.gmra.mxu1 %v6972_v61  ;;  %v7023_v51 = vpack.c.bf16 %v566_v10, %v612_v15  ;;  %v7062_v29 = vpack.c.bf16 %v567_v42, %v614_v38  ;;  %v551_v38 = vrot.slane %v7117_v9, 7 }
  0xd4   : > { %1493 = vmatprep.mubr.bf16.mxu0 %v6976_v44  ;;  %1670 = vmatprep.mubr.bf16.mxu1 %v6979_v45  ;;  %v7102_v41 = vpack.c.bf16 %v758_v19, %v711_v37 }
  0xd5   : > { %1780 = vmatpush2.bf16.msra.mxu0 %v6102_v7  ;;  %1956 = vmatprep.subr.bf16.mxu1 %v6407_v0  ;;  %v7060_v7 = vpack.c.bf16 %v6814_v46, %v6807_v40  ;;  %v532_v46 = vrot.slane %v7070_v20, 7  ;;  %v550_v40 = vrot.slane %v7078_v25, 7 }
  0xd6   : > { %1781 = vmatprep.subr.bf16.mxu0 %v6407_v0  ;;  %1957 = vmatpush2.bf16.msra.mxu1 %v6107_v49  ;;  %v616_v49 = vmul.f32 %v6611_v28, %v586_v21 }
  0xd7   : > { %1958 = vmatprep.subr.bf16.mxu1 %v6407_v0  ;;  %v756_v0 = vmul.f32 %v6649_v56, %v728_v2  ;;  %v676_v2 = vrot.slane %v6924_v60, 1 }
  0xd8   : > { %v7108_v47 = vpack.c.bf16 %v568_v16, %v616_v49  ;;  %v7145_v49 = vld [vmem:[#allocation2 + $0xf0] sm:$0xff]  ;;  %v677_v16 = vrot.slane %v7070_v20, 1 }
  0xd9   : > { %1782 = vmatpush2.bf16.msra.mxu0 %v6106_v31  ;;  %v7056_v48 = vpack.c.bf16 %v756_v0, %v710_v6  ;;  %v693_v31 = vrot.slane %v6828_v57, 1  ;;  %v569_v0 = vsel %vm555_vm1, %v532_v46, %v550_v40  ;;  %v533_v6 = vrot.slane %v7115_v63, 7 }
  0xda   : > { %5339 = vmatprep.subr.bf16.mxu0 %v6998_v35  ;;  %1959 = vmatpush2.bf16.msra.mxu1 %v6108_v30  ;;  %v587_v30 = vsel %vm555_vm1, %v550_v40, %v532_v46  ;;  %v731_v19 = vsel %vm700_vm2, %v694_v3, %v676_v2  ;;  %v713_v59 = vsel %vm700_vm2, %v676_v2, %v694_v3  ;;  %v695_v46 = vrot.slane %v7078_v25, 1 }
  0xdb   : > { %1494 = vmatmul.mubr.bf16.gmra.mxu0 %v6935_v5  ;;  %1671 = vmatmul.mubr.bf16.gmra.mxu1 %v7016_v8  ;;  %v730_v15 = vsel %vm700_vm2, %v693_v31, %v675_v50  ;;  %v712_v57 = vsel %vm700_vm2, %v675_v50, %v693_v31  ;;  %v618_v10 = vmul.f32 %v6611_v28, %v587_v30  ;;  %v7147_v50 = vld [vmem:[#allocation2 + $0xf8] sm:$0xff] }
  0xdc   : > { %1501 = vmatprep.mubr.bf16.mxu0 %v7020_v17  ;;  %1678 = vmatprep.mubr.bf16.mxu1 %v7023_v51  ;;  %v760_v54 = vmul.f32 %v6649_v56, %v730_v15  ;;  %v588_v37 = vsel %vm555_vm1, %v551_v38, %v533_v6  ;;  %v762_v60 = vmul.f32 %v6649_v56, %v731_v19  ;;  %v534_v15 = vrot.slane %v7145_v49, 7 }
  0xdd   : > { %v7138_v21 = vpack.c.bf16 %v569_v0, %v618_v10  ;;  %v620_v31 = vmul.f32 %v6611_v28, %v588_v37  ;;  %v570_v40 = vsel %vm555_vm1, %v533_v6, %v551_v38  ;;  %v552_v30 = vrot.slane %v7147_v50, 7  ;;  %v7175_v0 = vld [vmem:[#allocation2 + $0x100] sm:$0xff]  ;;  %v332_v6 = vld [vmem:[#allocation2 + $0x108] sm:$0xff] }
  0xde   : > { %v7132_v42 = vpack.c.bf16 %v760_v54, %v712_v57  ;;  %v7162_v54 = vpack.c.bf16 %v762_v60, %v713_v59  ;;  %v7166_v57 = vpack.c.bf16 %v7078_v25, %v7070_v20  ;;  %v732_v2 = vsel %vm700_vm2, %v695_v46, %v677_v16 }
  0xdf   : > { %10080 = vst [vmem:[#allocation25_spill] sm:$0xff] %v7138_v21  ;;  %v7168_v10 = vpack.c.bf16 %v570_v40, %v620_v31  ;;  %v589_v3 = vsel %vm555_vm1, %v552_v30, %v534_v15  ;;  %v764_v20 = vmul.f32 %v6649_v56, %v732_v2  ;;  %v714_v25 = vsel %vm700_vm2, %v677_v16, %v695_v46 }
  0xe0   : > { %v622_v38 = vmul.f32 %v6611_v28, %v589_v3  ;;  %v678_v19 = vrot.slane %v7115_v63, 1  ;;  %v696_v37 = vrot.slane %v7117_v9, 1  ;;  %v571_v60 = vsel %vm555_vm1, %v534_v15, %v552_v30  ;;  %v333_v15 = vld [vmem:[#allocation2 + $0x110] sm:$0xff]  ;;  %v334_v30 = vld [vmem:[#allocation2 + $0x118] sm:$0xff] }
  0xe1   : > { %10081 = vst [vmem:[#allocation26_spill] sm:$0xff] %v7168_v10  ;;  %v535_v59 = vrot.slane %v7175_v0, 7  ;;  %v553_v31 = vrot.slane %v332_v6, 7  ;;  %v7189_v40 = vpack.c.bf16 %v764_v20, %v714_v25  ;;  %v7193_v2 = vpack.c.bf16 %v7117_v9, %v7115_v63 }
  0xe2   : > { %v7195_v27 = vpack.c.bf16 %v571_v60, %v622_v38  ;;  %v733_v16 = vsel %vm700_vm2, %v696_v37, %v678_v19  ;;  %v715_v63 = vsel %vm700_vm2, %v678_v19, %v696_v37  ;;  %v679_v20 = vrot.slane %v7145_v49, 1 }
  0xe3   : > { %1502 = vmatmul.mubr.bf16.gmra.mxu0 %v6979_v45  ;;  %1679 = vmatmul.mubr.bf16.gmra.mxu1 %v7056_v48  ;;  %10082 = vst [vmem:[#allocation27_spill] sm:$0xff] %v7189_v40  ;;  %10083 = vst [vmem:[#allocation28_spill] sm:$0xff] %v7193_v2  ;;  %v590_v46 = vsel %vm555_vm1, %v553_v31, %v535_v59  ;;  %v766_v3 = vmul.f32 %v6649_v56, %v733_v16  ;;  %v697_v25 = vrot.slane %v7147_v50, 1 }
  0xe4   : > { %1509 = vmatprep.mubr.bf16.mxu0 %v7060_v7  ;;  %1686 = vmatprep.mubr.bf16.mxu1 %v7062_v29  ;;  %v624_v9 = vmul.f32 %v6611_v28, %v590_v46  ;;  %v572_v38 = vsel %vm555_vm1, %v535_v59, %v553_v31  ;;  %v536_v60 = vrot.slane %v333_v15, 7  ;;  %v7217_v16 = vpack.c.bf16 %v7147_v50, %v7145_v49  ;;  %v7226_v46 = vld [vmem:[#allocation2 + $0x120] sm:$0xff]  ;;  %v7228_v59 = vld [vmem:[#allocation2 + $0x128] sm:$0xff] }
  0xe5   : > { %v734_v19 = vsel %vm700_vm2, %v697_v25, %v679_v20  ;;  %v716_v50 = vsel %vm700_vm2, %v679_v20, %v697_v25 }
  0xe6   : > { %10085 = vst [vmem:[#allocation30_spill] sm:$0xff] %v7217_v16  ;;  %v768_v49 = vmul.f32 %v6649_v56, %v734_v19  ;;  %v7245_v19 = vpack.c.bf16 %v332_v6, %v7175_v0 }
  0xeb   : > { %1510 = vmatmul.mubr.bf16.gmra.mxu0 %v7023_v51  ;;  %1687 = vmatmul.mubr.bf16.gmra.mxu1 %v7102_v41 }
  0xec   : > { %1517 = vmatprep.mubr.bf16.mxu0 %v7106_v43  ;;  %1694 = vmatprep.mubr.bf16.mxu1 %v7108_v47 }
  0xf3   : > { %1518 = vmatmul.mubr.bf16.gmra.mxu0 %v7062_v29  ;;  %1695 = vmatmul.mubr.bf16.gmra.mxu1 %v7132_v42 }
  0xf4   : > { %1525 = vmatprep.mubr.bf16.mxu0 %v7136_v26  ;;  %1702 = vmatprep.mubr.bf16.mxu1 %v7138_v21 }
  0xfb   : > { %1526 = vmatmul.mubr.bf16.gmra.mxu0 %v7108_v47  ;;  %1703 = vmatmul.mubr.bf16.gmra.mxu1 %v7162_v54 }
  0xfc   : > { %1533 = vmatprep.mubr.bf16.mxu0 %v7166_v57  ;;  %1710 = vmatprep.mubr.bf16.mxu1 %v7168_v10 }
 0x103   : > { %1534 = vmatmul.mubr.bf16.gmra.mxu0 %v7138_v21  ;;  %1711 = vmatmul.mubr.bf16.gmra.mxu1 %v7189_v40  ;;  %v554_v40 = vrot.slane %v334_v30, 7  ;;  %v7213_v21 = vpack.c.bf16 %v766_v3, %v715_v63  ;;  %v680_v3 = vrot.slane %v7175_v0, 1  ;;  %v698_v63 = vrot.slane %v332_v6, 1 }
 0x104   : > { %1541 = vmatprep.mubr.bf16.mxu0 %v7193_v2  ;;  %1718 = vmatprep.mubr.bf16.mxu1 %v7195_v27  ;;  %v7219_v2 = vpack.c.bf16 %v572_v38, %v624_v9  ;;  %v791_v38 = vrot.slane %v7226_v46, 7 }
 0x105   : > { %10084 = vst [vmem:[#allocation29_spill] sm:$0xff] %v7213_v21  ;;  %v591_v37 = vsel %vm555_vm1, %v554_v40, %v536_v60  ;;  %v573_v9 = vsel %vm555_vm1, %v536_v60, %v554_v40  ;;  %v735_v20 = vsel %vm700_vm2, %v698_v63, %v680_v3  ;;  %v717_v0 = vsel %vm700_vm2, %v680_v3, %v698_v63  ;;  %v6111_v63 = vld [vmem:[#allocation8 + $0x228] sm:$0xff]  }
 0x106   : > { %v626_v31 = vmul.f32 %v6611_v28, %v591_v37  ;;  %v770_v40 = vmul.f32 %v6649_v56, %v735_v20  ;;  %v681_v60 = vrot.slane %v333_v15, 1  ;;  %v699_v37 = vrot.slane %v334_v30, 1 }
 0x108   : > { %v736_v20 = vsel %vm700_vm2, %v699_v37, %v681_v60 }
 0x109   : > { %v772_v3 = vmul.f32 %v6649_v56, %v736_v20 }
 0x10b   : > { %1542 = vmatmul.mubr.bf16.gmra.mxu0 %v7168_v10  ;;  %1719 = vmatmul.mubr.bf16.gmra.mxu1 %v7213_v21  ;;  %v792_v21 = vrot.slane %v7228_v59, 7  ;;  %v7247_v10 = vpack.c.bf16 %v573_v9, %v626_v31  ;;  %v7265_v31 = vpack.c.bf16 %v334_v30, %v333_v15  ;;  %v6110_v30 = vld [vmem:[#allocation8 + $0x230] sm:$0xff]  }
 0x10c   : > { %1549 = vmatprep.mubr.bf16.mxu0 %v7217_v16  ;;  %1726 = vmatprep.mubr.bf16.mxu1 %v7219_v2  ;;  %v7242_v16 = vpack.c.bf16 %v768_v49, %v716_v50  ;;  %v7263_v50 = vpack.c.bf16 %v770_v40, %v717_v0 }
 0x10d   : > { %v794_v25 = vsel %vm555_vm1, %v792_v21, %v791_v38  ;;  %v793_v49 = vsel %vm555_vm1, %v791_v38, %v792_v21  ;;  %v718_v21 = vsel %vm700_vm2, %v681_v60, %v699_v37  ;;  %v6112_v38 = vld [vmem:[#allocation8 + $0x220] sm:$0xff]  }
 0x10e   : > { %v795_v6 = vmul.f32 %v6611_v28, %v794_v25  ;;  %v7278_v15 = vpack.c.bf16 %v772_v3, %v718_v21 }
 0x110   : > { %v7267_v9 = vpack.c.bf16 %v793_v49, %v795_v6 }
 0x113   : > { %1550 = vmatmul.mubr.bf16.gmra.mxu0 %v7195_v27  ;;  %1727 = vmatmul.mubr.bf16.gmra.mxu1 %v7242_v16 }
 0x114   : > { %1557 = vmatprep.mubr.bf16.mxu0 %v7245_v19  ;;  %1734 = vmatprep.mubr.bf16.mxu1 %v7247_v10 }
 0x11b   : > { %1558 = vmatmul.mubr.bf16.gmra.mxu0 %v7219_v2  ;;  %1735 = vmatmul.mubr.bf16.gmra.mxu1 %v7263_v50 }
 0x11c   : > { %1565 = vmatprep.mubr.bf16.mxu0 %v7265_v31  ;;  %1742 = vmatprep.mubr.bf16.mxu1 %v7267_v9 }
 0x123   : > { %1566 = vmatmul.mubr.bf16.gmra.mxu0 %v7247_v10  ;;  %1743 = vmatmul.mubr.bf16.gmra.mxu1 %v7278_v15 }
 0x124   : > { %1783 = vmatprep.mubr.bf16.mxu0 %v6705_v33  ;;  %1960 = vmatprep.mubr.bf16.mxu1 %v6709_v34  ;;  %v6115_v33 = vld [vmem:[#allocation8 + $0x208] sm:$0xff]  }
 0x12b   : > { %1784 = vmatmul.mubr.bf16.vlgmr.msra.gmra.mxu0 %v6678_v13  ;;  %1961 = vmatmul.mubr.bf16.vlgmr.msra.gmra.mxu1 %v6680_v14  ;;  %v6113_v13 = vld [vmem:[#allocation8 + $0x218] sm:$0xff]   ;;  %v6114_v14 = vld [vmem:[#allocation8 + $0x210] sm:$0xff]  }
 0x12c   : > { %5340 = vmatpush3.bf16.msra.mxu0 %v6998_v35  ;;  %1791 = vmatprep.mubr.bf16.mxu0 %v6738_v52 }
 0x12d   : > { %1968 = vmatprep.mubr.bf16.mxu1 %v6742_v53  ;;  %5341 = vmatprep.subr.bf16.mxu0 %v6110_v30 }
 0x130   : > { %5342 = vmatpush3.bf16.msra.mxu0 %v6110_v30 }
 0x131   : > { %5343 = vmatprep.subr.bf16.mxu0 %v6111_v63 }
 0x133   : > { %1792 = vmatmul.mubr.bf16.gmra.mxu0 %v6709_v34  ;;  %1969 = vmatmul.mubr.bf16.gmra.mxu1 %v6711_v36  ;;  %v6116_v34 = vld [vmem:[#allocation8 + $0x200] sm:$0xff]  }
 0x134   : > { %1799 = vmatprep.mubr.bf16.mxu0 %v6783_v22  ;;  %1976 = vmatprep.mubr.bf16.mxu1 %v6787_v23 }
 0x135   : > { %5344 = vmatpush3.bf16.msra.mxu0 %v6111_v63 }
 0x136   : > { %5345 = vmatprep.subr.bf16.mxu0 %v6112_v38 }
 0x139   : > { %5346 = vmatpush3.bf16.msra.mxu0 %v6112_v38 }
 0x13a   : > { %5347 = vmatprep.subr.bf16.mxu0 %v6113_v13 }
 0x13b   : > { %1800 = vmatmul.mubr.bf16.gmra.mxu0 %v6742_v53  ;;  %1977 = vmatmul.mubr.bf16.gmra.mxu1 %v6745_v55 }
 0x13c   : > { %1807 = vmatprep.mubr.bf16.mxu0 %v6831_v62  ;;  %1984 = vmatprep.mubr.bf16.mxu1 %v6835_v1 }
 0x13d   : > { %5348 = vmatpush3.bf16.msra.mxu0 %v6113_v13 }
 0x13e   : > { %5349 = vmatprep.subr.bf16.mxu0 %v6114_v14 }
 0x141   : > { %5350 = vmatpush3.bf16.msra.mxu0 %v6114_v14 }
 0x142   : > { %5351 = vmatprep.subr.bf16.mxu0 %v6115_v33 }
 0x143   : > { %1808 = vmatmul.mubr.bf16.gmra.mxu0 %v6787_v23  ;;  %1985 = vmatmul.mubr.bf16.gmra.mxu1 %v6789_v24 }
 0x144   : > { %1815 = vmatprep.mubr.bf16.mxu0 %v6882_v39  ;;  %1992 = vmatprep.mubr.bf16.mxu1 %v6886_v11 }
 0x145   : > { %5352 = vmatpush3.bf16.msra.mxu0 %v6115_v33 }
 0x146   : > { %5353 = vmatprep.subr.bf16.mxu0 %v6116_v34 }
 0x149   : > { %5354 = vmatpush3.bf16.msra.mxu0 %v6116_v34 }
 0x14b   : > { %1816 = vmatmul.mubr.bf16.gmra.mxu0 %v6835_v1  ;;  %1993 = vmatmul.mubr.bf16.gmra.mxu1 %v6840_v4 }
 0x14c   : > { %1823 = vmatprep.mubr.bf16.mxu0 %v6928_v32  ;;  %2000 = vmatprep.mubr.bf16.mxu1 %v6932_v58 }
 0x153   : > { %1824 = vmatmul.mubr.bf16.gmra.mxu0 %v6886_v11  ;;  %2001 = vmatmul.mubr.bf16.gmra.mxu1 %v6889_v12 }
 0x154   : > { %1831 = vmatprep.mubr.bf16.mxu0 %v6972_v61  ;;  %2008 = vmatprep.mubr.bf16.mxu1 %v6976_v44 }
 0x15b   : > { %v1431_v36 = vpop.f32.mrf.mxu0  ;;  %1832 = vmatmul.mubr.bf16.gmra.mxu0 %v6932_v58  ;;  %v1608_v53 = vpop.f32.mrf.mxu1  ;;  %2009 = vmatmul.mubr.bf16.gmra.mxu1 %v6935_v5 }
 0x15c   : > { %1839 = vmatprep.mubr.bf16.mxu0 %v7016_v8  ;;  %2016 = vmatprep.mubr.bf16.mxu1 %v7020_v17 }
 0x15d   : > { %v1433_v55 = vpop.f32.mrf.mxu0  ;;  %v1610_v23 = vpop.f32.mrf.mxu1 }
 0x15f   : > { %v1434_v24 = vpop.f32.mrf.mxu0  ;;  %v1611_v1 = vpop.f32.mrf.mxu1 }
 0x161   : > { %v1436_v4 = vpop.f32.mrf.mxu0  ;;  %v1613_v11 = vpop.f32.mrf.mxu1 }
 0x163   : > { %v1439_v12 = vpop.f32.mrf.mxu0  ;;  %1840 = vmatmul.mubr.bf16.gmra.mxu0 %v6976_v44  ;;  %v1616_v35 = vpop.f32.mrf.mxu1  ;;  %2017 = vmatmul.mubr.bf16.gmra.mxu1 %v6979_v45 }
 0x164   : > { %1847 = vmatprep.mubr.bf16.mxu0 %v7056_v48  ;;  %v7316_v58 = vadd.f32 %v1616_v35, %v1439_v12  ;;  %2024 = vmatprep.mubr.bf16.mxu1 %v7060_v7 }
 0x165   : > { %v1441_v5 = vpop.f32.mrf.mxu0  ;;  %v1618_v25 = vpop.f32.mrf.mxu1 }
 0x167   : > { %v1442_v40 = vpop.f32.mrf.mxu0  ;;  %v1619_v0 = vpop.f32.mrf.mxu1 }
 0x168   : > { %v7319_v6 = vadd.f32 %v1619_v0, %v1442_v40 }
 0x169   : > { %v1444_v60 = vpop.f32.mrf.mxu0  ;;  %v1621_v37 = vpop.f32.mrf.mxu1 }
 0x16a   : > { %v10086_v60 = vld [vmem:[#allocation25_spill] sm:$0xff] }
 0x16b   : > { %v1447_v49 = vpop.f32.mrf.mxu0  ;;  %1848 = vmatmul.mubr.bf16.gmra.mxu0 %v7020_v17  ;;  %v1624_v44 = vpop.f32.mrf.mxu1  ;;  %2025 = vmatmul.mubr.bf16.gmra.mxu1 %v7023_v51 }
 0x16c   : > { %1855 = vmatprep.mubr.bf16.mxu0 %v7102_v41  ;;  %v7324_v45 = vadd.f32 %v1624_v44, %v1447_v49  ;;  %2032 = vmatprep.mubr.bf16.mxu1 %v7106_v43  ;;  %v10088_v44 = vld [vmem:[#allocation28_spill] sm:$0xff] }
 0x16d   : > { %v1449_v20 = vpop.f32.mrf.mxu0  ;;  %v1626_v3 = vpop.f32.mrf.mxu1 }
 0x16f   : > { %v1450_v21 = vpop.f32.mrf.mxu0  ;;  %v1627_v30 = vpop.f32.mrf.mxu1 }
 0x170   : > { %v7327_v63 = vadd.f32 %v1627_v30, %v1450_v21 }
 0x171   : > { %v1452_v38 = vpop.f32.mrf.mxu0  ;;  %v1629_v13 = vpop.f32.mrf.mxu1 }
 0x173   : > { %v1455_v14 = vpop.f32.mrf.mxu0  ;;  %1856 = vmatmul.mubr.bf16.gmra.mxu0 %v7060_v7  ;;  %v1632_v17 = vpop.f32.mrf.mxu1  ;;  %2033 = vmatmul.mubr.bf16.gmra.mxu1 %v7062_v29 }
 0x174   : > { %1863 = vmatprep.mubr.bf16.mxu0 %v7132_v42  ;;  %v7332_v51 = vadd.f32 %v1632_v17, %v1455_v14  ;;  %2040 = vmatprep.mubr.bf16.mxu1 %v7136_v26  ;;  %v6117_v14 = vld [vmem:[#allocation9 + $0x78] sm:$0xff]  }
 0x175   : > { %v1457_v33 = vpop.f32.mrf.mxu0  ;;  %v1634_v34 = vpop.f32.mrf.mxu1  ;;  %v6118_v17 = vld [vmem:[#allocation9 + $0x38] sm:$0xff]   ;;  %4867 = vmatprep.subr.bf16.mxu1 %v6117_v14 }
 0x176   : > { %v10089_v34 = vld [vmem:[#allocation26_spill] sm:$0xff]  ;;  %4868 = vmatpush3.bf16.msra.mxu1 %v6118_v17 }
 0x177   : > { %v1458_v36 = vpop.f32.mrf.mxu0  ;;  %v1635_v53 = vpop.f32.mrf.mxu1 }
 0x178   : > { %v7335_v55 = vadd.f32 %v1635_v53, %v1458_v36  ;;  %v10090_v36 = vld [vmem:[#allocation29_spill] sm:$0xff] }
 0x179   : > { %v1460_v23 = vpop.f32.mrf.mxu0  ;;  %v1637_v24 = vpop.f32.mrf.mxu1 }
 0x17a   : > { %v10091_v24 = vld [vmem:[#allocation30_spill] sm:$0xff] }
 0x17b   : > { %v1463_v1 = vpop.f32.mrf.mxu0  ;;  %1864 = vmatmul.mubr.bf16.gmra.mxu0 %v7106_v43  ;;  %v1640_v7 = vpop.f32.mrf.mxu1  ;;  %2041 = vmatmul.mubr.bf16.gmra.mxu1 %v7108_v47  ;;  %v10087_v47 = vld [vmem:[#allocation27_spill] sm:$0xff] }
 0x17c   : > { %1871 = vmatprep.mubr.bf16.mxu0 %v7162_v54  ;;  %v7340_v29 = vadd.f32 %v1640_v7, %v1463_v1  ;;  %2048 = vmatprep.mubr.bf16.mxu1 %v7166_v57 }
 0x17d   : > { %v1465_v4 = vpop.f32.mrf.mxu0  ;;  %v1642_v11 = vpop.f32.mrf.mxu1 }
 0x17f   : > { %v1466_v12 = vpop.f32.mrf.mxu0  ;;  %v1643_v35 = vpop.f32.mrf.mxu1 }
 0x180   : > { %v7343_v5 = vadd.f32 %v1643_v35, %v1466_v12 }
 0x181   : > { %v1468_v25 = vpop.f32.mrf.mxu0  ;;  %v1645_v40 = vpop.f32.mrf.mxu1 }
 0x183   : > { %v1471_v0 = vpop.f32.mrf.mxu0  ;;  %1872 = vmatmul.mubr.bf16.gmra.mxu0 %v7136_v26  ;;  %v1648_v43 = vpop.f32.mrf.mxu1  ;;  %2049 = vmatmul.mubr.bf16.gmra.mxu1 %v10086_v60 }
 0x184   : > { %1879 = vmatprep.mubr.bf16.mxu0 %v10087_v47  ;;  %v7348_v37 = vadd.f32 %v1648_v43, %v1471_v0  ;;  %2056 = vmatprep.mubr.bf16.mxu1 %v10088_v44 }
 0x185   : > { %v1473_v49 = vpop.f32.mrf.mxu0  ;;  %v1650_v20 = vpop.f32.mrf.mxu1 }
 0x187   : > { %v1474_v3 = vpop.f32.mrf.mxu0  ;;  %v1651_v21 = vpop.f32.mrf.mxu1 }
 0x188   : > { %v7351_v30 = vadd.f32 %v1651_v21, %v1474_v3 }
 0x189   : > { %v1476_v38 = vpop.f32.mrf.mxu0  ;;  %v1653_v13 = vpop.f32.mrf.mxu1 }
 0x18a   : > { %v6120_v13 = vld [vmem:[#allocation9 + $0x30] sm:$0xff]  }
 0x18b   : > { %v1479_v26 = vpop.f32.mrf.mxu0  ;;  %1880 = vmatmul.mubr.bf16.gmra.mxu0 %v7166_v57  ;;  %v1656_v33 = vpop.f32.mrf.mxu1  ;;  %2057 = vmatmul.mubr.bf16.gmra.mxu1 %v10089_v34 }
 0x18c   : > { %1887 = vmatprep.mubr.bf16.mxu0 %v10090_v36  ;;  %v7356_v53 = vadd.f32 %v1656_v33, %v1479_v26  ;;  %2064 = vmatprep.mubr.bf16.mxu1 %v10091_v24  ;;  %v799_v26 = vrot.slane %v7226_v46, 1  ;;  %v800_v33 = vrot.slane %v7228_v59, 1 }
 0x18d   : > { %v1481_v23 = vpop.f32.mrf.mxu0  ;;  %v1658_v1 = vpop.f32.mrf.mxu1 }
 0x18f   : > { %v1482_v7 = vpop.f32.mrf.mxu0  ;;  %v1659_v4 = vpop.f32.mrf.mxu1 }
 0x190   : > { %v7359_v11 = vadd.f32 %v1659_v4, %v1482_v7  ;;  %v798_v7 = vpack.c.bf16 %v7228_v59, %v7226_v46  ;;  %v802_v4 = vsel %vm700_vm2, %v800_v33, %v799_v26  ;;  %v801_v46 = vsel %vm700_vm2, %v799_v26, %v800_v33  ;;  %v6121_v26 = vld [vmem:[#allocation9 + $0x68] sm:$0xff]  }
 0x191   : > { %v1484_v12 = vpop.f32.mrf.mxu0  ;;  %v1661_v35 = vpop.f32.mrf.mxu1  ;;  %v6122_v33 = vld [vmem:[#allocation9 + $0x28] sm:$0xff]  }
 0x193   : > { %v1487_v57 = vpop.f32.mrf.mxu0  ;;  %1888 = vmatmul.mubr.bf16.gmra.mxu0 %v10088_v44  ;;  %v1664_v25 = vpop.f32.mrf.mxu1  ;;  %2065 = vmatmul.mubr.bf16.gmra.mxu1 %v7195_v27  ;;  %v6119_v27 = vld [vmem:[#allocation9 + $0x70] sm:$0xff]  }
 0x194   : > { %1895 = vmatprep.mubr.bf16.mxu0 %v7242_v16  ;;  %v7364_v40 = vadd.f32 %v1664_v25, %v1487_v57  ;;  %2072 = vmatprep.mubr.bf16.mxu1 %v7245_v19  ;;  %v804_v25 = vmul.f32 %v6649_v56, %v802_v4 }
 0x195   : > { %v1489_v0 = vpop.f32.mrf.mxu0  ;;  %v1666_v43 = vpop.f32.mrf.mxu1  ;;  %4869 = vmatprep.subr.bf16.mxu1 %v6119_v27 }
 0x196   : > { %4870 = vmatpush3.bf16.msra.mxu1 %v6120_v13 }
 0x197   : > { %v1490_v60 = vpop.f32.mrf.mxu0  ;;  %v1667_v49 = vpop.f32.mrf.mxu1  ;;  %4871 = vmatprep.subr.bf16.mxu1 %v6121_v26 }
 0x198   : > { %v7367_v20 = vadd.f32 %v1667_v49, %v1490_v60 }
 0x199   : > { %v1492_v3 = vpop.f32.mrf.mxu0  ;;  %v1669_v21 = vpop.f32.mrf.mxu1 }
 0x19a   : > { %v7391_v3 = vpack.c.bf16 %v804_v25, %v801_v46  ;;  %4872 = vmatpush3.bf16.msra.mxu1 %v6122_v33 }
 0x19b   : > { %v1495_v38 = vpop.f32.mrf.mxu0  ;;  %1896 = vmatmul.mubr.bf16.gmra.mxu0 %v10091_v24  ;;  %v1672_v44 = vpop.f32.mrf.mxu1  ;;  %2073 = vmatmul.mubr.bf16.gmra.mxu1 %v7219_v2 }
 0x19c   : > { %1903 = vmatprep.mubr.bf16.mxu0 %v7263_v50  ;;  %v7372_v14 = vadd.f32 %v1672_v44, %v1495_v38  ;;  %2080 = vmatprep.mubr.bf16.mxu1 %v7265_v31 }
 0x19d   : > { %v1497_v17 = vpop.f32.mrf.mxu0  ;;  %v1674_v34 = vpop.f32.mrf.mxu1 }
 0x19f   : > { %v1498_v23 = vpop.f32.mrf.mxu0  ;;  %v1675_v24 = vpop.f32.mrf.mxu1 }
 0x1a0   : > { %v7377_v1 = vadd.f32 %v1675_v24, %v1498_v23 }
 0x1a1   : > { %v1500_v2 = vpop.f32.mrf.mxu0  ;;  %v1677_v12 = vpop.f32.mrf.mxu1 }
 0x1a3   : > { %v1503_v35 = vpop.f32.mrf.mxu0  ;;  %1904 = vmatmul.mubr.bf16.gmra.mxu0 %v7245_v19  ;;  %v1680_v57 = vpop.f32.mrf.mxu1  ;;  %2081 = vmatmul.mubr.bf16.gmra.mxu1 %v7247_v10 }
 0x1a4   : > { %1911 = vmatprep.mubr.bf16.mxu0 %v7278_v15  ;;  %v7387_v0 = vadd.f32 %v1680_v57, %v1503_v35  ;;  %2088 = vmatprep.mubr.bf16.mxu1 %v798_v7 }
 0x1a5   : > { %v1505_v43 = vpop.f32.mrf.mxu0  ;;  %v1682_v59 = vpop.f32.mrf.mxu1 }
 0x1a7   : > { %v1506_v60 = vpop.f32.mrf.mxu0  ;;  %v1683_v49 = vpop.f32.mrf.mxu1 }
 0x1a8   : > { %v7393_v19 = vadd.f32 %v1683_v49, %v1506_v60 }
 0x1a9   : > { %v1508_v21 = vpop.f32.mrf.mxu0  ;;  %v1685_v10 = vpop.f32.mrf.mxu1 }
 0x1ab   : > { %v1511_v38 = vpop.f32.mrf.mxu0  ;;  %1912 = vmatmul.mubr.bf16.gmra.mxu0 %v7265_v31  ;;  %v1688_v44 = vpop.f32.mrf.mxu1  ;;  %2089 = vmatmul.mubr.bf16.gmra.mxu1 %v7267_v9 }
 0x1ac   : > { %1919 = vmatprep.mubr.bf16.mxu0 %v7391_v3  ;;  %v7398_v27 = vadd.f32 %v1688_v44, %v1511_v38 }
 0x1ad   : > { %v1513_v13 = vpop.f32.mrf.mxu0  ;;  %v1690_v17 = vpop.f32.mrf.mxu1 }
 0x1ae   : > { %v6123_v13 = vld [vmem:[#allocation9 + $0x60] sm:$0xff]  }
 0x1af   : > { %v1514_v34 = vpop.f32.mrf.mxu0  ;;  %v1691_v23 = vpop.f32.mrf.mxu1  ;;  %v6124_v17 = vld [vmem:[#allocation9 + $0x20] sm:$0xff]   ;;  %4873 = vmatprep.subr.bf16.mxu1 %v6123_v13  ;;  %v6126_v13 = vld [vmem:[#allocation9 + $0x18] sm:$0xff]  }
 0x1b0   : > { %v7400_v24 = vadd.f32 %v1691_v23, %v1514_v34  ;;  %4874 = vmatpush3.bf16.msra.mxu1 %v6124_v17 }
 0x1b1   : > { %v1516_v2 = vpop.f32.mrf.mxu0  ;;  %v1693_v4 = vpop.f32.mrf.mxu1 }
 0x1b3   : > { %v1519_v31 = vpop.f32.mrf.mxu0  ;;  %1920 = vmatmul.mubr.bf16.gmra.mxu0 %v798_v7  ;;  %v1696_v12 = vpop.f32.mrf.mxu1 }
 0x1b4   : > { %5355 = vmatprep.mubr.bf16.mxu0 %v6738_v52  ;;  %v7403_v9 = vadd.f32 %v1696_v12, %v1519_v31 }
 0x1b5   : > { %v1521_v35 = vpop.f32.mrf.mxu0  ;;  %v1698_v57 = vpop.f32.mrf.mxu1 }
 0x1b7   : > { %v1522_v25 = vpop.f32.mrf.mxu0  ;;  %v1699_v43 = vpop.f32.mrf.mxu1 }
 0x1b8   : > { %v7405_v46 = vadd.f32 %v1699_v43, %v1522_v25 }
 0x1b9   : > { %v1524_v59 = vpop.f32.mrf.mxu0  ;;  %v1701_v60 = vpop.f32.mrf.mxu1 }
 0x1bb   : > { %v1527_v49 = vpop.f32.mrf.mxu0  ;;  %5356 = vmatmul.mubr.bf16.vlgmr.msra.gmra.mxu0 %v6783_v22  ;;  %v1704_v21 = vpop.f32.mrf.mxu1 }
 0x1bc   : > { %5359 = vmatprep.mubr.bf16.mxu0 %v6831_v62  ;;  %v7409_v7 = vadd.f32 %v1704_v21, %v1527_v49 }
 0x1bd   : > { %v1529_v10 = vpop.f32.mrf.mxu0  ;;  %v1706_v52 = vpop.f32.mrf.mxu1 }
 0x1bf   : > { %v1530_v38 = vpop.f32.mrf.mxu0  ;;  %v1707_v44 = vpop.f32.mrf.mxu1 }
 0x1c0   : > { %v7411_v26 = vadd.f32 %v1707_v44, %v1530_v38  ;;  %v6125_v44 = vld [vmem:[#allocation9 + $0x58] sm:$0xff]  }
 0x1c1   : > { %v1532_v33 = vpop.f32.mrf.mxu0  ;;  %v1709_v34 = vpop.f32.mrf.mxu1  ;;  %4875 = vmatprep.subr.bf16.mxu1 %v6125_v44 }
 0x1c2   : > { %4876 = vmatpush3.bf16.msra.mxu1 %v6126_v13 }
 0x1c3   : > { %v1535_v23 = vpop.f32.mrf.mxu0  ;;  %5360 = vmatmul.mubr.bf16.gmra.mxu0 %v6882_v39  ;;  %v1712_v22 = vpop.f32.mrf.mxu1 }
 0x1c4   : > { %5363 = vmatprep.mubr.bf16.mxu0 %v6928_v32  ;;  %v7415_v62 = vadd.f32 %v1712_v22, %v1535_v23 }
 0x1c5   : > { %v1537_v2 = vpop.f32.mrf.mxu0  ;;  %v1714_v4 = vpop.f32.mrf.mxu1 }
 0x1c7   : > { %v1538_v31 = vpop.f32.mrf.mxu0  ;;  %v1715_v12 = vpop.f32.mrf.mxu1 }
 0x1c8   : > { %v7417_v35 = vadd.f32 %v1715_v12, %v1538_v31 }
 0x1c9   : > { %v1540_v57 = vpop.f32.mrf.mxu0  ;;  %v1717_v25 = vpop.f32.mrf.mxu1 }
 0x1cb   : > { %v1543_v43 = vpop.f32.mrf.mxu0  ;;  %5364 = vmatmul.mubr.bf16.gmra.mxu0 %v6972_v61  ;;  %v1720_v59 = vpop.f32.mrf.mxu1 }
 0x1cc   : > { %5367 = vmatprep.mubr.bf16.mxu0 %v7016_v8  ;;  %v7421_v39 = vadd.f32 %v1720_v59, %v1543_v43 }
 0x1cd   : > { %v1545_v60 = vpop.f32.mrf.mxu0  ;;  %v1722_v32 = vpop.f32.mrf.mxu1 }
 0x1cf   : > { %v1546_v49 = vpop.f32.mrf.mxu0  ;;  %v1723_v21 = vpop.f32.mrf.mxu1 }
 0x1d0   : > { %v7423_v10 = vadd.f32 %v1723_v21, %v1546_v49 }
 0x1d1   : > { %v1548_v52 = vpop.f32.mrf.mxu0  ;;  %v1725_v38 = vpop.f32.mrf.mxu1 }
 0x1d2   : > { %v6128_v38 = vld [vmem:[#allocation9 + $0x10] sm:$0xff]  }
 0x1d3   : > { %v1551_v17 = vpop.f32.mrf.mxu0  ;;  %5368 = vmatmul.mubr.bf16.gmra.mxu0 %v7056_v48  ;;  %v1728_v33 = vpop.f32.mrf.mxu1 }
 0x1d4   : > { %5371 = vmatprep.mubr.bf16.mxu0 %v7102_v41  ;;  %v7427_v61 = vadd.f32 %v1728_v33, %v1551_v17 }
 0x1d5   : > { %v1553_v8 = vpop.f32.mrf.mxu0  ;;  %v1730_v34 = vpop.f32.mrf.mxu1 }
 0x1d6   : > { %v7439_v8 = vld [vmem:[#allocation2 + $0x130] sm:$0xff]  ;;  %v7441_v34 = vld [vmem:[#allocation2 + $0x138] sm:$0xff] }
 0x1d7   : > { %v1554_v23 = vpop.f32.mrf.mxu0  ;;  %v1731_v22 = vpop.f32.mrf.mxu1 }
 0x1d8   : > { %v7429_v2 = vadd.f32 %v1731_v22, %v1554_v23 }
 0x1d9   : > { %v1556_v4 = vpop.f32.mrf.mxu0  ;;  %v1733_v31 = vpop.f32.mrf.mxu1 }
 0x1da   : > { %v815_v4 = vrot.slane %v7441_v34, 1 }
 0x1db   : > { %v1559_v12 = vpop.f32.mrf.mxu0  ;;  %5372 = vmatmul.mubr.bf16.gmra.mxu0 %v7132_v42  ;;  %v1736_v57 = vpop.f32.mrf.mxu1  ;;  %v6127_v42 = vld [vmem:[#allocation9 + $0x50] sm:$0xff]  }
 0x1dc   : > { %5375 = vmatprep.mubr.bf16.mxu0 %v7162_v54  ;;  %v7433_v48 = vadd.f32 %v1736_v57, %v1559_v12  ;;  %4877 = vmatprep.subr.bf16.mxu1 %v6127_v42  ;;  %v6129_v42 = vld [vmem:[#allocation9 + $0x48] sm:$0xff]  }
 0x1dd   : > { %v1561_v41 = vpop.f32.mrf.mxu0  ;;  %v1738_v25 = vpop.f32.mrf.mxu1  ;;  %4878 = vmatpush3.bf16.msra.mxu1 %v6128_v38  ;;  %v6130_v38 = vld [vmem:[#allocation9 + $0x8] sm:$0xff]  }
 0x1de   : > { %4879 = vmatprep.subr.bf16.mxu1 %v6129_v42 }
 0x1df   : > { %v1562_v43 = vpop.f32.mrf.mxu0  ;;  %v1739_v59 = vpop.f32.mrf.mxu1 }
 0x1e0   : > { %v7435_v60 = vadd.f32 %v1739_v59, %v1562_v43 }
 0x1e1   : > { %v1564_v32 = vpop.f32.mrf.mxu0  ;;  %v1741_v49 = vpop.f32.mrf.mxu1  ;;  %4880 = vmatpush3.bf16.msra.mxu1 %v6130_v38 }
 0x1e3   : > { %v1567_v21 = vpop.f32.mrf.mxu0  ;;  %5376 = vmatmul.mubr.bf16.gmra.mxu0 %v10087_v47  ;;  %v1744_v52 = vpop.f32.mrf.mxu1 }
 0x1e4   : > { %5379 = vmatprep.mubr.bf16.mxu0 %v10090_v36  ;;  %v814_v36 = vrot.slane %v7439_v8, 1 }
 0x1e5   : > { %v1569_v44 = vpop.f32.mrf.mxu0  ;;  %v1746_v54 = vpop.f32.mrf.mxu1 }
 0x1e6   : > { %v817_v25 = vsel %vm700_vm2, %v815_v4, %v814_v36  ;;  %v816_v21 = vsel %vm700_vm2, %v814_v36, %v815_v4 }
 0x1e7   : > { %v1570_v13 = vpop.f32.mrf.mxu0  ;;  %v1747_v17 = vpop.f32.mrf.mxu1 }
 0x1e9   : > { %v1572_v33 = vpop.f32.mrf.mxu0  ;;  %v1749_v23 = vpop.f32.mrf.mxu1 }
 0x1eb   : > { %v1785_v22 = vpop.f32.mrf.mxu0  ;;  %5380 = vmatmul.mubr.bf16.gmra.mxu0 %v7242_v16  ;;  %v1962_v47 = vpop.f32.mrf.mxu1  ;;  %v819_v16 = vmul.f32 %v6649_v56, %v817_v25 }
 0x1ec   : > { %5383 = vmatprep.mubr.bf16.mxu0 %v7263_v50 }
 0x1ed   : > { %v1787_v31 = vpop.f32.mrf.mxu0  ;;  %v1964_v12 = vpop.f32.mrf.mxu1  ;;  %v820_v17 = vpack.c.bf16 %v819_v16, %v816_v21 }
 0x1ef   : > { %v1788_v57 = vpop.f32.mrf.mxu0  ;;  %v1965_v41 = vpop.f32.mrf.mxu1 }
 0x1f0   : > { %v6131_v41 = vld [vmem:[#allocation9 + $0xf8] sm:$0xff]  }
 0x1f1   : > { %v1790_v43 = vpop.f32.mrf.mxu0  ;;  %v1967_v59 = vpop.f32.mrf.mxu1  ;;  %4979 = vmatprep.subr.bf16.mxu0 %v6131_v41 }
 0x1f2   : > { %v6132_v43 = vld [vmem:[#allocation9 + $0xb8] sm:$0xff]  }
 0x1f3   : > { %v1793_v32 = vpop.f32.mrf.mxu0  ;;  %5384 = vmatmul.mubr.bf16.gmra.mxu0 %v7278_v15  ;;  %v1970_v49 = vpop.f32.mrf.mxu1 }
 0x1f4   : > { %v1794_v50 = vadd.f32 %v1793_v32, %v7316_v58  ;;  %5387 = vmatprep.mubr.bf16.mxu0 %v7391_v3  ;;  %4980 = vmatpush3.bf16.msra.mxu0 %v6132_v43  ;;  %v6139_v43 = vld [vmem:[#allocation9 + $0xe0] sm:$0xff]  }
 0x1f5   : > { %v1795_v52 = vpop.f32.mrf.mxu0  ;;  %v1972_v54 = vpop.f32.mrf.mxu1 }
 0x1f6   : > { %v7455_v44 = vadd.f32 %v1970_v49, %v1794_v50  ;;  %v6133_v49 = vld [vmem:[#allocation9 + $0xf0] sm:$0xff]  }
 0x1f7   : > { %v1796_v13 = vpop.f32.mrf.mxu0  ;;  %v1973_v33 = vpop.f32.mrf.mxu1  ;;  %v6134_v52 = vld [vmem:[#allocation9 + $0xb0] sm:$0xff]   ;;  %4981 = vmatprep.subr.bf16.mxu0 %v6133_v49 }
 0x1f8   : > { %v1797_v15 = vadd.f32 %v1796_v13, %v7319_v6  ;;  %4982 = vmatpush3.bf16.msra.mxu0 %v6134_v52  ;;  %v807_v13 = vrot.slane %v7441_v34, 7 }
 0x1f9   : > { %v1798_v58 = vpop.f32.mrf.mxu0  ;;  %v1975_v3 = vpop.f32.mrf.mxu1 }
 0x1fa   : > { %v7458_v23 = vadd.f32 %v1973_v33, %v1797_v15  ;;  %v6137_v15 = vld [vmem:[#allocation9 + $0xe8] sm:$0xff]  }
 0x1fb   : > { %v1801_v22 = vpop.f32.mrf.mxu0  ;;  %5388 = vmatmul.mubr.bf16.gmra.mxu0 %v820_v17  ;;  %v1978_v36 = vpop.f32.mrf.mxu1  ;;  %4983 = vmatprep.subr.bf16.mxu0 %v6137_v15 }
 0x1fc   : > { %v1802_v47 = vadd.f32 %v1801_v22, %v7324_v45  ;;  %v6138_v22 = vld [vmem:[#allocation9 + $0xa8] sm:$0xff]  }
 0x1fd   : > { %v1803_v4 = vpop.f32.mrf.mxu0  ;;  %v1980_v12 = vpop.f32.mrf.mxu1  ;;  %4984 = vmatpush3.bf16.msra.mxu0 %v6138_v22 }
 0x1fe   : > { %v7461_v31 = vadd.f32 %v1978_v36, %v1802_v47  ;;  %v813_v12 = vpack.c.bf16 %v7441_v34, %v7439_v8  ;;  %4985 = vmatprep.subr.bf16.mxu0 %v6139_v43  ;;  %v6136_v34 = vld [vmem:[#allocation9] sm:$0xff]   ;;  %v6145_v43 = vld [vmem:[#allocation9 + $0xc8] sm:$0xff]  }
 0x1ff   : > { %v1804_v57 = vpop.f32.mrf.mxu0  ;;  %v1981_v6 = vpop.f32.mrf.mxu1 }
 0x200   : > { %v1805_v25 = vadd.f32 %v1804_v57, %v7327_v63  ;;  %v806_v63 = vrot.slane %v7439_v8, 7  ;;  %2096 = vmatprep.mubr.bf16.mxu1 %v813_v12 }
 0x201   : > { %v1806_v59 = vpop.f32.mrf.mxu0  ;;  %v1983_v16 = vpop.f32.mrf.mxu1 }
 0x202   : > { %v7464_v32 = vadd.f32 %v1981_v6, %v1805_v25  ;;  %v808_v57 = vsel %vm555_vm1, %v806_v63, %v807_v13  ;;  %v6140_v16 = vld [vmem:[#allocation9 + $0xa0] sm:$0xff]  }
 0x203   : > { %v1809_v50 = vpop.f32.mrf.mxu0  ;;  %v1986_v21 = vpop.f32.mrf.mxu1  ;;  %4986 = vmatpush3.bf16.msra.mxu0 %v6140_v16 }
 0x204   : > { %v1810_v45 = vadd.f32 %v1809_v50, %v7332_v51  ;;  %v809_v51 = vsel %vm555_vm1, %v807_v13, %v806_v63  ;;  %v6142_v13 = vld [vmem:[#allocation9 + $0x98] sm:$0xff]  }
 0x205   : > { %v1811_v42 = vpop.f32.mrf.mxu0  ;;  %v1988_v54 = vpop.f32.mrf.mxu1  ;;  %v810_v47 = vmul.f32 %v6611_v28, %v809_v51 }
 0x206   : > { %v7467_v38 = vadd.f32 %v1986_v21, %v1810_v45  ;;  %v6135_v45 = vld [vmem:[#allocation9 + $0x40] sm:$0xff]   ;;  %v6141_v42 = vld [vmem:[#allocation9 + $0xd8] sm:$0xff]  }
 0x207   : > { %v1812_v17 = vpop.f32.mrf.mxu0  ;;  %v1989_v58 = vpop.f32.mrf.mxu1  ;;  %4881 = vmatprep.subr.bf16.mxu1 %v6135_v45  ;;  %4987 = vmatprep.subr.bf16.mxu0 %v6141_v42 }
 0x208   : > { %v1813_v33 = vadd.f32 %v1812_v17, %v7335_v55  ;;  %v812_v55 = vpack.c.bf16 %v808_v57, %v810_v47  ;;  %4882 = vmatpush3.bf16.msra.mxu1 %v6136_v34  ;;  %4988 = vmatpush3.bf16.msra.mxu0 %v6142_v13  ;;  %v10035_v47 = vmov 0.0|0.0  }
 0x209   : > { %v1814_v3 = vpop.f32.mrf.mxu0  ;;  %v1991_v4 = vpop.f32.mrf.mxu1 }
 0x20a   : > { %v7475_v36 = vadd.f32 %v1989_v58, %v1813_v33  ;;  %2097 = vmatmul.mubr.bf16.gmra.mxu1 %v812_v55  ;;  %v6143_v4 = vld [vmem:[#allocation9 + $0xd0] sm:$0xff]  }
 0x20b   : > { %v1817_v41 = vpop.f32.mrf.mxu0  ;;  %v1994_v6 = vpop.f32.mrf.mxu1  ;;  %3608 = vmatprep.mubr.bf16.mxu1 %v10035_v47  ;;  %4989 = vmatprep.subr.bf16.mxu0 %v6143_v4 }
 0x20c   : > { %v1818_v25 = vadd.f32 %v1817_v41, %v7340_v29  ;;  %v10092_v29 = vmov 0.0   ;;  %v6144_v41 = vld [vmem:[#allocation9 + $0x90] sm:$0xff]  }
 0x20d   : > { %v1819_v59 = vpop.f32.mrf.mxu0  ;;  %v1996_v49 = vpop.f32.mrf.mxu1  ;;  %v2730_v54 = vrot.slane %v10092_v29, 7  ;;  %4990 = vmatpush3.bf16.msra.mxu0 %v6144_v41 }
 0x20e   : > { %v7482_v50 = vadd.f32 %v1994_v6, %v1818_v25  ;;  %v6146_v49 = vld [vmem:[#allocation9 + $0x88] sm:$0xff]   ;;  %4991 = vmatprep.subr.bf16.mxu0 %v6145_v43 }
 0x20f   : > { %v1820_v8 = vpop.f32.mrf.mxu0  ;;  %v1997_v52 = vpop.f32.mrf.mxu1  ;;  %v2794_v33 = vmul.f32 %v6611_v28, %v2730_v54 }
 0x210   : > { %v1821_v21 = vadd.f32 %v1820_v8, %v7343_v5 }
 0x211   : > { %v1822_v63 = vpop.f32.mrf.mxu0  ;;  %v1999_v15 = vpop.f32.mrf.mxu1  ;;  %v7490_v5 = vpack.c.bf16 %v2730_v54, %v2794_v33  ;;  %4992 = vmatpush3.bf16.msra.mxu0 %v6146_v49 }
 0x212   : > { %v7486_v17 = vadd.f32 %v1997_v52, %v1821_v21 }
 0x213   : > { %v1825_v58 = vpop.f32.mrf.mxu0  ;;  %v2002_v3 = vpop.f32.mrf.mxu1  ;;  %10093 = vst [vmem:[#allocation25_spill] sm:$0xff] %v7490_v5  ;;  %3609 = vmatmul.mubr.bf16.vlgmr.msra.gmra.mxu1 %v7490_v5 }
 0x214   : > { %v1826_v51 = vadd.f32 %v1825_v58, %v7348_v37 }
 0x215   : > { %v1827_v22 = vpop.f32.mrf.mxu0  ;;  %v2004_v57 = vpop.f32.mrf.mxu1 }
 0x216   : > { %v7493_v12 = vadd.f32 %v2002_v3, %v1826_v51 }
 0x217   : > { %v1828_v55 = vpop.f32.mrf.mxu0  ;;  %v2005_v6 = vpop.f32.mrf.mxu1 }
 0x218   : > { %v1829_v25 = vadd.f32 %v1828_v55, %v7351_v30 }
 0x219   : > { %v1830_v37 = vpop.f32.mrf.mxu0  ;;  %v2007_v16 = vpop.f32.mrf.mxu1 }
 0x21a   : > { %v7497_v59 = vadd.f32 %v2005_v6, %v1829_v25  ;;  %v6147_v25 = vld [vmem:[#allocation9 + $0x178] sm:$0xff]  }
 0x21b   : > { %v1833_v45 = vpop.f32.mrf.mxu0  ;;  %v2010_v34 = vpop.f32.mrf.mxu1  ;;  %5091 = vmatprep.subr.bf16.mxu1 %v6147_v25 }
 0x21c   : > { %v1834_v8 = vadd.f32 %v1833_v45, %v7356_v53  ;;  %v6148_v45 = vld [vmem:[#allocation9 + $0x138] sm:$0xff]  }
 0x21d   : > { %v1835_v21 = vpop.f32.mrf.mxu0  ;;  %v2012_v42 = vpop.f32.mrf.mxu1  ;;  %5092 = vmatpush3.bf16.msra.mxu1 %v6148_v45 }
 0x21e   : > { %v7500_v52 = vadd.f32 %v2010_v34, %v1834_v8  ;;  %v6149_v21 = vld [vmem:[#allocation9 + $0xc0] sm:$0xff]  }
 0x21f   : > { %v1836_v54 = vpop.f32.mrf.mxu0  ;;  %v2013_v63 = vpop.f32.mrf.mxu1  ;;  %4993 = vmatprep.subr.bf16.mxu0 %v6149_v21 }
 0x220   : > { %v1837_v30 = vadd.f32 %v1836_v54, %v7359_v11 }
 0x221   : > { %v1838_v13 = vpop.f32.mrf.mxu0  ;;  %v2015_v33 = vpop.f32.mrf.mxu1 }
 0x222   : > { %v7503_v15 = vadd.f32 %v2013_v63, %v1837_v30 }
 0x223   : > { %v1841_v58 = vpop.f32.mrf.mxu0  ;;  %v2018_v3 = vpop.f32.mrf.mxu1 }
 0x224   : > { %v1842_v51 = vadd.f32 %v1841_v58, %v7364_v40 }
 0x225   : > { %v1843_v22 = vpop.f32.mrf.mxu0  ;;  %v2020_v4 = vpop.f32.mrf.mxu1 }
 0x226   : > { %v7506_v53 = vadd.f32 %v2018_v3, %v1842_v51 }
 0x227   : > { %v1844_v57 = vpop.f32.mrf.mxu0  ;;  %v2021_v55 = vpop.f32.mrf.mxu1 }
 0x228   : > { %v1845_v41 = vadd.f32 %v1844_v57, %v7367_v20  ;;  %v6150_v20 = vld [vmem:[#allocation9 + $0x80] sm:$0xff]  }
 0x229   : > { %v1846_v6 = vpop.f32.mrf.mxu0  ;;  %v2023_v37 = vpop.f32.mrf.mxu1  ;;  %4994 = vmatpush3.bf16.msra.mxu0 %v6150_v20 }
 0x22a   : > { %v7509_v11 = vadd.f32 %v2021_v55, %v1845_v41 }
 0x22b   : > { %v1849_v43 = vpop.f32.mrf.mxu0  ;;  %v2026_v49 = vpop.f32.mrf.mxu1 }
 0x22c   : > { %v1850_v16 = vadd.f32 %v1849_v43, %v7372_v14 }
 0x22d   : > { %v1851_v40 = vpop.f32.mrf.mxu0  ;;  %v2028_v34 = vpop.f32.mrf.mxu1 }
 0x22e   : > { %v7512_v8 = vadd.f32 %v2026_v49, %v1850_v16 }
 0x22f   : > { %v1852_v42 = vpop.f32.mrf.mxu0  ;;  %v2029_v30 = vpop.f32.mrf.mxu1 }
 0x230   : > { %v1853_v54 = vadd.f32 %v1852_v42, %v7377_v1 }
 0x231   : > { %v1854_v63 = vpop.f32.mrf.mxu0  ;;  %v2031_v33 = vpop.f32.mrf.mxu1 }
 0x232   : > { %v7515_v13 = vadd.f32 %v2029_v30, %v1853_v54 }
 0x233   : > { %v1857_v14 = vpop.f32.mrf.mxu0  ;;  %v2034_v51 = vpop.f32.mrf.mxu1 }
 0x234   : > { %v1858_v58 = vadd.f32 %v1857_v14, %v7387_v0  ;;  %v6151_v14 = vld [vmem:[#allocation9 + $0x170] sm:$0xff]  }
 0x235   : > { %v1859_v3 = vpop.f32.mrf.mxu0  ;;  %v2036_v4 = vpop.f32.mrf.mxu1  ;;  %5093 = vmatprep.subr.bf16.mxu1 %v6151_v14 }
 0x236   : > { %v7518_v22 = vadd.f32 %v2034_v51, %v1858_v58 }
 0x237   : > { %v1860_v57 = vpop.f32.mrf.mxu0  ;;  %v2037_v55 = vpop.f32.mrf.mxu1 }
 0x238   : > { %v1861_v41 = vadd.f32 %v1860_v57, %v7393_v19 }
 0x239   : > { %v1862_v1 = vpop.f32.mrf.mxu0  ;;  %v2039_v6 = vpop.f32.mrf.mxu1 }
 0x23a   : > { %v7521_v25 = vadd.f32 %v2037_v55, %v1861_v41 }
 0x23b   : > { %v1865_v37 = vpop.f32.mrf.mxu0  ;;  %v2042_v16 = vpop.f32.mrf.mxu1 }
 0x23c   : > { %v1866_v43 = vadd.f32 %v1865_v37, %v7398_v27  ;;  %v6152_v37 = vld [vmem:[#allocation9 + $0x130] sm:$0xff]  }
 0x23d   : > { %v1867_v49 = vpop.f32.mrf.mxu0  ;;  %v2044_v0 = vpop.f32.mrf.mxu1  ;;  %5094 = vmatpush3.bf16.msra.mxu1 %v6152_v37 }
 0x23e   : > { %v7524_v40 = vadd.f32 %v2042_v16, %v1866_v43 }
 0x23f   : > { %v1868_v45 = vpop.f32.mrf.mxu0  ;;  %v2045_v21 = vpop.f32.mrf.mxu1 }
 0x240   : > { %v1869_v34 = vadd.f32 %v1868_v45, %v7400_v24 }
 0x241   : > { %v1870_v42 = vpop.f32.mrf.mxu0  ;;  %v2047_v19 = vpop.f32.mrf.mxu1 }
 0x242   : > { %v7527_v20 = vadd.f32 %v2045_v21, %v1869_v34 }
 0x243   : > { %v1873_v54 = vpop.f32.mrf.mxu0  ;;  %v2050_v63 = vpop.f32.mrf.mxu1 }
 0x244   : > { %v1874_v30 = vadd.f32 %v1873_v54, %v7403_v9 }
 0x245   : > { %v1875_v33 = vpop.f32.mrf.mxu0  ;;  %v2052_v58 = vpop.f32.mrf.mxu1 }
 0x246   : > { %v7530_v27 = vadd.f32 %v2050_v63, %v1874_v30 }
 0x247   : > { %v1876_v51 = vpop.f32.mrf.mxu0  ;;  %v2053_v4 = vpop.f32.mrf.mxu1 }
 0x248   : > { %v1877_v3 = vadd.f32 %v1876_v51, %v7405_v46 }
 0x249   : > { %v1878_v24 = vpop.f32.mrf.mxu0  ;;  %v2055_v41 = vpop.f32.mrf.mxu1 }
 0x24a   : > { %v7533_v57 = vadd.f32 %v2053_v4, %v1877_v3 }
 0x24b   : > { %v1881_v55 = vpop.f32.mrf.mxu0  ;;  %v2058_v6 = vpop.f32.mrf.mxu1 }
 0x24c   : > { %v1882_v1 = vadd.f32 %v1881_v55, %v7409_v7 }
 0x24d   : > { %v1883_v9 = vpop.f32.mrf.mxu0  ;;  %v2060_v16 = vpop.f32.mrf.mxu1 }
 0x24e   : > { %v7536_v43 = vadd.f32 %v2058_v6, %v1882_v1 }
 0x24f   : > { %v1884_v49 = vpop.f32.mrf.mxu0  ;;  %v2061_v45 = vpop.f32.mrf.mxu1 }
 0x250   : > { %v1885_v0 = vadd.f32 %v1884_v49, %v7411_v26 }
 0x251   : > { %v1886_v46 = vpop.f32.mrf.mxu0  ;;  %v2063_v21 = vpop.f32.mrf.mxu1 }
 0x252   : > { %v7539_v34 = vadd.f32 %v2061_v45, %v1885_v0 }
 0x253   : > { %v1889_v42 = vpop.f32.mrf.mxu0  ;;  %v2066_v54 = vpop.f32.mrf.mxu1 }
 0x254   : > { %v1890_v19 = vadd.f32 %v1889_v42, %v7415_v62  ;;  %v6153_v42 = vld [vmem:[#allocation9 + $0x168] sm:$0xff]  }
 0x255   : > { %v1891_v7 = vpop.f32.mrf.mxu0  ;;  %v2068_v63 = vpop.f32.mrf.mxu1  ;;  %5095 = vmatprep.subr.bf16.mxu1 %v6153_v42  ;;  %v7574_v42 = vld [vmem:[%s10018_s4 + $0x1] ss:$0 sm:$0xff] }
 0x256   : > { %v7542_v30 = vadd.f32 %v2066_v54, %v1890_v19 }
 0x257   : > { %v1892_v33 = vpop.f32.mrf.mxu0  ;;  %v2069_v58 = vpop.f32.mrf.mxu1 }
 0x258   : > { %v1893_v14 = vadd.f32 %v1892_v33, %v7417_v35 }
 0x259   : > { %v1894_v51 = vpop.f32.mrf.mxu0  ;;  %v2071_v26 = vpop.f32.mrf.mxu1 }
 0x25a   : > { %v7545_v3 = vadd.f32 %v2069_v58, %v1893_v14 }
 0x25b   : > { %v1897_v4 = vpop.f32.mrf.mxu0  ;;  %v2074_v41 = vpop.f32.mrf.mxu1 }
 0x25c   : > { %v1898_v24 = vadd.f32 %v1897_v4, %v7421_v39  ;;  %v6154_v4 = vld [vmem:[#allocation9 + $0x128] sm:$0xff]  }
 0x25d   : > { %v1899_v55 = vpop.f32.mrf.mxu0  ;;  %v2076_v62 = vpop.f32.mrf.mxu1  ;;  %5096 = vmatpush3.bf16.msra.mxu1 %v6154_v4 }
 0x25e   : > { %v7548_v1 = vadd.f32 %v2074_v41, %v1898_v24 }
 0x25f   : > { %v1900_v6 = vpop.f32.mrf.mxu0  ;;  %v2077_v37 = vpop.f32.mrf.mxu1 }
 0x260   : > { %v1901_v9 = vadd.f32 %v1900_v6, %v7423_v10 }
 0x261   : > { %v1902_v16 = vpop.f32.mrf.mxu0  ;;  %v2079_v35 = vpop.f32.mrf.mxu1 }
 0x262   : > { %v7551_v49 = vadd.f32 %v2077_v37, %v1901_v9 }
 0x263   : > { %v1905_v0 = vpop.f32.mrf.mxu0  ;;  %v2082_v46 = vpop.f32.mrf.mxu1 }
 0x264   : > { %v1906_v45 = vadd.f32 %v1905_v0, %v7427_v61 }
 0x265   : > { %v1907_v21 = vpop.f32.mrf.mxu0  ;;  %v2084_v19 = vpop.f32.mrf.mxu1 }
 0x266   : > { %v7554_v39 = vadd.f32 %v2082_v46, %v1906_v45  ;;  %v7568_v46 = vld [vmem:[%s10018_s4] ss:$0 sm:$0xff] }
 0x267   : > { %v1908_v54 = vpop.f32.mrf.mxu0  ;;  %v2085_v63 = vpop.f32.mrf.mxu1 }
 0x268   : > { %v1909_v7 = vadd.f32 %v1908_v54, %v7429_v2 }
 0x269   : > { %v1910_v10 = vpop.f32.mrf.mxu0  ;;  %v2087_v14 = vpop.f32.mrf.mxu1 }
 0x26a   : > { %v7557_v33 = vadd.f32 %v2085_v63, %v1909_v7  ;;  %v7579_v7 = vstv %s6565_s8  ;;  %v6156_v10 = vld [vmem:[#allocation9 + $0x120] sm:$0xff]   ;;  %s354_s8 = ssub.f32 0.0, %s6552_s10 }
 0x26b   : > { %v1913_v58 = vpop.f32.mrf.mxu0  ;;  %v2090_v26 = vpop.f32.mrf.mxu1 }
 0x26c   : > { %v1914_v51 = vadd.f32 %v1913_v58, %v7433_v48 }
 0x26d   : > { %v1915_v61 = vpop.f32.mrf.mxu0  ;;  %v2092_v41 = vpop.f32.mrf.mxu1 }
 0x26e   : > { %v7560_v24 = vadd.f32 %v2090_v26, %v1914_v51  ;;  %v7584_v26 = vstv %s2473_s26  ;;  %v2858_v41 = vrot.slane %v10092_v29, 1  ;;  %v7599_v29 = vstv %s6563_s24  ;;  %s6315_s26 = scalar_lea.vmem %s6314_s22, 8192 }
 0x26f   : > { %v1916_v55 = vpop.f32.mrf.mxu0  ;;  %v2093_v2 = vpop.f32.mrf.mxu1  ;;  %p6317_p10 = scmp.lt.s32.totalorder %s6315_s26, %s6309_s2 }
 0x270   : > { %v1917_v62 = vadd.f32 %v1916_v55, %v7435_v60  ;;  %v6155_v60 = vld [vmem:[#allocation9 + $0x160] sm:$0xff]  }
 0x271   : > { %v1918_v6 = vpop.f32.mrf.mxu0  ;;  %v2095_v37 = vpop.f32.mrf.mxu1  ;;  %5097 = vmatprep.subr.bf16.mxu1 %v6155_v60  ;;  %p6318_p11 = por %p6317_p10, %p6316_p8 }
 0x272   : > { %v7563_v9 = vadd.f32 %v2093_v2, %v1917_v62  ;;  %5098 = vmatpush3.bf16.msra.mxu1 %v6156_v10  ;;  %v7589_v62 = vstv %s6560_s16 }
 0x273   : > { %v1921_v16 = vpop.f32.mrf.mxu0  ;;  %p6319_p13 = pnand %p6318_p11, %p6312_p6 }
 0x275   : > { %v1923_v35 = vpop.f32.mrf.mxu0 }
 0x277   : > { %v1924_v48 = vpop.f32.mrf.mxu0 }
 0x279   : > { %v1926_v0 = vpop.f32.mrf.mxu0 }
 0x27b   : > { %v5357_v45 = vpop.f32.mrf.mxu0 }
 0x27c   : > { %v2148_v21 = vadd.f32 %v5357_v45, %v7455_v44 }
 0x27d   : > { %v2139_v19 = vpop.f32.mrf.mxu0 }
 0x27e   : > { %v2289_v54 = vmul.f32 %v7568_v46, %v2148_v21  ;;  %v2923_v21 = vmul.f32 %v6649_v56, %v2858_v41 }
 0x27f   : > { %v5358_v63 = vpop.f32.mrf.mxu0 }
 0x280   : > { %v2330_v14 = vadd.f32 %v7574_v42, %v2289_v54  ;;  %v2151_v44 = vadd.f32 %v5358_v63, %v7458_v23 }
 0x281   : > { %v2142_v58 = vpop.f32.mrf.mxu0 }
 0x282   : > { %vm2366_vm4 = vcmp.ge.f32.partialorder %v2330_v14, 0.0  ;;  %v2403_v51 = vmul.f32 %v7579_v7, %v2330_v14  ;;  %v2290_v61 = vmul.f32 %v7568_v46, %v2151_v44 }
 0x283   : > { %v5361_v4 = vpop.f32.mrf.mxu0 }
 0x284   : > { %v2439_v55 = vsel %vm2366_vm4, %v2330_v14, %v2403_v51  ;;  %v2331_v2 = vadd.f32 %v7574_v42, %v2290_v61  ;;  %v2164_v23 = vadd.f32 %v5361_v4, %v7467_v38  ;;  %v7613_v4 = vpack.c.bf16 %v2923_v21, %v2858_v41 }
 0x285   : > { %v2477_v6 = vmax.f32 %v7584_v26, %v2439_v55  ;;  %v2155_v37 = vpop.f32.mrf.mxu0 }
 0x286   : > { %vm2367_vm5 = vcmp.ge.f32.partialorder %v2331_v2, 0.0  ;;  %v2404_v16 = vmul.f32 %v7579_v7, %v2331_v2  ;;  %v2293_v35 = vmul.f32 %v7568_v46, %v2164_v23  ;;  %v2156_v48 = vadd.f32 %v2155_v37, %v7461_v31  ;;  %10094 = vst [vmem:[#allocation27_spill] sm:$0xff] %v7613_v4  ;;  %v6157_v23 = vld [vmem:[#allocation9 + $0x1f8] sm:$0xff]  }
 0x287   : > { %v2514_v0 = vmin.f32 %v7589_v62, %v2477_v6  ;;  %v5362_v45 = vpop.f32.mrf.mxu0  ;;  %v6159_v6 = vld [vmem:[#allocation9 + $0x158] sm:$0xff]   ;;  %5203 = vmatprep.subr.bf16.mxu0 %v6157_v23 }
 0x288   : > { %v2440_v60 = vsel %vm2367_vm5, %v2331_v2, %v2404_v16  ;;  %v2334_v38 = vadd.f32 %v7574_v42, %v2293_v35  ;;  %v2291_v19 = vmul.f32 %v7568_v46, %v2156_v48  ;;  %v2167_v54 = vadd.f32 %v5362_v45, %v7475_v36  ;;  %5099 = vmatprep.subr.bf16.mxu1 %v6159_v6 }
 0x289   : > { %v2478_v63 = vmax.f32 %v7584_v26, %v2440_v60  ;;  %v2158_v10 = vpop.f32.mrf.mxu0  ;;  %v7610_v58 = vmul.f32 %v7599_v29, %v2514_v0 }
 0x28a   : > { %vm2370_vm6 = vcmp.ge.f32.partialorder %v2334_v38, 0.0  ;;  %v2407_v31 = vmul.f32 %v7579_v7, %v2334_v38  ;;  %v2332_v14 = vadd.f32 %v7574_v42, %v2291_v19  ;;  %v2294_v44 = vmul.f32 %v7568_v46, %v2167_v54 }
 0x28b   : > { %v2159_v51 = vadd.f32 %v2158_v10, %v7464_v32  ;;  %v5365_v61 = vpop.f32.mrf.mxu0  ;;  %v2515_v37 = vmin.f32 %v7589_v62, %v2478_v63  ;;  %v6160_v63 = vld [vmem:[#allocation9 + $0x118] sm:$0xff]  }
 0x28c   : > { %v2443_v55 = vsel %vm2370_vm6, %v2334_v38, %v2407_v31  ;;  %vm2368_vm7 = vcmp.ge.f32.partialorder %v2332_v14, 0.0  ;;  %v2405_v36 = vmul.f32 %v7579_v7, %v2332_v14  ;;  %v2335_v2 = vadd.f32 %v7574_v42, %v2294_v44  ;;  %5100 = vmatpush3.bf16.msra.mxu1 %v6160_v63 }
 0x28d   : > { %v2481_v16 = vmax.f32 %v7584_v26, %v2443_v55  ;;  %v2292_v35 = vmul.f32 %v7568_v46, %v2159_v51  ;;  %v2180_v48 = vadd.f32 %v5365_v61, %v7493_v12  ;;  %v2171_v32 = vpop.f32.mrf.mxu0  ;;  %v5697_v61 = vcvt.f32.s32 %v7610_v58 }
 0x28e   : > { %v2441_v0 = vsel %vm2368_vm7, %v2332_v14, %v2405_v36  ;;  %vm2371_vm8 = vcmp.ge.f32.partialorder %v2335_v2, 0.0  ;;  %v2408_v41 = vmul.f32 %v7579_v7, %v2335_v2  ;;  %v2172_v45 = vadd.f32 %v2171_v32, %v7482_v50 }
 0x28f   : > { %v2518_v21 = vmin.f32 %v7589_v62, %v2481_v16  ;;  %v2479_v60 = vmax.f32 %v7584_v26, %v2441_v0  ;;  %v2333_v38 = vadd.f32 %v7574_v42, %v2292_v35  ;;  %v2297_v19 = vmul.f32 %v7568_v46, %v2180_v48  ;;  %v5366_v54 = vpop.f32.mrf.mxu0 }
 0x290   : > { %v2444_v12 = vsel %vm2371_vm8, %v2335_v2, %v2408_v41  ;;  %v2295_v10 = vmul.f32 %v7568_v46, %v2172_v45  ;;  %v2183_v31 = vadd.f32 %v5366_v54, %v7497_v59  ;;  %v5695_v14 = vand.u32 2147483647, %v7610_v58 }
 0x291   : > { %v2516_v50 = vmin.f32 %v7589_v62, %v2479_v60  ;;  %v2482_v44 = vmax.f32 %v7584_v26, %v2444_v12  ;;  %vm2369_vm9 = vcmp.ge.f32.partialorder %v2333_v38, 0.0  ;;  %v2174_v51 = vpop.f32.mrf.mxu0  ;;  %v2406_v55 = vmul.f32 %v7579_v7, %v2333_v38 }
 0x292   : > { %v2338_v36 = vadd.f32 %v7574_v42, %v2297_v19  ;;  %v2336_v2 = vadd.f32 %v7574_v42, %v2295_v10  ;;  %v2298_v23 = vmul.f32 %v7568_v46, %v2183_v31  ;;  %v7638_v59 = vmul.f32 %v7599_v29, %v2515_v37 }
 0x293   : > { %v7641_v6 = vmul.f32 %v7599_v29, %v2518_v21  ;;  %v7644_v16 = vmul.f32 %v7599_v29, %v2516_v50  ;;  %v2175_v35 = vadd.f32 %v2174_v51, %v7486_v17  ;;  %v5369_v48 = vpop.f32.mrf.mxu0  ;;  %v2442_v32 = vsel %vm2369_vm9, %v2333_v38, %v2406_v55 }
 0x294   : > { %vm2374_vm10 = vcmp.ge.f32.partialorder %v2338_v36, 0.0  ;;  %v2411_v0 = vmul.f32 %v7579_v7, %v2338_v36  ;;  %vm2372_vm11 = vcmp.ge.f32.partialorder %v2336_v2, 0.0  ;;  %v2519_v41 = vmin.f32 %v7589_v62, %v2482_v44 }
 0x295   : > { %v2480_v45 = vmax.f32 %v7584_v26, %v2442_v32  ;;  %v2409_v37 = vmul.f32 %v7579_v7, %v2336_v2  ;;  %v2339_v21 = vadd.f32 %v7574_v42, %v2298_v23  ;;  %v2187_v60 = vpop.f32.mrf.mxu0  ;;  %v2296_v54 = vmul.f32 %v7568_v46, %v2175_v35 }
 0x296   : > { %v2447_v19 = vsel %vm2374_vm10, %v2338_v36, %v2411_v0  ;;  %v2196_v17 = vadd.f32 %v5369_v48, %v7506_v53  ;;  %v2188_v38 = vadd.f32 %v2187_v60, %v7500_v52  ;;  %v5698_v31 = vcvt.s32.f32 %v5697_v61 }
 0x297   : > { %v2485_v63 = vmax.f32 %v7584_v26, %v2447_v19  ;;  %v2445_v12 = vsel %vm2372_vm11, %v2336_v2, %v2409_v37  ;;  %vm2375_vm12 = vcmp.ge.f32.partialorder %v2339_v21, 0.0  ;;  %v5370_v10 = vpop.f32.mrf.mxu0  ;;  %v2412_v44 = vmul.f32 %v7579_v7, %v2339_v21 }
 0x298   : > { %v2483_v50 = vmax.f32 %v7584_v26, %v2445_v12  ;;  %v2337_v51 = vadd.f32 %v7574_v42, %v2296_v54  ;;  %v2301_v55 = vmul.f32 %v7568_v46, %v2196_v17  ;;  %v7661_v36 = vmul.f32 %v7599_v29, %v2519_v41  ;;  %v6163_v17 = vld [vmem:[#allocation9 + $0x150] sm:$0xff]  }
 0x299   : > { %v2522_v53 = vmin.f32 %v7589_v62, %v2485_v63  ;;  %v2299_v52 = vmul.f32 %v7568_v46, %v2188_v38  ;;  %v2199_v2 = vadd.f32 %v5370_v10, %v7509_v11  ;;  %v2190_v23 = vpop.f32.mrf.mxu0  ;;  %v7667_v61 = vmin.f32 %v7589_v62, %v2480_v45  ;;  %5101 = vmatprep.subr.bf16.mxu1 %v6163_v17 }
 0x29a   : > { %v2448_v35 = vsel %vm2375_vm12, %v2339_v21, %v2412_v44  ;;  %vm2373_vm13 = vcmp.ge.f32.partialorder %v2337_v51, 0.0  ;;  %v2410_v48 = vmul.f32 %v7579_v7, %v2337_v51  ;;  %v2520_v32 = vmin.f32 %v7589_v62, %v2483_v50 }
 0x29b   : > { %v2486_v0 = vmax.f32 %v7584_v26, %v2448_v35  ;;  %v2342_v41 = vadd.f32 %v7574_v42, %v2301_v55  ;;  %v2340_v37 = vadd.f32 %v7574_v42, %v2299_v52  ;;  %vm7674_vm14 = vcmp.lt.f32.partialorder %v5695_v14, 8388608.0  ;;  %v5373_v11 = vpop.f32.mrf.mxu0 }
 0x29c   : > { %v2446_v19 = vsel %vm2373_vm13, %v2337_v51, %v2410_v48  ;;  %v2302_v45 = vmul.f32 %v7568_v46, %v2199_v2  ;;  %v2191_v21 = vadd.f32 %v2190_v23, %v7503_v15  ;;  %v5699_v54 = vand.u32 2147483647, %v5698_v31  ;;  %v6164_v15 = vld [vmem:[#allocation9 + $0x110] sm:$0xff]  }
 0x29d   : > { %v7681_v38 = vmul.f32 %v7599_v29, %v2522_v53  ;;  %v2523_v63 = vmin.f32 %v7589_v62, %v2486_v0  ;;  %vm2378_vm15 = vcmp.ge.f32.partialorder %v2342_v41, 0.0  ;;  %v2415_v12 = vmul.f32 %v7579_v7, %v2342_v41  ;;  %v2203_v14 = vpop.f32.mrf.mxu0  ;;  %5102 = vmatpush3.bf16.msra.mxu1 %v6164_v15 }
 0x29e   : > { %vm2376_vm0 = vcmp.ge.f32.partialorder %v2340_v37, 0.0  ;;  %v2413_v10 = vmul.f32 %v7579_v7, %v2340_v37  ;;  %v2343_v50 = vadd.f32 %v7574_v42, %v2302_v45  ;;  %v2300_v44 = vmul.f32 %v7568_v46, %v2191_v21 }
 0x29f   : > { %v7689_v31 = vmul.f32 %v7599_v29, %v2520_v32  ;;  %v2484_v51 = vmax.f32 %v7584_v26, %v2446_v19  ;;  %v2451_v55 = vsel %vm2378_vm15, %v2342_v41, %v2415_v12  ;;  %v5700_v53 = vand.u32 2147483648, %v7610_v58  ;;  %v5374_v52 = vpop.f32.mrf.mxu0 }
 0x2a0   : > { %v2489_v2 = vmax.f32 %v7584_v26, %v2451_v55  ;;  %v2449_v23 = vsel %vm2376_vm0, %v2340_v37, %v2413_v10  ;;  %vm2379_vm3 = vcmp.ge.f32.partialorder %v2343_v50, 0.0  ;;  %v2416_v35 = vmul.f32 %v7579_v7, %v2343_v50 }
 0x2a1   : > { %v2487_v48 = vmax.f32 %v7584_v26, %v2449_v23  ;;  %v2341_v0 = vadd.f32 %v7574_v42, %v2300_v44  ;;  %v5701_v45 = vor.u32 %v5700_v53, %v5699_v54  ;;  %v5703_v32 = vand.u32 2147483647, %v7638_v59  ;;  %v2206_v21 = vpop.f32.mrf.mxu0 }
 0x2a2   : > { %v7699_v41 = vmul.f32 %v7599_v29, %v2523_v63  ;;  %v2526_v19 = vmin.f32 %v7589_v62, %v2489_v2  ;;  %v2452_v17 = vsel %vm2379_vm3, %v2343_v50, %v2416_v35  ;;  %v5705_v37 = vcvt.f32.s32 %v7638_v59 }
 0x2a3   : > { %v2524_v12 = vmin.f32 %v7589_v62, %v2487_v48  ;;  %v2490_v10 = vmax.f32 %v7584_v26, %v2452_v17  ;;  %vm2377_vm4 = vcmp.ge.f32.partialorder %v2341_v0, 0.0  ;;  %v2414_v15 = vmul.f32 %v7579_v7, %v2341_v0  ;;  %v5377_v44 = vpop.f32.mrf.mxu0 }
 0x2a4   : > { %v7707_v54 = vmin.f32 %v7589_v62, %v2484_v51  ;;  %v7712_v63 = vsel %vm7674_vm14, %v5701_v45, %v7610_v58  ;;  %v5706_v55 = vcvt.s32.f32 %v5705_v37  ;;  %v5708_v50 = vand.u32 2147483648, %v7638_v59 }
 0x2a5   : > { %v7716_v53 = vmul.f32 %v7599_v29, %v2526_v19  ;;  %v2527_v2 = vmin.f32 %v7589_v62, %v2490_v10  ;;  %v2450_v23 = vsel %vm2377_vm4, %v2341_v0, %v2414_v15  ;;  %vm7719_vm5 = vcmp.lt.f32.partialorder %v5703_v32, 8388608.0  ;;  %v7723_v51 = vpop.f32.mrf.mxu0 }
 0x2a6   : > { %v7726_v48 = vmul.f32 %v7599_v29, %v2524_v12  ;;  %v2488_v58 = vmax.f32 %v7584_v26, %v2450_v23  ;;  %v5707_v60 = vand.u32 2147483647, %v5706_v55  ;;  %v2212_v45 = vadd.f32 %v5373_v11, %v7518_v22 }
 0x2a7   : > { %v2731_v19 = vrot.slane %v7712_v63, 7  ;;  %v2204_v17 = vadd.f32 %v2203_v14, %v7512_v8  ;;  %v2215_v0 = vadd.f32 %v5374_v52, %v7521_v25  ;;  %v2207_v32 = vadd.f32 %v2206_v21, %v7515_v13  ;;  %v7734_v37 = vpop.f32.mrf.mxu0 }
 0x2a8   : > { %v5709_v10 = vor.u32 %v5708_v50, %v5707_v60  ;;  %v2305_v12 = vmul.f32 %v7568_v46, %v2212_v45  ;;  %v2228_v23 = vadd.f32 %v5377_v44, %v7530_v27  ;;  %v7740_v55 = vmul.f32 %v7599_v29, %v2527_v2  ;;  %v6167_v45 = vld [vmem:[#allocation9 + $0x148] sm:$0xff]  }
 0x2a9   : > { %v2303_v22 = vmul.f32 %v7568_v46, %v2204_v17  ;;  %v2306_v8 = vmul.f32 %v7568_v46, %v2215_v0  ;;  %v2304_v25 = vmul.f32 %v7568_v46, %v2207_v32  ;;  %v7745_v11 = vpop.f32.mrf.mxu0  ;;  %v7748_v13 = vmin.f32 %v7589_v62, %v2488_v58  ;;  %5103 = vmatprep.subr.bf16.mxu1 %v6167_v45 }
 0x2aa   : > { %10099 = vst [vmem:[#allocation28_spill] sm:$0xff] %v7740_v55  ;;  %v7753_v14 = vsel %vm7719_vm5, %v5709_v10, %v7638_v59  ;;  %v2346_v27 = vadd.f32 %v7574_v42, %v2305_v12  ;;  %v2309_v52 = vmul.f32 %v7568_v46, %v2228_v23  ;;  %v5711_v2 = vand.u32 2147483647, %v7644_v16 }
 0x2ab   : > { %v2747_v21 = vrot.slane %v7753_v14, 7  ;;  %v7760_v44 = vpack.c.bf16 %v7753_v14, %v7712_v63  ;;  %v2344_v50 = vadd.f32 %v7574_v42, %v2303_v22  ;;  %v7764_v58 = vpop.f32.mrf.mxu0  ;;  %v2347_v35 = vadd.f32 %v7574_v42, %v2306_v8  ;;  %v6168_v8 = vld [vmem:[#allocation9 + $0x108] sm:$0xff]  }
 0x2ac   : > { %vm2382_vm6 = vcmp.ge.f32.partialorder %v2346_v27, 0.0  ;;  %v2419_v59 = vmul.f32 %v7579_v7, %v2346_v27  ;;  %v2345_v60 = vadd.f32 %v7574_v42, %v2304_v25  ;;  %5104 = vmatpush3.bf16.msra.mxu1 %v6168_v8  ;;  %vm7799_vm11 = vcmp.lt.f32.partialorder %v5711_v2, 8388608.0 }
 0x2ad   : > { %10100 = vst [vmem:[#allocation26_spill] sm:$0xff] %v7760_v44  ;;  %3616 = vmatprep.mubr.bf16.mxu1 %v7760_v44  ;;  %vm2380_vm7 = vcmp.ge.f32.partialorder %v2344_v50, 0.0  ;;  %v2417_v17 = vmul.f32 %v7579_v7, %v2344_v50  ;;  %v2763_v0 = vsel %vm555_vm1, %v2731_v19, %v2747_v21  ;;  %v2779_v32 = vsel %vm555_vm1, %v2747_v21, %v2731_v19  ;;  %v7775_v10 = vpop.f32.mrf.mxu0 }
 0x2ae   : > { %v2455_v12 = vsel %vm2382_vm6, %v2346_v27, %v2419_v59  ;;  %vm2383_vm8 = vcmp.ge.f32.partialorder %v2347_v35, 0.0  ;;  %v2420_v23 = vmul.f32 %v7579_v7, %v2347_v35  ;;  %v2796_v22 = vmul.f32 %v6611_v28, %v2779_v32  ;;  %v6158_v59 = vld [vmem:[#allocation9 + $0x1b8] sm:$0xff]  }
 0x2af   : > { %v2493_v25 = vmax.f32 %v7584_v26, %v2455_v12  ;;  %v2453_v47 = vsel %vm2380_vm7, %v2344_v50, %v2417_v17  ;;  %vm2381_vm9 = vcmp.ge.f32.partialorder %v2345_v60, 0.0  ;;  %v2418_v15 = vmul.f32 %v7579_v7, %v2345_v60  ;;  %v7781_v5 = vpop.f32.mrf.mxu0  ;;  %v6161_v12 = vld [vmem:[#allocation9 + $0x1f0] sm:$0xff]  }
 0x2b0   : > { %v2491_v19 = vmax.f32 %v7584_v26, %v2453_v47  ;;  %v2456_v21 = vsel %vm2383_vm8, %v2347_v35, %v2420_v23  ;;  %v2827_v44 = vpack.c.bf16 %v2763_v0, %v2796_v22  ;;  %v2350_v27 = vadd.f32 %v7574_v42, %v2309_v52 }
 0x2b1   : > { %v2530_v32 = vmin.f32 %v7589_v62, %v2493_v25  ;;  %v2494_v45 = vmax.f32 %v7584_v26, %v2456_v21  ;;  %v2454_v55 = vsel %vm2381_vm9, %v2345_v60, %v2418_v15  ;;  %v7789_v50 = vmul.f32 %v7599_v29, %v7667_v61  ;;  %v7791_v17 = vpop.f32.mrf.mxu0  ;;  %v6162_v25 = vld [vmem:[#allocation9 + $0x1b0] sm:$0xff]  }
 0x2b2   : > { %v2528_v47 = vmin.f32 %v7589_v62, %v2491_v19  ;;  %3617 = vmatmul.mubr.bf16.gmra.mxu1 %v2827_v44  ;;  %3769 = vmatprep.mubr.bf16.mxu0 %v2827_v44  ;;  %v2492_v52 = vmax.f32 %v7584_v26, %v2454_v55  ;;  %vm2386_vm10 = vcmp.ge.f32.partialorder %v2350_v27, 0.0  ;;  %v2423_v35 = vmul.f32 %v7579_v7, %v2350_v27 }
 0x2b3   : > { %v2531_v15 = vmin.f32 %v7589_v62, %v2494_v45  ;;  %3770 = vmatmul.mubr.bf16.vlgmr.msra.gmra.mxu0 %v7613_v4  ;;  %v5713_v60 = vcvt.f32.s32 %v7644_v16  ;;  %v7804_v23 = vpop.f32.mrf.mxu0  ;;  %v7807_v44 = vmul.f32 %v7599_v29, %v2530_v32  ;;  %v5716_v8 = vand.u32 2147483648, %v7644_v16  ;;  %v6165_v32 = vld [vmem:[#allocation9 + $0x1e8] sm:$0xff]  }
 0x2b4   : > { %v7810_v55 = vmul.f32 %v7599_v29, %v2528_v47  ;;  %v2459_v22 = vsel %vm2386_vm10, %v2350_v27, %v2423_v35  ;;  %5204 = vmatpush3.bf16.msra.mxu0 %v6158_v59  ;;  %v7814_v2 = vmin.f32 %v7589_v62, %v2492_v52  ;;  %v5721_v45 = vcvt.f32.s32 %v7789_v50 }
 0x2b5   : > { %10103 = vst [vmem:[#allocation29_spill] sm:$0xff] %v7807_v44  ;;  %v2497_v19 = vmax.f32 %v7584_v26, %v2459_v22  ;;  %v5714_v21 = vcvt.s32.f32 %v5713_v60  ;;  %v7818_v0 = vpop.f32.mrf.mxu0  ;;  %5205 = vmatprep.subr.bf16.mxu0 %v6161_v12  ;;  %v7821_v47 = vmul.f32 %v7599_v29, %v2531_v15  ;;  %v5719_v27 = vand.u32 2147483647, %v7789_v50 }
 0x2b6   : > { %10104 = vst [vmem:[#allocation30_spill] sm:$0xff] %v7810_v55  ;;  %v2220_v59 = vadd.f32 %v7723_v51, %v7524_v40  ;;  %v2231_v52 = vadd.f32 %v7734_v37, %v7533_v57  ;;  %v5722_v22 = vcvt.s32.f32 %v5721_v45  ;;  %v2223_v4 = vadd.f32 %v7745_v11, %v7527_v20  ;;  %v6166_v51 = vld [vmem:[#allocation9 + $0x1a8] sm:$0xff]   ;;  %v6169_v20 = vld [vmem:[#allocation9 + $0x1e0] sm:$0xff]  }
 0x2b7   : > { %10105 = vst [vmem:[#allocation31_spill] sm:$0xff] %v7821_v47  ;;  %v2534_v35 = vmin.f32 %v7589_v62, %v2497_v19  ;;  %v5715_v60 = vand.u32 2147483647, %v5714_v21  ;;  %v7831_v12 = vpop.f32.mrf.mxu0  ;;  %v5727_v44 = vand.u32 2147483647, %v7641_v6  ;;  %v5729_v40 = vcvt.f32.s32 %v7641_v6 }
 0x2b8   : > { %v2307_v15 = vmul.f32 %v7568_v46, %v2220_v59  ;;  %v2310_v47 = vmul.f32 %v7568_v46, %v2231_v52  ;;  %5206 = vmatpush3.bf16.msra.mxu0 %v6162_v25  ;;  %v5723_v37 = vand.u32 2147483647, %v5722_v22  ;;  %v5724_v19 = vand.u32 2147483648, %v7789_v50 }
 0x2b9   : > { %v5717_v57 = vor.u32 %v5716_v8, %v5715_v60  ;;  %v2308_v21 = vmul.f32 %v7568_v46, %v2223_v4  ;;  %v7839_v45 = vpop.f32.mrf.mxu0  ;;  %5207 = vmatprep.subr.bf16.mxu0 %v6165_v32  ;;  %v7842_v11 = vmul.f32 %v7599_v29, %v2534_v35  ;;  %vm5720_vm12 = vcmp.lt.f32.partialorder %v5719_v27, 8388608.0 }
 0x2ba   : > { %v2348_v59 = vadd.f32 %v7574_v42, %v2307_v15  ;;  %v2351_v52 = vadd.f32 %v7574_v42, %v2310_v47  ;;  %v5725_v25 = vor.u32 %v5724_v19, %v5723_v37  ;;  %v5730_v60 = vcvt.s32.f32 %v5729_v40  ;;  %v6170_v47 = vld [vmem:[#allocation9 + $0x1a0] sm:$0xff]  }
 0x2bb   : > { %10106 = vst [vmem:[#allocation32_spill] sm:$0xff] %v7842_v11  ;;  %v7849_v8 = vsel %vm7799_vm11, %v5717_v57, %v7644_v16  ;;  %v2349_v4 = vadd.f32 %v7574_v42, %v2308_v21  ;;  %v5389_v22 = vpop.f32.mrf.mxu0  ;;  %vm7853_vm14 = vcmp.lt.f32.partialorder %v5727_v44, 8388608.0  ;;  %v5732_v27 = vand.u32 2147483648, %v7641_v6  ;;  %v6171_v15 = vld [vmem:[#allocation9 + $0x140] sm:$0xff]  }
 0x2bc   : > { %vm2384_vm13 = vcmp.ge.f32.partialorder %v2348_v59, 0.0  ;;  %v2421_v32 = vmul.f32 %v7579_v7, %v2348_v59  ;;  %5208 = vmatpush3.bf16.msra.mxu0 %v6166_v51  ;;  %v7859_v16 = vsel %vm5720_vm12, %v5725_v25, %v7789_v50  ;;  %v2732_v61 = vrot.slane %v7849_v8, 7  ;;  %5105 = vmatprep.subr.bf16.mxu1 %v6171_v15  ;;  %v6172_v19 = vld [vmem:[#allocation9 + $0x100] sm:$0xff]  }
 0x2bd   : > { %vm2387_vm15 = vcmp.ge.f32.partialorder %v2351_v52, 0.0  ;;  %v2424_v40 = vmul.f32 %v7579_v7, %v2351_v52  ;;  %v7863_v57 = vpop.f32.mrf.mxu0  ;;  %5209 = vmatprep.subr.bf16.mxu0 %v6169_v20  ;;  %v2748_v44 = vrot.slane %v7859_v16, 7  ;;  %v7868_v37 = vpack.c.bf16 %v7859_v16, %v7849_v8  ;;  %5106 = vmatpush3.bf16.msra.mxu1 %v6172_v19 }
 0x2be   : > { %v2457_v51 = vsel %vm2384_vm13, %v2348_v59, %v2421_v32  ;;  %vm2385_vm0 = vcmp.ge.f32.partialorder %v2349_v4, 0.0  ;;  %v2422_v25 = vmul.f32 %v7579_v7, %v2349_v4  ;;  %v5731_v22 = vand.u32 2147483647, %v5730_v60 }
 0x2bf   : > { %10109 = vst [vmem:[#allocation33_spill] sm:$0xff] %v7868_v37  ;;  %v2495_v50 = vmax.f32 %v7584_v26, %v2457_v51  ;;  %v2460_v21 = vsel %vm2387_vm15, %v2351_v52, %v2424_v40  ;;  %v5390_v11 = vpop.f32.mrf.mxu0  ;;  %3624 = vmatprep.mubr.bf16.mxu1 %v7868_v37  ;;  %v2764_v55 = vsel %vm555_vm1, %v2732_v61, %v2748_v44  ;;  %v5735_v32 = vand.u32 2147483647, %v7661_v36 }
 0x2c0   : > { %v2498_v20 = vmax.f32 %v7584_v26, %v2460_v21  ;;  %v2780_v59 = vsel %vm555_vm1, %v2748_v44, %v2732_v61  ;;  %5210 = vmatpush3.bf16.msra.mxu0 %v6170_v47  ;;  %v2458_v52 = vsel %vm2385_vm0, %v2349_v4, %v2422_v25  ;;  %v5733_v60 = vor.u32 %v5732_v27, %v5731_v22 }
 0x2c1   : > { %v2532_v15 = vmin.f32 %v7589_v62, %v2495_v50  ;;  %v2798_v40 = vmul.f32 %v6611_v28, %v2780_v59  ;;  %v2496_v21 = vmax.f32 %v7584_v26, %v2458_v52  ;;  %v5737_v37 = vcvt.f32.s32 %v7661_v36 }
 0x2c2   : > { %v2535_v51 = vmin.f32 %v7589_v62, %v2498_v20  ;;  %vm7891_vm3 = vcmp.lt.f32.partialorder %v5735_v32, 8388608.0  ;;  %v7904_v50 = vsel %vm7853_vm14, %v5733_v60, %v7641_v6  ;;  %v10112_v22 = vrot.slane %v7753_v14, 1 }
 0x2c3   : > { %v7887_v44 = vmul.f32 %v7599_v29, %v2532_v15  ;;  %v7889_v47 = vpack.c.bf16 %v2764_v55, %v2798_v40  ;;  %v7899_v19 = vmin.f32 %v7589_v62, %v2496_v21  ;;  %v5738_v25 = vcvt.s32.f32 %v5737_v37 }
 0x2c4   : > { %v7896_v27 = vmul.f32 %v7599_v29, %v2535_v51  ;;  %v5740_v55 = vand.u32 2147483648, %v7661_v36  ;;  %v10113_v20 = vrot.slane %v7712_v63, 1  ;;  %v10115_v35 = vmov %v10112_v22  ;;  %v6173_v51 = vld [vmem:[#allocation9 + $0x1d8] sm:$0xff]  }
 0x2c5   : > { %3625 = vmatmul.mubr.bf16.gmra.mxu1 %v7889_v47  ;;  %3777 = vmatprep.mubr.bf16.mxu0 %v7889_v47  ;;  %v2244_v37 = vadd.f32 %v7764_v58, %v7542_v30  ;;  %v5739_v15 = vand.u32 2147483647, %v5738_v25  ;;  %v2236_v40 = vadd.f32 %v7775_v10, %v7536_v43  ;;  %v2247_v60 = vadd.f32 %v7781_v5, %v7545_v3  ;;  %v6174_v10 = vld [vmem:[#allocation9 + $0x198] sm:$0xff]   ;;  %v6175_v5 = vld [vmem:[#allocation9 + $0x1d0] sm:$0xff]  }
 0x2c6   : > { %v2891_v59 = vsel %vm700_vm2, %v10113_v20, %v10112_v22  ;;  %v10114_v32 = vmov %v10113_v20  ;;  %v2733_v63 = vrot.slane %v7904_v50, 7  ;;  %v2239_v22 = vadd.f32 %v7791_v17, %v7539_v34  ;;  %5211 = vmatprep.subr.bf16.mxu0 %v6173_v51 }
 0x2c7   : > { %v2907_v6 = vsel %vm700_vm2, %v10115_v35, %v10114_v32  ;;  %v2313_v21 = vmul.f32 %v7568_v46, %v2244_v37  ;;  %v5741_v30 = vor.u32 %v5740_v55, %v5739_v15  ;;  %v2311_v25 = vmul.f32 %v7568_v46, %v2236_v40  ;;  %5212 = vmatpush3.bf16.msra.mxu0 %v6174_v10 }
 0x2c8   : > { %v2925_v52 = vmul.f32 %v6649_v56, %v2907_v6  ;;  %v2314_v43 = vmul.f32 %v7568_v46, %v2247_v60  ;;  %v2312_v20 = vmul.f32 %v7568_v46, %v2239_v22  ;;  %v7941_v32 = vmul.f32 %v7599_v29, %v7707_v54  ;;  %5213 = vmatprep.subr.bf16.mxu0 %v6175_v5  ;;  %v6178_v5 = vld [vmem:[#allocation9 + $0x1c8] sm:$0xff]  }
 0x2c9   : > { %v2354_v3 = vadd.f32 %v7574_v42, %v2313_v21  ;;  %v5743_v34 = vand.u32 2147483647, %v7689_v31  ;;  %v7947_v17 = vsel %vm7891_vm3, %v5741_v30, %v7661_v36  ;;  %v2352_v55 = vadd.f32 %v7574_v42, %v2311_v25  ;;  %v6176_v36 = vld [vmem:[#allocation9 + $0x190] sm:$0xff]  }
 0x2ca   : > { %v7933_v58 = vpack.c.bf16 %v2925_v52, %v2891_v59  ;;  %v2355_v59 = vadd.f32 %v7574_v42, %v2314_v43  ;;  %v5745_v35 = vcvt.f32.s32 %v7689_v31  ;;  %v2749_v6 = vrot.slane %v7947_v17, 7  ;;  %v6177_v52 = vld [vmem:[#allocation9 + $0x238] sm:$0xff]   ;;  %v2098_v22 = vpop.f32.mrf.mxu1 }
 0x2cb   : > { %v7956_v54 = vpack.c.bf16 %v7947_v17, %v7904_v50  ;;  %vm2390_vm4 = vcmp.ge.f32.partialorder %v2354_v3, 0.0  ;;  %v5748_v37 = vand.u32 2147483648, %v7689_v31  ;;  %v2427_v4 = vmul.f32 %v7579_v7, %v2354_v3  ;;  %5391 = vmatprep.subr.bf16.mxu1 %v6177_v52  ;;  %5214 = vmatpush3.bf16.msra.mxu0 %v6176_v36 }
 0x2cc   : > { %3778 = vmatmul.mubr.bf16.gmra.mxu0 %v7933_v58  ;;  %vm2388_vm5 = vcmp.ge.f32.partialorder %v2352_v55, 0.0  ;;  %v2425_v15 = vmul.f32 %v7579_v7, %v2352_v55  ;;  %vm2391_vm6 = vcmp.ge.f32.partialorder %v2355_v59, 0.0  ;;  %v2765_v40 = vsel %vm555_vm1, %v2733_v63, %v2749_v6  ;;  %5215 = vmatprep.subr.bf16.mxu0 %v6178_v5 }
 0x2cd   : > { %3632 = vmatprep.mubr.bf16.mxu1 %v7956_v54  ;;  %v2781_v60 = vsel %vm555_vm1, %v2749_v6, %v2733_v63  ;;  %v2428_v51 = vmul.f32 %v7579_v7, %v2355_v59  ;;  %v2353_v21 = vadd.f32 %v7574_v42, %v2312_v20  ;;  %v2463_v30 = vsel %vm2390_vm4, %v2354_v3, %v2427_v4  ;;  %v6179_v63 = vld [vmem:[#allocation9 + $0x188] sm:$0xff]   ;;  %v2100_v6 = vpop.f32.mrf.mxu1 }
 0x2ce   : > { %v2800_v25 = vmul.f32 %v6611_v28, %v2781_v60  ;;  %v2461_v43 = vsel %vm2388_vm5, %v2352_v55, %v2425_v15  ;;  %v5746_v10 = vcvt.s32.f32 %v5745_v35  ;;  %v2501_v14 = vmax.f32 %v7584_v26, %v2463_v30  ;;  %v6180_v35 = vld [vmem:[#allocation9 + $0x1c0] sm:$0xff]  }
 0x2cf   : > { %v2499_v11 = vmax.f32 %v7584_v26, %v2461_v43  ;;  %v2464_v61 = vsel %vm2391_vm6, %v2355_v59, %v2428_v51  ;;  %vm2389_vm7 = vcmp.ge.f32.partialorder %v2353_v21, 0.0  ;;  %v2426_v4 = vmul.f32 %v7579_v7, %v2353_v21  ;;  %v2101_v36 = vpop.f32.mrf.mxu1  ;;  %5216 = vmatpush3.bf16.msra.mxu0 %v6179_v63 }
 0x2d0   : > { %v7973_v20 = vpack.c.bf16 %v2765_v40, %v2800_v25  ;;  %v2502_v3 = vmax.f32 %v7584_v26, %v2464_v61  ;;  %v5747_v55 = vand.u32 2147483647, %v5746_v10  ;;  %v2538_v15 = vmin.f32 %v7589_v62, %v2501_v14  ;;  %v6181_v25 = vld [vmem:[#allocation9 + $0x180] sm:$0xff]   ;;  %5217 = vmatprep.subr.bf16.mxu0 %v6180_v35 }
 0x2d1   : > { %v2536_v52 = vmin.f32 %v7589_v62, %v2499_v11  ;;  %v5751_v60 = vand.u32 2147483647, %v7941_v32  ;;  %v5753_v59 = vcvt.f32.s32 %v7941_v32  ;;  %v2462_v61 = vsel %vm2389_vm7, %v2353_v21, %v2426_v4  ;;  %v2103_v43 = vpop.f32.mrf.mxu1 }
 0x2d2   : > { %3785 = vmatprep.mubr.bf16.mxu0 %v7973_v20  ;;  %v2539_v40 = vmin.f32 %v7589_v62, %v2502_v3  ;;  %3633 = vmatmul.mubr.bf16.gmra.mxu1 %v7973_v20  ;;  %vm5744_vm8 = vcmp.lt.f32.partialorder %v5743_v34, 8388608.0  ;;  %v5749_v51 = vor.u32 %v5748_v37, %v5747_v55  ;;  %v2877_v22 = vrot.slane %v7947_v17, 1 }
 0x2d3   : > { %v7987_v14 = vmul.f32 %v7599_v29, %v2538_v15  ;;  %v2500_v11 = vmax.f32 %v7584_v26, %v2462_v61  ;;  %v5756_v30 = vand.u32 2147483648, %v7941_v32  ;;  %v7992_v10 = vmul.f32 %v7599_v29, %v2536_v52  ;;  %5218 = vmatpush3.bf16.msra.mxu0 %v6181_v25 }
 0x2d4   : > { %v7995_v21 = vsel %vm5744_vm8, %v5749_v51, %v7689_v31  ;;  %v5754_v34 = vcvt.s32.f32 %v5753_v59  ;;  %v10116_v37 = vrot.slane %v7859_v16, 1  ;;  %v10117_v5 = vrot.slane %v7849_v8, 1 }
 0x2d5   : > { %v8004_v3 = vmul.f32 %v7599_v29, %v2539_v40  ;;  %v8007_v63 = vmin.f32 %v7589_v62, %v2500_v11  ;;  %vm8009_vm9 = vcmp.lt.f32.partialorder %v5751_v60, 8388608.0  ;;  %v2260_v59 = vadd.f32 %v7804_v23, %v7554_v39 }
 0x2d6   : > { %v2892_v6 = vsel %vm700_vm2, %v10117_v5, %v10116_v37  ;;  %v10120_v31 = vmov %v10117_v5  ;;  %v10121_v55 = vmov %v10116_v37  ;;  %v5755_v52 = vand.u32 2147483647, %v5754_v34 }
 0x2d7   : > { %v2908_v15 = vsel %vm700_vm2, %v10121_v55, %v10120_v31  ;;  %v2252_v36 = vadd.f32 %v7818_v0, %v7548_v1  ;;  %v2734_v60 = vrot.slane %v7995_v21, 7  ;;  %v2263_v40 = vadd.f32 %v7831_v12, %v7557_v33 }
 0x2d8   : > { %v2927_v35 = vmul.f32 %v6649_v56, %v2908_v15  ;;  %v2255_v8 = vadd.f32 %v7839_v45, %v7551_v49  ;;  %v5761_v16 = vcvt.f32.s32 %v7681_v38  ;;  %v5757_v61 = vor.u32 %v5756_v30, %v5755_v52 }
 0x2d9   : > { %v2317_v11 = vmul.f32 %v7568_v46, %v2260_v59  ;;  %v2315_v39 = vmul.f32 %v7568_v46, %v2252_v36  ;;  %v2862_v1 = vrot.slane %v7995_v21, 1  ;;  %v2318_v0 = vmul.f32 %v7568_v46, %v2263_v40 }
 0x2da   : > { %v8030_v51 = vpack.c.bf16 %v2927_v35, %v2892_v6  ;;  %v2316_v23 = vmul.f32 %v7568_v46, %v2255_v8  ;;  %v5759_v33 = vand.u32 2147483647, %v7681_v38  ;;  %v8041_v49 = vsel %vm8009_vm9, %v5757_v61, %v7941_v32 }
 0x2db   : > { %v2358_v12 = vadd.f32 %v7574_v42, %v2317_v11  ;;  %v2356_v45 = vadd.f32 %v7574_v42, %v2315_v39  ;;  %v5762_v30 = vcvt.s32.f32 %v5761_v16  ;;  %v2750_v25 = vrot.slane %v8041_v49, 7 }
 0x2dc   : > { %3786 = vmatmul.mubr.bf16.gmra.mxu0 %v8030_v51  ;;  %v8049_v43 = vpack.c.bf16 %v8041_v49, %v7995_v21  ;;  %v2359_v46 = vadd.f32 %v7574_v42, %v2318_v0  ;;  %v5764_v34 = vand.u32 2147483648, %v7681_v38  ;;  %v2357_v52 = vadd.f32 %v7574_v42, %v2316_v23 }
 0x2dd   : > { %vm2394_vm10 = vcmp.ge.f32.partialorder %v2358_v12, 0.0  ;;  %v2431_v32 = vmul.f32 %v7579_v7, %v2358_v12  ;;  %vm2392_vm11 = vcmp.ge.f32.partialorder %v2356_v45, 0.0  ;;  %v2429_v37 = vmul.f32 %v7579_v7, %v2356_v45 }
 0x2de   : > { %3640 = vmatprep.mubr.bf16.mxu1 %v8049_v43  ;;  %v2766_v5 = vsel %vm555_vm1, %v2734_v60, %v2750_v25  ;;  %v2782_v6 = vsel %vm555_vm1, %v2750_v25, %v2734_v60  ;;  %vm2395_vm12 = vcmp.ge.f32.partialorder %v2359_v46, 0.0  ;;  %v2432_v4 = vmul.f32 %v7579_v7, %v2359_v46 }
 0x2df   : > { %v2467_v31 = vsel %vm2394_vm10, %v2358_v12, %v2431_v32  ;;  %v2802_v55 = vmul.f32 %v6611_v28, %v2782_v6  ;;  %v2465_v15 = vsel %vm2392_vm11, %v2356_v45, %v2429_v37  ;;  %v5763_v40 = vand.u32 2147483647, %v5762_v30 }
 0x2e0   : > { %v2505_v35 = vmax.f32 %v7584_v26, %v2467_v31  ;;  %v2503_v59 = vmax.f32 %v7584_v26, %v2465_v15  ;;  %v2468_v36 = vsel %vm2395_vm12, %v2359_v46, %v2432_v4  ;;  %vm2393_vm13 = vcmp.ge.f32.partialorder %v2357_v52, 0.0 }
 0x2e1   : > { %v8065_v8 = vpack.c.bf16 %v2766_v5, %v2802_v55  ;;  %v2506_v16 = vmax.f32 %v7584_v26, %v2468_v36  ;;  %v2430_v60 = vmul.f32 %v7579_v7, %v2357_v52  ;;  %v5765_v39 = vor.u32 %v5764_v34, %v5763_v40  ;;  %v2270_v34 = vpop.f32.mrf.mxu0 }
 0x2e2   : > { %v2542_v61 = vmin.f32 %v7589_v62, %v2505_v35  ;;  %v2540_v11 = vmin.f32 %v7589_v62, %v2503_v59  ;;  %v5767_v42 = vand.u32 2147483647, %v7699_v41  ;;  %vm5760_vm14 = vcmp.lt.f32.partialorder %v5759_v33, 8388608.0 }
 0x2e3   : > { %3793 = vmatprep.mubr.bf16.mxu0 %v8065_v8  ;;  %v2543_v0 = vmin.f32 %v7589_v62, %v2506_v16  ;;  %v2466_v23 = vsel %vm2393_vm13, %v2357_v52, %v2430_v60  ;;  %3641 = vmatmul.mubr.bf16.gmra.mxu1 %v8065_v8  ;;  %v5769_v12 = vcvt.f32.s32 %v7699_v41  ;;  %v2878_v45 = vrot.slane %v8041_v49, 1 }
 0x2e4   : > { %v2504_v30 = vmax.f32 %v7584_v26, %v2466_v23  ;;  %v8079_v25 = vsel %vm5760_vm14, %v5765_v39, %v7681_v38  ;;  %v5772_v46 = vand.u32 2147483648, %v7699_v41  ;;  %v8083_v32 = vmul.f32 %v7599_v29, %v2542_v61  ;;  %v6189_v61 = vld [vmem:[%s10018_s4] ss:$0 sm:$0xff] }
 0x2e5   : > { %v8086_v37 = vmul.f32 %v7599_v29, %v2540_v11  ;;  %v8089_v33 = vmul.f32 %v7599_v29, %v2543_v0  ;;  %v5770_v5 = vcvt.s32.f32 %v5769_v12  ;;  %vm8091_vm15 = vcmp.lt.f32.partialorder %v5767_v42, 8388608.0  ;;  %v6190_v0 = vld [vmem:[%s10018_s4 + $0x1] ss:$0 sm:$0xff] }
 0x2e6   : > { %v2735_v38 = vrot.slane %v8079_v25, 7  ;;  %v10124_v4 = vrot.slane %v7904_v50, 1  ;;  %v2268_v59 = vadd.f32 %v7863_v57, %v7560_v24  ;;  %v2271_v36 = vadd.f32 %v2270_v34, %v7563_v9 }
 0x2e7   : > { %v5771_v52 = vand.u32 2147483647, %v5770_v5  ;;  %v8113_v40 = vmin.f32 %v7589_v62, %v2504_v30  ;;  %v2562_v16 = vmul.f32 %v7599_v29, %v7748_v13  ;;  %v5775_v50 = vand.u32 2147483647, %v7726_v48 }
 0x2e8   : > { %v2893_v31 = vsel %vm700_vm2, %v10124_v4, %v2877_v22  ;;  %v10125_v55 = vmov %v10124_v4  ;;  %v5777_v17 = vcvt.f32.s32 %v7726_v48  ;;  %v2319_v24 = vmul.f32 %v6189_v61, %v2268_v59 }
 0x2e9   : > { %v2909_v15 = vsel %vm700_vm2, %v2877_v22, %v10125_v55  ;;  %v5773_v60 = vor.u32 %v5772_v46, %v5771_v52  ;;  %v2320_v57 = vmul.f32 %v6189_v61, %v2271_v36  ;;  %v2863_v9 = vrot.slane %v8079_v25, 1 }
 0x2ea   : > { %v2929_v35 = vmul.f32 %v6649_v56, %v2909_v15  ;;  %vm8125_vm0 = vcmp.lt.f32.partialorder %v5775_v50, 8388608.0  ;;  %v5778_v13 = vcvt.s32.f32 %v5777_v17  ;;  %v5780_v39 = vand.u32 2147483648, %v7726_v48 }
 0x2eb   : > { %v8133_v42 = vsel %vm8091_vm15, %v5773_v60, %v7699_v41  ;;  %v2360_v23 = vadd.f32 %v6190_v0, %v2319_v24  ;;  %v2361_v12 = vadd.f32 %v6190_v0, %v2320_v57  ;;  %v5785_v30 = vcvt.f32.s32 %v2562_v16 }
 0x2ec   : > { %v8119_v22 = vpack.c.bf16 %v2929_v35, %v2893_v31  ;;  %v2751_v46 = vrot.slane %v8133_v42, 7  ;;  %v8142_v34 = vpack.c.bf16 %v8133_v42, %v8079_v25  ;;  %v5779_v5 = vand.u32 2147483647, %v5778_v13 }
 0x2ed   : > { %v5783_v4 = vand.u32 2147483647, %v2562_v16  ;;  %vm2396_vm3 = vcmp.ge.f32.partialorder %v2360_v23, 0.0  ;;  %v2433_v41 = vmul.f32 %v7579_v7, %v2360_v23  ;;  %vm2397_vm4 = vcmp.ge.f32.partialorder %v2361_v12, 0.0 }
 0x2ee   : > { %3794 = vmatmul.mubr.bf16.gmra.mxu0 %v8119_v22  ;;  %v2434_v6 = vmul.f32 %v7579_v7, %v2361_v12  ;;  %3648 = vmatprep.mubr.bf16.mxu1 %v8142_v34  ;;  %v2767_v31 = vsel %vm555_vm1, %v2735_v38, %v2751_v46  ;;  %v2783_v55 = vsel %vm555_vm1, %v2751_v46, %v2735_v38  ;;  %v5788_v52 = vand.u32 2147483648, %v2562_v16 }
 0x2ef   : > { %v5781_v15 = vor.u32 %v5780_v39, %v5779_v5  ;;  %v2804_v35 = vmul.f32 %v6611_v28, %v2783_v55  ;;  %v2469_v59 = vsel %vm2396_vm3, %v2360_v23, %v2433_v41  ;;  %v5786_v50 = vcvt.s32.f32 %v5785_v30  ;;  %v10130_v5 = vld [vmem:[#allocation28_spill] sm:$0xff] }
 0x2f0   : > { %v2470_v36 = vsel %vm2397_vm4, %v2361_v12, %v2434_v6  ;;  %v2507_v17 = vmax.f32 %v7584_v26, %v2469_v59  ;;  %v2894_v38 = vsel %vm700_vm2, %v2862_v1, %v2878_v45  ;;  %v2879_v61 = vrot.slane %v8133_v42, 1 }
 0x2f1   : > { %v2508_v60 = vmax.f32 %v7584_v26, %v2470_v36  ;;  %v8157_v7 = vsel %vm8125_vm0, %v5781_v15, %v7726_v48  ;;  %v8166_v24 = vpack.c.bf16 %v2767_v31, %v2804_v35  ;;  %vm8168_vm5 = vcmp.lt.f32.partialorder %v5783_v4, 8388608.0 }
 0x2f2   : > { %v5787_v26 = vand.u32 2147483647, %v5786_v50  ;;  %v2544_v11 = vmin.f32 %v7589_v62, %v2507_v17  ;;  %v2910_v13 = vsel %vm700_vm2, %v2878_v45, %v2862_v1  ;;  %v5791_v39 = vand.u32 2147483647, %v7716_v53 }
 0x2f3   : > { %v2545_v48 = vmin.f32 %v7589_v62, %v2508_v60  ;;  %3801 = vmatprep.mubr.bf16.mxu0 %v8166_v24  ;;  %3649 = vmatmul.mubr.bf16.gmra.mxu1 %v8166_v24  ;;  %v2736_v0 = vrot.slane %v8157_v7, 7  ;;  %v2931_v23 = vmul.f32 %v6649_v56, %v2910_v13  ;;  %v5793_v62 = vcvt.f32.s32 %v7716_v53 }
 0x2f4   : > { %v5789_v42 = vor.u32 %v5788_v52, %v5787_v26  ;;  %v8187_v21 = vmul.f32 %v7599_v29, %v2544_v11  ;;  %v2864_v1 = vrot.slane %v8157_v7, 1  ;;  %v5796_v45 = vand.u32 2147483648, %v7716_v53  ;;  %v10133_v11 = vld [vmem:[#allocation30_spill] sm:$0xff] }
 0x2f5   : > { %v8190_v49 = vmul.f32 %v7599_v29, %v2545_v48  ;;  %v8196_v30 = vpack.c.bf16 %v2931_v23, %v2894_v38  ;;  %v5794_v46 = vcvt.s32.f32 %v5793_v62  ;;  %v5801_v4 = vcvt.f32.s32 %v10130_v5 }
 0x2f6   : > { %v5790_v12 = vsel %vm8168_vm5, %v5789_v42, %v2562_v16  ;;  %vm8202_vm6 = vcmp.lt.f32.partialorder %v5791_v39, 8388608.0  ;;  %v5799_v55 = vand.u32 2147483647, %v10130_v5  ;;  %v5804_v16 = vand.u32 2147483648, %v10130_v5 }
 0x2f7   : > { %v2752_v41 = vrot.slane %v5790_v12, 7  ;;  %v8200_v6 = vpack.c.bf16 %v5790_v12, %v8157_v7  ;;  %3802 = vmatmul.mubr.bf16.gmra.mxu0 %v8196_v30  ;;  %v5795_v15 = vand.u32 2147483647, %v5794_v46  ;;  %v5802_v52 = vcvt.s32.f32 %v5801_v4 }
 0x2f8   : > { %v2895_v35 = vsel %vm700_vm2, %v2863_v9, %v2879_v61  ;;  %v2911_v50 = vsel %vm700_vm2, %v2879_v61, %v2863_v9  ;;  %v2566_v17 = vmul.f32 %v7599_v29, %v7814_v2  ;;  %v2880_v26 = vrot.slane %v5790_v12, 1 }
 0x2f9   : > { %3656 = vmatprep.mubr.bf16.mxu1 %v8200_v6  ;;  %v2768_v59 = vsel %vm555_vm1, %v2736_v0, %v2752_v41  ;;  %v2784_v36 = vsel %vm555_vm1, %v2752_v41, %v2736_v0  ;;  %v5797_v7 = vor.u32 %v5796_v45, %v5795_v15  ;;  %v5803_v38 = vand.u32 2147483647, %v5802_v52  ;;  %v10136_v52 = vld [vmem:[#allocation29_spill] sm:$0xff] }
 0x2fa   : > { %v2806_v60 = vmul.f32 %v6611_v28, %v2784_v36  ;;  %v2933_v57 = vmul.f32 %v6649_v56, %v2911_v50  ;;  %vm5800_vm7 = vcmp.lt.f32.partialorder %v5799_v55, 8388608.0  ;;  %v5807_v48 = vand.u32 2147483647, %v10133_v11 }
 0x2fb   : > { %v5809_v13 = vcvt.f32.s32 %v10133_v11  ;;  %v5798_v25 = vsel %vm8202_vm6, %v5797_v7, %v7716_v53  ;;  %v5805_v9 = vor.u32 %v5804_v16, %v5803_v38  ;;  %v5812_v0 = vand.u32 2147483648, %v10133_v11 }
 0x2fc   : > { %v8228_v39 = vpack.c.bf16 %v2768_v59, %v2806_v60  ;;  %v8233_v2 = vpack.c.bf16 %v2933_v57, %v2895_v35  ;;  %v2737_v61 = vrot.slane %v5798_v25, 7  ;;  %v5815_v23 = vand.u32 2147483647, %v2566_v17 }
 0x2fd   : > { %v5810_v42 = vcvt.s32.f32 %v5809_v13  ;;  %v5806_v62 = vsel %vm5800_vm7, %v5805_v9, %v10130_v5  ;;  %v2865_v45 = vrot.slane %v5798_v25, 1  ;;  %vm8239_vm8 = vcmp.lt.f32.partialorder %v5807_v48, 8388608.0  ;;  %v10137_v48 = vld [vmem:[#allocation31_spill] sm:$0xff] }
 0x2fe   : > { %3809 = vmatprep.mubr.bf16.mxu0 %v8228_v39  ;;  %3657 = vmatmul.mubr.bf16.gmra.mxu1 %v8228_v39  ;;  %v5817_v53 = vcvt.f32.s32 %v2566_v17  ;;  %v2753_v46 = vrot.slane %v5806_v62, 7  ;;  %v8243_v4 = vpack.c.bf16 %v5806_v62, %v5798_v25  ;;  %v5820_v31 = vand.u32 2147483648, %v2566_v17 }
 0x2ff   : > { %v5811_v41 = vand.u32 2147483647, %v5810_v42  ;;  %3810 = vmatmul.mubr.bf16.gmra.mxu0 %v8233_v2  ;;  %v2896_v15 = vsel %vm700_vm2, %v2864_v1, %v2880_v26  ;;  %v2912_v5 = vsel %vm700_vm2, %v2880_v26, %v2864_v1  ;;  %v5823_v16 = vand.u32 2147483647, %v10136_v52 }
 0x300   : > { %v5818_v55 = vcvt.s32.f32 %v5817_v53  ;;  %3664 = vmatprep.mubr.bf16.mxu1 %v8243_v4  ;;  %v2769_v35 = vsel %vm555_vm1, %v2737_v61, %v2753_v46  ;;  %v2785_v59 = vsel %vm555_vm1, %v2753_v46, %v2737_v61  ;;  %v2935_v50 = vmul.f32 %v6649_v56, %v2912_v5 }
 0x301   : > { %v5813_v36 = vor.u32 %v5812_v0, %v5811_v41  ;;  %v2881_v60 = vrot.slane %v5806_v62, 1  ;;  %v2808_v7 = vmul.f32 %v6611_v28, %v2785_v59  ;;  %v5825_v57 = vcvt.f32.s32 %v10136_v52 }
 0x302   : > { %v5819_v38 = vand.u32 2147483647, %v5818_v55  ;;  %vm5816_vm9 = vcmp.lt.f32.partialorder %v5815_v23, 8388608.0  ;;  %v8262_v26 = vpack.c.bf16 %v2935_v50, %v2896_v15  ;;  %v5831_v13 = vand.u32 2147483647, %v10137_v48 }
 0x303   : > { %v5814_v1 = vsel %vm8239_vm8, %v5813_v36, %v10133_v11  ;;  %v8265_v25 = vpack.c.bf16 %v2769_v35, %v2808_v7  ;;  %vm8267_vm10 = vcmp.lt.f32.partialorder %v5823_v16, 8388608.0  ;;  %v5828_v42 = vand.u32 2147483648, %v10136_v52 }
 0x304   : > { %v5821_v9 = vor.u32 %v5820_v31, %v5819_v38  ;;  %v2738_v0 = vrot.slane %v5814_v1, 7  ;;  %v2866_v62 = vrot.slane %v5814_v1, 1  ;;  %v5826_v53 = vcvt.s32.f32 %v5825_v57 }
 0x305   : > { %v5833_v12 = vcvt.f32.s32 %v10137_v48  ;;  %3817 = vmatprep.mubr.bf16.mxu0 %v8265_v25  ;;  %vm8275_vm11 = vcmp.lt.f32.partialorder %v5831_v13, 8388608.0  ;;  %v2897_v46 = vsel %vm700_vm2, %v2865_v45, %v2881_v60  ;;  %v2913_v41 = vsel %vm700_vm2, %v2881_v60, %v2865_v45 }
 0x306   : > { %3665 = vmatmul.mubr.bf16.gmra.mxu1 %v8265_v25  ;;  %v5822_v11 = vsel %vm5816_vm9, %v5821_v9, %v2566_v17  ;;  %v5827_v15 = vand.u32 2147483647, %v5826_v53  ;;  %v5839_v5 = vand.u32 2147483647, %v7887_v44  ;;  %v5836_v17 = vand.u32 2147483648, %v10137_v48 }
 0x307   : > { %v2754_v31 = vrot.slane %v5822_v11, 7  ;;  %v8283_v55 = vpack.c.bf16 %v5822_v11, %v5814_v1  ;;  %3818 = vmatmul.mubr.bf16.gmra.mxu0 %v8262_v26  ;;  %v5834_v16 = vcvt.s32.f32 %v5833_v12  ;;  %v2937_v35 = vmul.f32 %v6649_v56, %v2913_v41 }
 0x308   : > { %v2570_v59 = vmul.f32 %v7599_v29, %v7899_v19  ;;  %v5829_v50 = vor.u32 %v5828_v42, %v5827_v15  ;;  %v5841_v60 = vcvt.f32.s32 %v7887_v44  ;;  %v2882_v7 = vrot.slane %v5822_v11, 1 }
 0x309   : > { %3672 = vmatprep.mubr.bf16.mxu1 %v8283_v55  ;;  %v2770_v45 = vsel %vm555_vm1, %v2738_v0, %v2754_v31  ;;  %v2786_v36 = vsel %vm555_vm1, %v2754_v31, %v2738_v0  ;;  %v5835_v57 = vand.u32 2147483647, %v5834_v16  ;;  %v8298_v1 = vpack.c.bf16 %v2937_v35, %v2897_v46  ;;  %v10144_v16 = vld [vmem:[#allocation32_spill] sm:$0xff] }
 0x30a   : > { %v2810_v38 = vmul.f32 %v6611_v28, %v2786_v36  ;;  %v5830_v19 = vsel %vm8267_vm10, %v5829_v50, %v10136_v52  ;;  %vm8303_vm12 = vcmp.lt.f32.partialorder %v5839_v5, 8388608.0  ;;  %v5842_v9 = vcvt.s32.f32 %v5841_v60 }
 0x30b   : > { %v5849_v53 = vcvt.f32.s32 %v2570_v59  ;;  %v5837_v42 = vor.u32 %v5836_v17, %v5835_v57  ;;  %v5844_v12 = vand.u32 2147483648, %v7887_v44  ;;  %v5847_v11 = vand.u32 2147483647, %v2570_v59 }
 0x30c   : > { %v8307_v0 = vpack.c.bf16 %v2770_v45, %v2810_v38  ;;  %v2739_v41 = vrot.slane %v5830_v19, 7  ;;  %v2867_v31 = vrot.slane %v5830_v19, 1  ;;  %v5843_v46 = vand.u32 2147483647, %v5842_v9 }
 0x30d   : > { %v5850_v15 = vcvt.s32.f32 %v5849_v53  ;;  %v5838_v52 = vsel %vm8275_vm11, %v5837_v42, %v10137_v48  ;;  %v2898_v61 = vsel %vm700_vm2, %v2866_v62, %v2882_v7  ;;  %v2914_v5 = vsel %vm700_vm2, %v2882_v7, %v2866_v62 }
 0x30e   : > { %3825 = vmatprep.mubr.bf16.mxu0 %v8307_v0  ;;  %3673 = vmatmul.mubr.bf16.gmra.mxu1 %v8307_v0  ;;  %v5855_v17 = vand.u32 2147483647, %v10144_v16  ;;  %v2755_v35 = vrot.slane %v5838_v52, 7  ;;  %v8320_v45 = vpack.c.bf16 %v5838_v52, %v5830_v19  ;;  %v5845_v36 = vor.u32 %v5844_v12, %v5843_v46 }
 0x30f   : > { %v5852_v50 = vand.u32 2147483648, %v2570_v59  ;;  %v2883_v60 = vrot.slane %v5838_v52, 1  ;;  %3826 = vmatmul.mubr.bf16.gmra.mxu0 %v8298_v1  ;;  %v5851_v38 = vand.u32 2147483647, %v5850_v15  ;;  %v2939_v23 = vmul.f32 %v6649_v56, %v2914_v5 }
 0x310   : > { %v5857_v48 = vcvt.f32.s32 %v10144_v16  ;;  %3680 = vmatprep.mubr.bf16.mxu1 %v8320_v45  ;;  %v2771_v62 = vsel %vm555_vm1, %v2739_v41, %v2755_v35  ;;  %v2787_v7 = vsel %vm555_vm1, %v2755_v35, %v2739_v41  ;;  %v5846_v57 = vsel %vm8303_vm12, %v5845_v36, %v7887_v44 }
 0x311   : > { %vm5848_vm13 = vcmp.lt.f32.partialorder %v5847_v11, 8388608.0  ;;  %v2812_v19 = vmul.f32 %v6611_v28, %v2787_v7  ;;  %v5853_v9 = vor.u32 %v5852_v50, %v5851_v38  ;;  %vm8334_vm14 = vcmp.lt.f32.partialorder %v5855_v17, 8388608.0 }
 0x312   : > { %v5860_v42 = vand.u32 2147483648, %v10144_v16  ;;  %v2740_v12 = vrot.slane %v5846_v57, 7  ;;  %v8339_v46 = vpack.c.bf16 %v2939_v23, %v2898_v61  ;;  %v5858_v15 = vcvt.s32.f32 %v5857_v48 }
 0x313   : > { %v5865_v41 = vcvt.f32.s32 %v7896_v27  ;;  %v8342_v52 = vpack.c.bf16 %v2771_v62, %v2812_v19  ;;  %v5854_v13 = vsel %vm5848_vm13, %v5853_v9, %v2570_v59  ;;  %v5863_v44 = vand.u32 2147483647, %v7896_v27 }
 0x314   : > { %v2899_v11 = vsel %vm700_vm2, %v2867_v31, %v2883_v60  ;;  %v2756_v5 = vrot.slane %v5854_v13, 7  ;;  %v8347_v17 = vpack.c.bf16 %v5854_v13, %v5846_v57  ;;  %v5859_v35 = vand.u32 2147483647, %v5858_v15 }
 0x315   : > { %v5868_v36 = vand.u32 2147483648, %v7896_v27  ;;  %3833 = vmatprep.mubr.bf16.mxu0 %v8342_v52  ;;  %v2884_v61 = vrot.slane %v5854_v13, 1  ;;  %v5866_v50 = vcvt.s32.f32 %v5865_v41  ;;  %v2915_v59 = vsel %vm700_vm2, %v2883_v60, %v2867_v31 }
 0x316   : > { %3681 = vmatmul.mubr.bf16.gmra.mxu1 %v8342_v52  ;;  %v2574_v38 = vmul.f32 %v7599_v29, %v8007_v63  ;;  %v2772_v23 = vsel %vm555_vm1, %v2740_v12, %v2756_v5  ;;  %v2788_v48 = vsel %vm555_vm1, %v2756_v5, %v2740_v12  ;;  %v5861_v62 = vor.u32 %v5860_v42, %v5859_v35 }
 0x317   : > { %3688 = vmatprep.mubr.bf16.mxu1 %v8347_v17  ;;  %v2941_v7 = vmul.f32 %v6649_v56, %v2915_v59  ;;  %3834 = vmatmul.mubr.bf16.gmra.mxu0 %v8339_v46  ;;  %v2814_v19 = vmul.f32 %v6611_v28, %v2788_v48  ;;  %v5867_v9 = vand.u32 2147483647, %v5866_v50  ;;  %v5871_v31 = vand.u32 2147483647, %v7992_v10 }
 0x318   : > { %v5873_v63 = vcvt.f32.s32 %v7992_v10  ;;  %v2868_v60 = vrot.slane %v5846_v57, 1  ;;  %v5862_v15 = vsel %vm8334_vm14, %v5861_v62, %v10144_v16  ;;  %v5879_v12 = vand.u32 2147483647, %v2574_v38 }
 0x319   : > { %v8369_v41 = vpack.c.bf16 %v2941_v7, %v2899_v11  ;;  %v8371_v42 = vpack.c.bf16 %v2772_v23, %v2814_v19  ;;  %vm5864_vm15 = vcmp.lt.f32.partialorder %v5863_v44, 8388608.0  ;;  %v5869_v13 = vor.u32 %v5868_v36, %v5867_v9 }
 0x31a   : > { %v5876_v5 = vand.u32 2147483648, %v7992_v10  ;;  %v2741_v35 = vrot.slane %v5862_v15, 7  ;;  %v2869_v50 = vrot.slane %v5862_v15, 1  ;;  %v5874_v59 = vcvt.s32.f32 %v5873_v63 }
 0x31b   : > { %10147 = vst [vmem:[#allocation28_spill] sm:$0xff] %v8371_v42  ;;  %v5881_v48 = vcvt.f32.s32 %v2574_v38  ;;  %3841 = vmatprep.mubr.bf16.mxu0 %v8371_v42  ;;  %v5870_v57 = vsel %vm5864_vm15, %v5869_v13, %v7896_v27  ;;  %vm8376_vm0 = vcmp.lt.f32.partialorder %v5871_v31, 8388608.0  ;;  %v2900_v16 = vsel %vm700_vm2, %v2868_v60, %v2884_v61 }
 0x31c   : > { %v2916_v44 = vsel %vm700_vm2, %v2884_v61, %v2868_v60  ;;  %v2757_v11 = vrot.slane %v5870_v57, 7  ;;  %v8384_v36 = vpack.c.bf16 %v5870_v57, %v5862_v15  ;;  %v5875_v23 = vand.u32 2147483647, %v5874_v59 }
 0x31d   : > { %vm8386_vm3 = vcmp.lt.f32.partialorder %v5879_v12, 8388608.0  ;;  %v5882_v27 = vcvt.s32.f32 %v5881_v48  ;;  %v2943_v7 = vmul.f32 %v6649_v56, %v2916_v44  ;;  %v5887_v19 = vand.u32 2147483647, %v7987_v14 }
 0x31e   : > { %10150 = vst [vmem:[#allocation30_spill] sm:$0xff] %v8384_v36  ;;  %3689 = vmatmul.mubr.bf16.gmra.mxu1 %v8371_v42  ;;  %v5889_v9 = vcvt.f32.s32 %v7987_v14  ;;  %v2773_v61 = vsel %vm555_vm1, %v2741_v35, %v2757_v11  ;;  %v2789_v31 = vsel %vm555_vm1, %v2757_v11, %v2741_v35  ;;  %v5877_v63 = vor.u32 %v5876_v5, %v5875_v23 }
 0x31f   : > { %3696 = vmatprep.mubr.bf16.mxu1 %v8384_v36  ;;  %v5884_v60 = vand.u32 2147483648, %v2574_v38  ;;  %v2885_v15 = vrot.slane %v5870_v57, 1  ;;  %3842 = vmatmul.mubr.bf16.gmra.mxu0 %v8369_v41  ;;  %v2816_v12 = vmul.f32 %v6611_v28, %v2789_v31  ;;  %v5883_v13 = vand.u32 2147483647, %v5882_v27 }
 0x320   : > { %v8401_v59 = vpack.c.bf16 %v2943_v7, %v2900_v16  ;;  %v5878_v48 = vsel %vm8376_vm0, %v5877_v63, %v7992_v10  ;;  %v5890_v44 = vcvt.s32.f32 %v5889_v9  ;;  %v5892_v36 = vand.u32 2147483648, %v7987_v14 }
 0x321   : > { %v5897_v42 = vcvt.f32.s32 %v8004_v3  ;;  %v8408_v35 = vpack.c.bf16 %v2773_v61, %v2816_v12  ;;  %v5885_v5 = vor.u32 %v5884_v60, %v5883_v13  ;;  %vm8410_vm4 = vcmp.lt.f32.partialorder %v5887_v19, 8388608.0 }
 0x322   : > { %v5895_v11 = vand.u32 2147483647, %v8004_v3  ;;  %v2742_v16 = vrot.slane %v5878_v48, 7  ;;  %v2870_v23 = vrot.slane %v5878_v48, 1  ;;  %v5891_v27 = vand.u32 2147483647, %v5890_v44 }
 0x323   : > { %v5898_v7 = vcvt.s32.f32 %v5897_v42  ;;  %3849 = vmatprep.mubr.bf16.mxu0 %v8408_v35  ;;  %v5886_v10 = vsel %vm8386_vm3, %v5885_v5, %v2574_v38  ;;  %v5900_v53 = vand.u32 2147483648, %v8004_v3  ;;  %v2901_v9 = vsel %vm700_vm2, %v2869_v50, %v2885_v15 }
 0x324   : > { %v2917_v19 = vsel %vm700_vm2, %v2885_v15, %v2869_v50  ;;  %v2758_v61 = vrot.slane %v5886_v10, 7  ;;  %v8423_v31 = vpack.c.bf16 %v5886_v10, %v5878_v48  ;;  %v5893_v63 = vor.u32 %v5892_v36, %v5891_v27 }
 0x325   : > { %v2578_v42 = vmul.f32 %v7599_v29, %v8113_v40  ;;  %v5899_v60 = vand.u32 2147483647, %v5898_v7  ;;  %v2945_v38 = vmul.f32 %v6649_v56, %v2917_v19  ;;  %v5903_v62 = vand.u32 2147483647, %v8086_v37 }
 0x326   : > { %3697 = vmatmul.mubr.bf16.gmra.mxu1 %v8408_v35  ;;  %v5905_v12 = vcvt.f32.s32 %v8086_v37  ;;  %v2774_v50 = vsel %vm555_vm1, %v2742_v16, %v2758_v61  ;;  %v2790_v36 = vsel %vm555_vm1, %v2758_v61, %v2742_v16  ;;  %v5894_v29 = vsel %vm8410_vm4, %v5893_v63, %v7987_v14 }
 0x327   : > { %3704 = vmatprep.mubr.bf16.mxu1 %v8423_v31  ;;  %vm5896_vm5 = vcmp.lt.f32.partialorder %v5895_v11, 8388608.0  ;;  %v2886_v40 = vrot.slane %v5886_v10, 1  ;;  %3850 = vmatmul.mubr.bf16.gmra.mxu0 %v8401_v59  ;;  %v2818_v15 = vmul.f32 %v6611_v28, %v2790_v36  ;;  %v5901_v13 = vor.u32 %v5900_v53, %v5899_v60 }
 0x328   : > { %v5908_v48 = vand.u32 2147483648, %v8086_v37  ;;  %v2743_v44 = vrot.slane %v5894_v29, 7  ;;  %v8442_v5 = vpack.c.bf16 %v2945_v38, %v2901_v9  ;;  %vm8444_vm6 = vcmp.lt.f32.partialorder %v5903_v62, 8388608.0 }
 0x329   : > { %v5906_v16 = vcvt.s32.f32 %v5905_v12  ;;  %v8448_v7 = vpack.c.bf16 %v2774_v50, %v2818_v15  ;;  %v5902_v14 = vsel %vm5896_vm5, %v5901_v13, %v8004_v3  ;;  %v5911_v57 = vand.u32 2147483647, %v2578_v42 }
 0x32a   : > { %v5913_v11 = vcvt.f32.s32 %v2578_v42  ;;  %v2759_v10 = vrot.slane %v5902_v14, 7  ;;  %v8451_v19 = vpack.c.bf16 %v5902_v14, %v5894_v29  ;;  %v5916_v61 = vand.u32 2147483648, %v2578_v42 }
 0x32b   : > { %v5907_v53 = vand.u32 2147483647, %v5906_v16  ;;  %3857 = vmatprep.mubr.bf16.mxu0 %v8448_v7  ;;  %v2887_v9 = vrot.slane %v5902_v14, 1  ;;  %v2902_v60 = vsel %vm700_vm2, %v2870_v23, %v2886_v40  ;;  %v2918_v38 = vsel %vm700_vm2, %v2886_v40, %v2870_v23 }
 0x32c   : > { %v5914_v63 = vcvt.s32.f32 %v5913_v11  ;;  %v2775_v3 = vsel %vm555_vm1, %v2743_v44, %v2759_v10  ;;  %v2791_v62 = vsel %vm555_vm1, %v2759_v10, %v2743_v44  ;;  %v2947_v50 = vmul.f32 %v6649_v56, %v2918_v38 }
 0x32d   : > { %v5909_v12 = vor.u32 %v5908_v48, %v5907_v53  ;;  %v2820_v36 = vmul.f32 %v6611_v28, %v2791_v62  ;;  %v5919_v13 = vand.u32 2147483647, %v8083_v32  ;;  %v5921_v16 = vcvt.f32.s32 %v8083_v32 }
 0x32e   : > { %3705 = vmatmul.mubr.bf16.gmra.mxu1 %v8448_v7  ;;  %v5915_v15 = vand.u32 2147483647, %v5914_v63  ;;  %v2871_v14 = vrot.slane %v5894_v29, 1  ;;  %vm5912_vm7 = vcmp.lt.f32.partialorder %v5911_v57, 8388608.0  ;;  %v8471_v40 = vpack.c.bf16 %v2947_v50, %v2902_v60 }
 0x32f   : > { %3712 = vmatprep.mubr.bf16.mxu1 %v8451_v19  ;;  %v5910_v23 = vsel %vm8444_vm6, %v5909_v12, %v8086_v37  ;;  %3858 = vmatmul.mubr.bf16.gmra.mxu0 %v8442_v5  ;;  %v8474_v48 = vpack.c.bf16 %v2775_v3, %v2820_v36  ;;  %v5924_v11 = vand.u32 2147483648, %v8083_v32  ;;  %v5927_v10 = vand.u32 2147483647, %v8089_v33 }
 0x330   : > { %v5917_v44 = vor.u32 %v5916_v61, %v5915_v15  ;;  %v2744_v53 = vrot.slane %v5910_v23, 7  ;;  %v2872_v29 = vrot.slane %v5910_v23, 1  ;;  %v5922_v63 = vcvt.s32.f32 %v5921_v16 }
 0x331   : > { %v5929_v38 = vcvt.f32.s32 %v8089_v33  ;;  %3865 = vmatprep.mubr.bf16.mxu0 %v8474_v48  ;;  %vm8480_vm8 = vcmp.lt.f32.partialorder %v5919_v13, 8388608.0  ;;  %v2903_v57 = vsel %vm700_vm2, %v2871_v14, %v2887_v9  ;;  %v2919_v61 = vsel %vm700_vm2, %v2887_v9, %v2871_v14  ;;  %v4883_v14 = vpop.f32.mrf.mxu1 }
 0x332   : > { %v5918_v37 = vsel %vm5912_vm7, %v5917_v44, %v2578_v42  ;;  %v5923_v12 = vand.u32 2147483647, %v5922_v63  ;;  %v5932_v36 = vand.u32 2147483648, %v8089_v33  ;;  %v2949_v42 = vmul.f32 %v6649_v56, %v2919_v61 }
 0x333   : > { %v2760_v60 = vrot.slane %v5918_v37, 7  ;;  %v8488_v3 = vpack.c.bf16 %v5918_v37, %v5910_v23  ;;  %v2888_v62 = vrot.slane %v5918_v37, 1  ;;  %v5930_v50 = vcvt.s32.f32 %v5929_v38 }
 0x334   : > { %v5937_v15 = vcvt.f32.s32 %v8187_v21  ;;  %v5925_v44 = vor.u32 %v5924_v11, %v5923_v12  ;;  %v8501_v38 = vpack.c.bf16 %v2949_v42, %v2903_v57  ;;  %vm5928_vm9 = vcmp.lt.f32.partialorder %v5927_v10, 8388608.0 }
 0x335   : > { %v2776_v13 = vsel %vm555_vm1, %v2744_v53, %v2760_v60  ;;  %v2792_v16 = vsel %vm555_vm1, %v2760_v60, %v2744_v53  ;;  %v2904_v9 = vsel %vm700_vm2, %v2872_v29, %v2888_v62  ;;  %v5931_v63 = vand.u32 2147483647, %v5930_v50 }
 0x336   : > { %3713 = vmatmul.mubr.bf16.gmra.mxu1 %v8474_v48  ;;  %v2822_v23 = vmul.f32 %v6611_v28, %v2792_v16  ;;  %v2920_v37 = vsel %vm700_vm2, %v2888_v62, %v2872_v29  ;;  %v5926_v11 = vsel %vm8480_vm8, %v5925_v44, %v8083_v32  ;;  %v5938_v61 = vcvt.s32.f32 %v5937_v15  ;;  %v4884_v16 = vpop.f32.mrf.mxu1 }
 0x337   : > { %3720 = vmatprep.mubr.bf16.mxu1 %v8488_v3  ;;  %v2951_v53 = vmul.f32 %v6649_v56, %v2920_v37  ;;  %3866 = vmatmul.mubr.bf16.gmra.mxu0 %v8471_v40  ;;  %v5933_v12 = vor.u32 %v5932_v36, %v5931_v63  ;;  %v5935_v57 = vand.u32 2147483647, %v8187_v21  ;;  %v2745_v50 = vrot.slane %v5926_v11, 7 }
 0x338   : > { %v8511_v60 = vpack.c.bf16 %v2776_v13, %v2822_v23  ;;  %v5939_v29 = vand.u32 2147483647, %v5938_v61  ;;  %v5940_v62 = vand.u32 2147483648, %v8187_v21  ;;  %v2873_v27 = vrot.slane %v5926_v11, 1 }
 0x339   : > { %v8514_v42 = vpack.c.bf16 %v2951_v53, %v2904_v9  ;;  %v5934_v32 = vsel %vm5928_vm9, %v5933_v12, %v8089_v33  ;;  %v5945_v15 = vcvt.f32.s32 %v8190_v49  ;;  %v8520_v13 = vadd.f32 %v4884_v16, %v4883_v14 }
 0x33a   : > { %3873 = vmatprep.mubr.bf16.mxu0 %v8511_v60  ;;  %v2761_v10 = vrot.slane %v5934_v32, 7  ;;  %v8522_v36 = vpack.c.bf16 %v5934_v32, %v5926_v11  ;;  %v2889_v44 = vrot.slane %v5934_v32, 1  ;;  %v5941_v23 = vor.u32 %v5940_v62, %v5939_v29 }
 0x33b   : > { %vm5936_vm10 = vcmp.lt.f32.partialorder %v5935_v57, 8388608.0  ;;  %v5946_v9 = vcvt.s32.f32 %v5945_v15  ;;  %v5943_v33 = vand.u32 2147483647, %v8190_v49  ;;  %v5948_v61 = vand.u32 2147483648, %v8190_v49 }
 0x33c   : > { %v2777_v63 = vsel %vm555_vm1, %v2745_v50, %v2761_v10  ;;  %v2793_v37 = vsel %vm555_vm1, %v2761_v10, %v2745_v50  ;;  %v2905_v53 = vsel %vm700_vm2, %v2873_v27, %v2889_v44  ;;  %v2921_v12 = vsel %vm700_vm2, %v2889_v44, %v2873_v27 }
 0x33d   : > { %v2824_v14 = vmul.f32 %v6611_v28, %v2793_v37  ;;  %v5947_v11 = vand.u32 2147483647, %v5946_v9  ;;  %v5942_v57 = vsel %vm5936_vm10, %v5941_v23, %v8187_v21  ;;  %v2953_v50 = vmul.f32 %v6649_v56, %v2921_v12  ;;  %v6185_v12 = vld [vmem:[#allocation9 + $0x218] sm:$0xff]  }
 0x33e   : > { %3721 = vmatmul.mubr.bf16.gmra.mxu1 %v8511_v60  ;;  %vm5944_vm11 = vcmp.lt.f32.partialorder %v5943_v33, 8388608.0  ;;  %v2970_v15 = vrot.slane %v5942_v57, 7  ;;  %v2978_v10 = vrot.slane %v5942_v57, 1 }
 0x33f   : > { %3728 = vmatprep.mubr.bf16.mxu1 %v8522_v36  ;;  %3874 = vmatmul.mubr.bf16.gmra.mxu0 %v8501_v38  ;;  %v8540_v29 = vpack.c.bf16 %v2777_v63, %v2824_v14  ;;  %v5949_v62 = vor.u32 %v5948_v61, %v5947_v11  ;;  %v8542_v16 = vpack.c.bf16 %v2953_v50, %v2905_v53  ;;  %v6182_v11 = vld [vmem:[#allocation9 + $0x230] sm:$0xff]   ;;  %v10159_v61 = vld [vmem:[#allocation26_spill] sm:$0xff] }
 0x340   : > { %v6187_v50 = vld [vmem:[#allocation9 + $0x208] sm:$0xff]  }
 0x341   : > { %3881 = vmatprep.mubr.bf16.mxu0 %v8540_v29  ;;  %v5950_v32 = vsel %vm5944_vm11, %v5949_v62, %v8190_v49 }
 0x342   : > { %v2971_v27 = vrot.slane %v5950_v32, 7  ;;  %v2979_v44 = vrot.slane %v5950_v32, 1  ;;  %v8546_v9 = vpack.c.bf16 %v5950_v32, %v5942_v57  ;;  %v6186_v57 = vld [vmem:[#allocation9 + $0x210] sm:$0xff]  }
 0x344   : > { %v2972_v21 = vsel %vm555_vm1, %v2970_v15, %v2971_v27  ;;  %v2973_v23 = vsel %vm555_vm1, %v2971_v27, %v2970_v15  ;;  %v2980_v63 = vsel %vm700_vm2, %v2978_v10, %v2979_v44  ;;  %v2981_v37 = vsel %vm700_vm2, %v2979_v44, %v2978_v10 }
 0x345   : > { %v2974_v49 = vmul.f32 %v6611_v28, %v2973_v23  ;;  %v2983_v33 = vmul.f32 %v6649_v56, %v2981_v37  ;;  %v6183_v28 = vld [vmem:[#allocation9 + $0x228] sm:$0xff]   ;;  %v10160_v56 = vld [vmem:[#allocation33_spill] sm:$0xff] }
 0x346   : > { %3729 = vmatmul.mubr.bf16.gmra.mxu1 %v8540_v29 }
 0x347   : > { %3930 = vmatprep.mubr.bf16.mxu1 %v7933_v58  ;;  %3882 = vmatmul.mubr.bf16.gmra.mxu0 %v8514_v42  ;;  %v8561_v53 = vpack.c.bf16 %v2972_v21, %v2974_v49  ;;  %v8563_v14 = vpack.c.bf16 %v2983_v33, %v2980_v63  ;;  %v6184_v58 = vld [vmem:[#allocation9 + $0x220] sm:$0xff]  }
 0x349   : > { %3889 = vmatprep.mubr.bf16.mxu0 %v8561_v53 }
 0x34e   : > { %3931 = vmatmul.mubr.bf16.vlgmr.msra.gmra.mxu1 %v10159_v61 }
 0x34f   : > { %3938 = vmatprep.mubr.bf16.mxu1 %v8030_v51  ;;  %5392 = vmatpush3.bf16.msra.mxu1 %v6191_v18 }
 0x350   : > { %3890 = vmatmul.mubr.bf16.gmra.mxu0 %v8542_v16  ;;  %5393 = vmatprep.subr.bf16.mxu1 %v6182_v11 }
 0x351   : > { %4091 = vmatprep.mubr.bf16.mxu0 %v10160_v56 }
 0x353   : > { %5394 = vmatpush3.bf16.msra.mxu1 %v6182_v11 }
 0x354   : > { %5395 = vmatprep.subr.bf16.mxu1 %v6183_v28 }
 0x356   : > { %3939 = vmatmul.mubr.bf16.gmra.mxu1 %v10160_v56 }
 0x357   : > { %3946 = vmatprep.mubr.bf16.mxu1 %v8119_v22  ;;  %5396 = vmatpush3.bf16.msra.mxu1 %v6183_v28 }
 0x358   : > { %4092 = vmatmul.mubr.bf16.vlgmr.msra.gmra.mxu0 %v7889_v47  ;;  %5397 = vmatprep.subr.bf16.mxu1 %v6184_v58  ;;  %v6188_v47 = vld [vmem:[#allocation9 + $0x200] sm:$0xff]  }
 0x359   : > { %4099 = vmatprep.mubr.bf16.mxu0 %v7956_v54 }
 0x35b   : > { %5398 = vmatpush3.bf16.msra.mxu1 %v6184_v58 }
 0x35c   : > { %5399 = vmatprep.subr.bf16.mxu1 %v6185_v12 }
 0x35e   : > { %3947 = vmatmul.mubr.bf16.gmra.mxu1 %v7956_v54  ;;  %v4886_v54 = vpop.f32.mrf.mxu1 }
 0x35f   : > { %3954 = vmatprep.mubr.bf16.mxu1 %v8196_v30  ;;  %5400 = vmatpush3.bf16.msra.mxu1 %v6185_v12 }
 0x360   : > { %4100 = vmatmul.mubr.bf16.gmra.mxu0 %v7973_v20  ;;  %5401 = vmatprep.subr.bf16.mxu1 %v6186_v57  ;;  %v4887_v20 = vpop.f32.mrf.mxu1 }
 0x361   : > { %4107 = vmatprep.mubr.bf16.mxu0 %v8049_v43  ;;  %v4888_v63 = vadd.f32 %v4887_v20, %v4886_v54 }
 0x363   : > { %5402 = vmatpush3.bf16.msra.mxu1 %v6186_v57 }
 0x364   : > { %5403 = vmatprep.subr.bf16.mxu1 %v6187_v50 }
 0x366   : > { %3955 = vmatmul.mubr.bf16.gmra.mxu1 %v8049_v43 }
 0x367   : > { %3962 = vmatprep.mubr.bf16.mxu1 %v8233_v2  ;;  %5404 = vmatpush3.bf16.msra.mxu1 %v6187_v50  ;;  %v10161_v50 = vld [vmem:[#allocation28_spill] sm:$0xff] }
 0x368   : > { %4108 = vmatmul.mubr.bf16.gmra.mxu0 %v8065_v8  ;;  %5405 = vmatprep.subr.bf16.mxu1 %v6188_v47 }
 0x369   : > { %4115 = vmatprep.mubr.bf16.mxu0 %v8142_v34 }
 0x36b   : > { %5406 = vmatpush3.bf16.msra.mxu1 %v6188_v47 }
 0x36e   : > { %3963 = vmatmul.mubr.bf16.gmra.mxu1 %v8142_v34 }
 0x36f   : > { %3970 = vmatprep.mubr.bf16.mxu1 %v8262_v26 }
 0x370   : > { %4116 = vmatmul.mubr.bf16.gmra.mxu0 %v8166_v24 }
 0x371   : > { %4123 = vmatprep.mubr.bf16.mxu0 %v8200_v6 }
 0x372   : > { %v4889_v43 = vpop.f32.mrf.mxu1 }
 0x373   : > { %v4995_v62 = vpop.f32.mrf.mxu0 }
 0x374   : > { %v4890_v32 = vpop.f32.mrf.mxu1 }
 0x375   : > { %v4891_v8 = vadd.f32 %v4890_v32, %v4889_v43  ;;  %v4996_v15 = vpop.f32.mrf.mxu0 }
 0x376   : > { %3971 = vmatmul.mubr.bf16.gmra.mxu1 %v8200_v6  ;;  %v4997_v34 = vadd.f32 %v4996_v15, %v4995_v62  ;;  %v4892_v27 = vpop.f32.mrf.mxu1 }
 0x377   : > { %3978 = vmatprep.mubr.bf16.mxu1 %v8298_v1  ;;  %v4998_v10 = vpop.f32.mrf.mxu0 }
 0x378   : > { %4124 = vmatmul.mubr.bf16.gmra.mxu0 %v8228_v39  ;;  %v8591_v24 = vadd.f32 %v4997_v34, %v8520_v13  ;;  %v4893_v44 = vpop.f32.mrf.mxu1 }
 0x379   : > { %4131 = vmatprep.mubr.bf16.mxu0 %v8243_v4  ;;  %v4894_v21 = vadd.f32 %v4893_v44, %v4892_v27  ;;  %v4999_v23 = vpop.f32.mrf.mxu0 }
 0x37a   : > { %v5000_v6 = vadd.f32 %v4999_v23, %v4998_v10 }
 0x37c   : > { %v8594_v37 = vadd.f32 %v5000_v6, %v4888_v63 }
 0x37e   : > { %3979 = vmatmul.mubr.bf16.gmra.mxu1 %v8243_v4 }
 0x37f   : > { %3986 = vmatprep.mubr.bf16.mxu1 %v8339_v46 }
 0x380   : > { %4132 = vmatmul.mubr.bf16.gmra.mxu0 %v8265_v25 }
 0x381   : > { %4139 = vmatprep.mubr.bf16.mxu0 %v8283_v55 }
 0x385   : > { %v4895_v39 = vpop.f32.mrf.mxu1 }
 0x386   : > { %3987 = vmatmul.mubr.bf16.gmra.mxu1 %v8283_v55 }
 0x387   : > { %3994 = vmatprep.mubr.bf16.mxu1 %v8369_v41  ;;  %v4896_v13 = vpop.f32.mrf.mxu1 }
 0x388   : > { %4140 = vmatmul.mubr.bf16.gmra.mxu0 %v8307_v0  ;;  %v4897_v49 = vadd.f32 %v4896_v13, %v4895_v39 }
 0x389   : > { %4147 = vmatprep.mubr.bf16.mxu0 %v8320_v45  ;;  %v4898_v4 = vpop.f32.mrf.mxu1 }
 0x38b   : > { %v4899_v11 = vpop.f32.mrf.mxu1 }
 0x38c   : > { %v5001_v33 = vpop.f32.mrf.mxu0  ;;  %v4900_v25 = vadd.f32 %v4899_v11, %v4898_v4 }
 0x38e   : > { %3995 = vmatmul.mubr.bf16.gmra.mxu1 %v8320_v45  ;;  %v5002_v61 = vpop.f32.mrf.mxu0 }
 0x38f   : > { %4002 = vmatprep.mubr.bf16.mxu1 %v8401_v59  ;;  %v5003_v18 = vadd.f32 %v5002_v61, %v5001_v33 }
 0x390   : > { %4148 = vmatmul.mubr.bf16.gmra.mxu0 %v8342_v52  ;;  %v5004_v55 = vpop.f32.mrf.mxu0  ;;  %v10162_v52 = vld [vmem:[#allocation30_spill] sm:$0xff] }
 0x391   : > { %4155 = vmatprep.mubr.bf16.mxu0 %v8347_v17  ;;  %v8607_v0 = vadd.f32 %v5003_v18, %v4891_v8 }
 0x392   : > { %v5005_v28 = vpop.f32.mrf.mxu0  ;;  %v4901_v58 = vpop.f32.mrf.mxu1 }
 0x393   : > { %v5006_v56 = vadd.f32 %v5005_v28, %v5004_v55 }
 0x394   : > { %v4902_v45 = vpop.f32.mrf.mxu1 }
 0x395   : > { %v8609_v12 = vadd.f32 %v5006_v56, %v4894_v21  ;;  %v4903_v57 = vadd.f32 %v4902_v45, %v4901_v58 }
 0x396   : > { %4003 = vmatmul.mubr.bf16.gmra.mxu1 %v8347_v17  ;;  %v4904_v47 = vpop.f32.mrf.mxu1 }
 0x397   : > { %4010 = vmatprep.mubr.bf16.mxu1 %v8442_v5 }
 0x398   : > { %4156 = vmatmul.mubr.bf16.gmra.mxu0 %v10161_v50  ;;  %v4905_v54 = vpop.f32.mrf.mxu1 }
 0x399   : > { %4163 = vmatprep.mubr.bf16.mxu0 %v10162_v52  ;;  %v4906_v20 = vadd.f32 %v4905_v54, %v4904_v47 }
 0x39c   : > { %v5007_v43 = vpop.f32.mrf.mxu0 }
 0x39e   : > { %4011 = vmatmul.mubr.bf16.gmra.mxu1 %v10162_v52  ;;  %v5008_v62 = vpop.f32.mrf.mxu0 }
 0x39f   : > { %4018 = vmatprep.mubr.bf16.mxu1 %v8471_v40  ;;  %v5009_v32 = vadd.f32 %v5008_v62, %v5007_v43 }
 0x3a0   : > { %4164 = vmatmul.mubr.bf16.gmra.mxu0 %v8408_v35  ;;  %v5010_v17 = vpop.f32.mrf.mxu0 }
 0x3a1   : > { %4171 = vmatprep.mubr.bf16.mxu0 %v8423_v31  ;;  %v8619_v8 = vadd.f32 %v5009_v32, %v4897_v49 }
 0x3a2   : > { %v5011_v15 = vpop.f32.mrf.mxu0 }
 0x3a3   : > { %v5012_v34 = vadd.f32 %v5011_v15, %v5010_v17  ;;  %v4907_v27 = vpop.f32.mrf.mxu1 }
 0x3a5   : > { %v8621_v10 = vadd.f32 %v5012_v34, %v4900_v25  ;;  %v4908_v44 = vpop.f32.mrf.mxu1 }
 0x3a6   : > { %4019 = vmatmul.mubr.bf16.gmra.mxu1 %v8423_v31  ;;  %v4909_v21 = vadd.f32 %v4908_v44, %v4907_v27 }
 0x3a7   : > { %4026 = vmatprep.mubr.bf16.mxu1 %v8501_v38  ;;  %v4910_v23 = vpop.f32.mrf.mxu1 }
 0x3a8   : > { %4172 = vmatmul.mubr.bf16.gmra.mxu0 %v8448_v7 }
 0x3a9   : > { %4179 = vmatprep.mubr.bf16.mxu0 %v8451_v19  ;;  %v4911_v35 = vpop.f32.mrf.mxu1 }
 0x3aa   : > { %v4912_v63 = vadd.f32 %v4911_v35, %v4910_v23 }
 0x3ae   : > { %v5013_v6 = vpop.f32.mrf.mxu0  ;;  %4027 = vmatmul.mubr.bf16.gmra.mxu1 %v8451_v19 }
 0x3af   : > { %4034 = vmatprep.mubr.bf16.mxu1 %v8514_v42 }
 0x3b0   : > { %v5014_v39 = vpop.f32.mrf.mxu0  ;;  %4180 = vmatmul.mubr.bf16.gmra.mxu0 %v8474_v48 }
 0x3b1   : > { %v5015_v13 = vadd.f32 %v5014_v39, %v5013_v6  ;;  %4187 = vmatprep.mubr.bf16.mxu0 %v8488_v3 }
 0x3b2   : > { %v5016_v31 = vpop.f32.mrf.mxu0 }
 0x3b3   : > { %v8631_v49 = vadd.f32 %v5015_v13, %v4903_v57  ;;  %v4913_v33 = vpop.f32.mrf.mxu1 }
 0x3b4   : > { %v5017_v7 = vpop.f32.mrf.mxu0 }
 0x3b5   : > { %v5018_v4 = vadd.f32 %v5017_v7, %v5016_v31  ;;  %v4914_v61 = vpop.f32.mrf.mxu1 }
 0x3b6   : > { %4035 = vmatmul.mubr.bf16.gmra.mxu1 %v8488_v3  ;;  %v4915_v19 = vadd.f32 %v4914_v61, %v4913_v33 }
 0x3b7   : > { %v8633_v11 = vadd.f32 %v5018_v4, %v4906_v20  ;;  %4042 = vmatprep.mubr.bf16.mxu1 %v8542_v16  ;;  %v5019_v25 = vpop.f32.mrf.mxu0  ;;  %v4916_v48 = vpop.f32.mrf.mxu1 }
 0x3b8   : > { %4188 = vmatmul.mubr.bf16.gmra.mxu0 %v8511_v60 }
 0x3b9   : > { %4195 = vmatprep.mubr.bf16.mxu0 %v8522_v36  ;;  %v5020_v18 = vpop.f32.mrf.mxu0  ;;  %v4917_v55 = vpop.f32.mrf.mxu1 }
 0x3ba   : > { %v5021_v28 = vadd.f32 %v5020_v18, %v5019_v25  ;;  %v4918_v56 = vadd.f32 %v4917_v55, %v4916_v48 }
 0x3bb   : > { %v5022_v58 = vpop.f32.mrf.mxu0 }
 0x3bc   : > { %v8639_v45 = vadd.f32 %v5021_v28, %v4909_v21 }
 0x3bd   : > { %v5023_v57 = vpop.f32.mrf.mxu0 }
 0x3be   : > { %v4919_v50 = vpop.f32.mrf.mxu1  ;;  %4043 = vmatmul.mubr.bf16.gmra.mxu1 %v8522_v36  ;;  %v5024_v3 = vadd.f32 %v5023_v57, %v5022_v58 }
 0x3bf   : > { %4050 = vmatprep.mubr.bf16.mxu1 %v8563_v14  ;;  %v5025_v47 = vpop.f32.mrf.mxu0 }
 0x3c0   : > { %4196 = vmatmul.mubr.bf16.gmra.mxu0 %v8540_v29  ;;  %v4920_v60 = vpop.f32.mrf.mxu1  ;;  %v8644_v52 = vadd.f32 %v5024_v3, %v4912_v63  ;;  %v10163_v63 = vmov 0.0|0.0  }
 0x3c1   : > { %v4921_v54 = vadd.f32 %v4920_v60, %v4919_v50  ;;  %4203 = vmatprep.mubr.bf16.mxu0 %v8546_v9  ;;  %v5026_v20 = vpop.f32.mrf.mxu0 }
 0x3c2   : > { %v4922_v43 = vpop.f32.mrf.mxu1  ;;  %v5027_v62 = vadd.f32 %v5026_v20, %v5025_v47 }
 0x3c3   : > { %v5028_v32 = vpop.f32.mrf.mxu0 }
 0x3c4   : > { %v4923_v17 = vpop.f32.mrf.mxu1  ;;  %v8647_v15 = vadd.f32 %v5027_v62, %v4915_v19  ;;  %v10164_v19 = vld [vmem:[#allocation25_spill] sm:$0xff] }
 0x3c5   : > { %v4924_v36 = vadd.f32 %v4923_v17, %v4922_v43  ;;  %v5029_v34 = vpop.f32.mrf.mxu0 }
 0x3c6   : > { %v4925_v27 = vpop.f32.mrf.mxu1  ;;  %4051 = vmatmul.mubr.bf16.gmra.mxu1 %v8546_v9  ;;  %v5030_v44 = vadd.f32 %v5029_v34, %v5028_v32 }
 0x3c7   : > { %5407 = vmatprep.mubr.bf16.mxu1 %v8030_v51  ;;  %v5031_v29 = vpop.f32.mrf.mxu0 }
 0x3c8   : > { %4204 = vmatmul.mubr.bf16.gmra.mxu0 %v8561_v53  ;;  %v4926_v21 = vpop.f32.mrf.mxu1  ;;  %v8652_v23 = vadd.f32 %v5030_v44, %v4918_v56 }
 0x3c9   : > { %v4927_v35 = vadd.f32 %v4926_v21, %v4925_v27  ;;  %4211 = vmatprep.mubr.bf16.mxu0 %v10163_v63  ;;  %v5032_v6 = vpop.f32.mrf.mxu0 }
 0x3ca   : > { %v4928_v39 = vpop.f32.mrf.mxu1  ;;  %v5033_v13 = vadd.f32 %v5032_v6, %v5031_v29 }
 0x3cb   : > { %v5034_v31 = vpop.f32.mrf.mxu0 }
 0x3cc   : > { %v4929_v7 = vpop.f32.mrf.mxu1  ;;  %v8655_v4 = vadd.f32 %v5033_v13, %v4921_v54 }
 0x3cd   : > { %v4930_v9 = vadd.f32 %v4929_v7, %v4928_v39  ;;  %v5035_v33 = vpop.f32.mrf.mxu0 }
 0x3ce   : > { %v4931_v61 = vpop.f32.mrf.mxu1  ;;  %5408 = vmatmul.mubr.bf16.vlgmr.msra.gmra.mxu1 %v8119_v22  ;;  %v5036_v51 = vadd.f32 %v5035_v33, %v5034_v31 }
 0x3cf   : > { %5411 = vmatprep.mubr.bf16.mxu1 %v8196_v30  ;;  %v5037_v53 = vpop.f32.mrf.mxu0 }
 0x3d0   : > { %4212 = vmatmul.mubr.bf16.gmra.mxu0 %v10164_v19  ;;  %v4932_v25 = vpop.f32.mrf.mxu1  ;;  %v8660_v48 = vadd.f32 %v5036_v51, %v4924_v36 }
 0x3d1   : > { %v4933_v18 = vadd.f32 %v4932_v25, %v4931_v61  ;;  %v5038_v55 = vpop.f32.mrf.mxu0 }
 0x3d2   : > { %v4934_v28 = vpop.f32.mrf.mxu1  ;;  %v5039_v56 = vadd.f32 %v5038_v55, %v5037_v53 }
 0x3d3   : > { %v5040_v58 = vpop.f32.mrf.mxu0 }
 0x3d4   : > { %v4935_v57 = vpop.f32.mrf.mxu1  ;;  %v8662_v50 = vadd.f32 %v5039_v56, %v4927_v35 }
 0x3d5   : > { %v4936_v3 = vadd.f32 %v4935_v57, %v4934_v28  ;;  %v5041_v47 = vpop.f32.mrf.mxu0 }
 0x3d6   : > { %v4937_v22 = vpop.f32.mrf.mxu1  ;;  %5412 = vmatmul.mubr.bf16.gmra.mxu1 %v8233_v2  ;;  %v5042_v30 = vadd.f32 %v5041_v47, %v5040_v58 }
 0x3d7   : > { %5415 = vmatprep.mubr.bf16.mxu1 %v8262_v26  ;;  %v5043_v60 = vpop.f32.mrf.mxu0 }
 0x3d8   : > { %v4938_v54 = vpop.f32.mrf.mxu1  ;;  %v8666_v20 = vadd.f32 %v5042_v30, %v4930_v9 }
 0x3d9   : > { %v4939_v43 = vadd.f32 %v4938_v54, %v4937_v22  ;;  %v5044_v62 = vpop.f32.mrf.mxu0 }
 0x3da   : > { %v4940_v32 = vpop.f32.mrf.mxu1  ;;  %v5045_v17 = vadd.f32 %v5044_v62, %v5043_v60 }
 0x3db   : > { %v5046_v36 = vpop.f32.mrf.mxu0 }
 0x3dc   : > { %v4941_v34 = vpop.f32.mrf.mxu1  ;;  %v8668_v27 = vadd.f32 %v5045_v17, %v4933_v18 }
 0x3dd   : > { %v4942_v44 = vadd.f32 %v4941_v34, %v4940_v32  ;;  %v5047_v29 = vpop.f32.mrf.mxu0 }
 0x3de   : > { %v4943_v21 = vpop.f32.mrf.mxu1  ;;  %5416 = vmatmul.mubr.bf16.gmra.mxu1 %v8298_v1  ;;  %v5048_v2 = vadd.f32 %v5047_v29, %v5046_v36 }
 0x3df   : > { %5419 = vmatprep.mubr.bf16.mxu1 %v8339_v46  ;;  %v5049_v26 = vpop.f32.mrf.mxu0 }
 0x3e0   : > { %v4944_v35 = vpop.f32.mrf.mxu1  ;;  %v8672_v63 = vadd.f32 %v5048_v2, %v4936_v3 }
 0x3e1   : > { %v4945_v6 = vadd.f32 %v4944_v35, %v4943_v21  ;;  %v5050_v39 = vpop.f32.mrf.mxu0 }
 0x3e2   : > { %v4946_v13 = vpop.f32.mrf.mxu1  ;;  %v5051_v31 = vadd.f32 %v5050_v39, %v5049_v26 }
 0x3e3   : > { %v5052_v7 = vpop.f32.mrf.mxu0 }
 0x3e4   : > { %v4947_v9 = vpop.f32.mrf.mxu1  ;;  %v8674_v33 = vadd.f32 %v5051_v31, %v4939_v43 }
 0x3e5   : > { %v4948_v61 = vadd.f32 %v4947_v9, %v4946_v13  ;;  %v5053_v51 = vpop.f32.mrf.mxu0 }
 0x3e6   : > { %v4949_v53 = vpop.f32.mrf.mxu1  ;;  %5420 = vmatmul.mubr.bf16.gmra.mxu1 %v8369_v41  ;;  %v5054_v1 = vadd.f32 %v5053_v51, %v5052_v7 }
 0x3e7   : > { %5423 = vmatprep.mubr.bf16.mxu1 %v8401_v59  ;;  %v5055_v46 = vpop.f32.mrf.mxu0 }
 0x3e8   : > { %v4950_v19 = vpop.f32.mrf.mxu1  ;;  %v8678_v25 = vadd.f32 %v5054_v1, %v4942_v44 }
 0x3e9   : > { %v4951_v18 = vadd.f32 %v4950_v19, %v4949_v53  ;;  %v5056_v55 = vpop.f32.mrf.mxu0 }
 0x3ea   : > { %v4952_v28 = vpop.f32.mrf.mxu1  ;;  %v5057_v56 = vadd.f32 %v5056_v55, %v5055_v46 }
 0x3eb   : > { %v5058_v58 = vpop.f32.mrf.mxu0 }
 0x3ec   : > { %v4953_v57 = vpop.f32.mrf.mxu1  ;;  %v8680_v3 = vadd.f32 %v5057_v56, %v4945_v6 }
 0x3ed   : > { %v4954_v47 = vadd.f32 %v4953_v57, %v4952_v28  ;;  %v5059_v22 = vpop.f32.mrf.mxu0 }
 0x3ee   : > { %10165 = vst [vmem:[#allocation29_spill] sm:$0xff] %v8680_v3  ;;  %v4955_v30 = vpop.f32.mrf.mxu1  ;;  %5424 = vmatmul.mubr.bf16.gmra.mxu1 %v8442_v5  ;;  %v5060_v41 = vadd.f32 %v5059_v22, %v5058_v58 }
 0x3ef   : > { %5427 = vmatprep.mubr.bf16.mxu1 %v8471_v40  ;;  %v5061_v59 = vpop.f32.mrf.mxu0 }
 0x3f0   : > { %v4956_v60 = vpop.f32.mrf.mxu1  ;;  %v8684_v54 = vadd.f32 %v5060_v41, %v4948_v61 }
 0x3f1   : > { %v4957_v43 = vadd.f32 %v4956_v60, %v4955_v30  ;;  %v5062_v62 = vpop.f32.mrf.mxu0 }
 0x3f2   : > { %10166 = vst [vmem:[#allocation31_spill] sm:$0xff] %v8684_v54  ;;  %v4958_v32 = vpop.f32.mrf.mxu1  ;;  %v5063_v17 = vadd.f32 %v5062_v62, %v5061_v59  ;;  %v10172_v59 = vld [vmem:[#allocation27_spill] sm:$0xff] }
 0x3f3   : > { %v5064_v36 = vpop.f32.mrf.mxu0  ;;  %v8881_v54 = vld [vmem:[#allocation2 + $0xd0] sm:$0xff] }
 0x3f4   : > { %v4959_v34 = vpop.f32.mrf.mxu1  ;;  %v8686_v44 = vadd.f32 %v5063_v17, %v4951_v18  ;;  %10198 = vst [vmem:[#allocation57_spill] sm:$0xff] %v8881_v54  ;;  %v8899_v54 = vld [vmem:[#allocation2 + $0xe8] sm:$0xff] }
 0x3f5   : > { %v4960_v29 = vadd.f32 %v4959_v34, %v4958_v32  ;;  %v5065_v21 = vpop.f32.mrf.mxu0  ;;  %10202 = vst [vmem:[#allocation61_spill] sm:$0xff] %v8899_v54 }
 0x3f6   : > { %10167 = vst [vmem:[#allocation32_spill] sm:$0xff] %v8686_v44  ;;  %v4961_v2 = vpop.f32.mrf.mxu1  ;;  %5428 = vmatmul.mubr.bf16.gmra.mxu1 %v8501_v38  ;;  %v5066_v5 = vadd.f32 %v5065_v21, %v5064_v36 }
 0x3f7   : > { %5431 = vmatprep.mubr.bf16.mxu1 %v8514_v42  ;;  %v5067_v40 = vpop.f32.mrf.mxu0 }
 0x3f8   : > { %v4962_v26 = vpop.f32.mrf.mxu1  ;;  %v8690_v35 = vadd.f32 %v5066_v5, %v4954_v47 }
 0x3f9   : > { %v4963_v6 = vadd.f32 %v4962_v26, %v4961_v2  ;;  %v5068_v39 = vpop.f32.mrf.mxu0 }
 0x3fa   : > { %10168 = vst [vmem:[#allocation26_spill] sm:$0xff] %v8690_v35  ;;  %v4964_v13 = vpop.f32.mrf.mxu1  ;;  %v5069_v31 = vadd.f32 %v5068_v39, %v5067_v40  ;;  %v8845_v35 = vld [vmem:[#allocation2 + $0xa8] sm:$0xff] }
 0x3fb   : > { %v5070_v7 = vpop.f32.mrf.mxu0  ;;  %10190 = vst [vmem:[#allocation49_spill] sm:$0xff] %v8845_v35  ;;  %v8865_v35 = vld [vmem:[#allocation2 + $0xc0] sm:$0xff] }
 0x3fc   : > { %v4965_v9 = vpop.f32.mrf.mxu1  ;;  %v8692_v61 = vadd.f32 %v5069_v31, %v4957_v43  ;;  %10194 = vst [vmem:[#allocation53_spill] sm:$0xff] %v8865_v35  ;;  %v8885_v35 = vld [vmem:[#allocation2 + $0xd8] sm:$0xff] }
 0x3fd   : > { %v4966_v51 = vadd.f32 %v4965_v9, %v4964_v13  ;;  %v5071_v53 = vpop.f32.mrf.mxu0  ;;  %10199 = vst [vmem:[#allocation58_spill] sm:$0xff] %v8885_v35  ;;  %v8903_v35 = vld [vmem:[#allocation2 + $0xf0] sm:$0xff] }
 0x3fe   : > { %10169 = vst [vmem:[#allocation33_spill] sm:$0xff] %v8692_v61  ;;  %v4967_v1 = vpop.f32.mrf.mxu1  ;;  %5432 = vmatmul.mubr.bf16.gmra.mxu1 %v8542_v16  ;;  %v5072_v38 = vadd.f32 %v5071_v53, %v5070_v7  ;;  %v8841_v61 = vld [vmem:[#allocation2 + $0xa0] sm:$0xff]  ;;  %10203 = vst [vmem:[#allocation62_spill] sm:$0xff] %v8903_v35 }
 0x3ff   : > { %5435 = vmatprep.mubr.bf16.mxu1 %v8563_v14  ;;  %v5073_v42 = vpop.f32.mrf.mxu0  ;;  %10189 = vst [vmem:[#allocation48_spill] sm:$0xff] %v8841_v61  ;;  %v8861_v61 = vld [vmem:[#allocation2 + $0xb8] sm:$0xff] }
 0x400   : > { %v4968_v46 = vpop.f32.mrf.mxu1  ;;  %v8696_v19 = vadd.f32 %v5072_v38, %v4960_v29  ;;  %10193 = vst [vmem:[#allocation52_spill] sm:$0xff] %v8861_v61 }
 0x401   : > { %v4969_v18 = vadd.f32 %v4968_v46, %v4967_v1  ;;  %v5074_v55 = vpop.f32.mrf.mxu0 }
 0x402   : > { %10170 = vst [vmem:[#allocation28_spill] sm:$0xff] %v8696_v19  ;;  %v4970_v28 = vpop.f32.mrf.mxu1  ;;  %v5075_v56 = vadd.f32 %v5074_v55, %v5073_v42 }
 0x403   : > { %v5076_v58 = vpop.f32.mrf.mxu0 }
 0x404   : > { %v4971_v57 = vpop.f32.mrf.mxu1  ;;  %v8698_v47 = vadd.f32 %v5075_v56, %v4963_v6 }
 0x405   : > { %v4972_v22 = vadd.f32 %v4971_v57, %v4970_v28  ;;  %v5077_v30 = vpop.f32.mrf.mxu0 }
 0x406   : > { %10171 = vst [vmem:[#allocation30_spill] sm:$0xff] %v8698_v47  ;;  %v4973_v41 = vpop.f32.mrf.mxu1  ;;  %5436 = vmatmul.mubr.bf16.gmra.mxu1 %v10172_v59  ;;  %v5078_v16 = vadd.f32 %v5077_v30, %v5076_v58  ;;  %v8834_v47 = vld [vmem:[#allocation2 + $0x98] sm:$0xff] }
 0x407   : > { %v5079_v60 = vpop.f32.mrf.mxu0  ;;  %10187 = vst [vmem:[#allocation46_spill] sm:$0xff] %v8834_v47 }
 0x408   : > { %v4974_v14 = vpop.f32.mrf.mxu1  ;;  %v8701_v43 = vadd.f32 %v5078_v16, %v4966_v51 }
 0x409   : > { %v4975_v62 = vadd.f32 %v4974_v14, %v4973_v41  ;;  %v5080_v32 = vpop.f32.mrf.mxu0 }
 0x40a   : > { %10173 = vst [vmem:[#allocation25_spill] sm:$0xff] %v8701_v43  ;;  %v4976_v17 = vpop.f32.mrf.mxu1  ;;  %v5081_v36 = vadd.f32 %v5080_v32, %v5079_v60  ;;  %v8830_v43 = vld [vmem:[#allocation2 + $0x90] sm:$0xff] }
 0x40b   : > { %v5082_v34 = vpop.f32.mrf.mxu0 }
 0x40c   : > { %v4977_v29 = vpop.f32.mrf.mxu1  ;;  %v8703_v21 = vadd.f32 %v5081_v36, %v4969_v18 }
 0x40d   : > { %v4978_v2 = vadd.f32 %v4977_v29, %v4976_v17  ;;  %v5083_v5 = vpop.f32.mrf.mxu0 }
 0x40e   : > { %10174 = vst [vmem:[#allocation27_spill] sm:$0xff] %v8703_v21  ;;  %v5107_v40 = vpop.f32.mrf.mxu1  ;;  %v5084_v26 = vadd.f32 %v5083_v5, %v5082_v34  ;;  %v8820_v21 = vld [vmem:[#allocation2 + $0x80] sm:$0xff] }
 0x410   : > { %v5085_v6 = vpop.f32.mrf.mxu0  ;;  %v5108_v39 = vpop.f32.mrf.mxu1  ;;  %v8705_v13 = vadd.f32 %v5084_v26, %v4972_v22 }
 0x411   : > { %v5109_v31 = vadd.f32 %v5108_v39, %v5107_v40 }
 0x412   : > { %10175 = vst [vmem:[#allocation34_spill] sm:$0xff] %v8705_v13  ;;  %v5086_v7 = vpop.f32.mrf.mxu0  ;;  %v5110_v9 = vpop.f32.mrf.mxu1  ;;  %v8816_v13 = vld [vmem:[#allocation2 + $0x78] sm:$0xff] }
 0x413   : > { %v3933_v51 = vadd.f32 %v5109_v31, %v8591_v24  ;;  %v5087_v53 = vadd.f32 %v5086_v7, %v5085_v6 }
 0x414   : > { %v5088_v1 = vpop.f32.mrf.mxu0  ;;  %v5111_v38 = vpop.f32.mrf.mxu1 }
 0x415   : > { %v8708_v42 = vadd.f32 %v5087_v53, %v4975_v62  ;;  %v5112_v46 = vadd.f32 %v5111_v38, %v5110_v9  ;;  %v8738_v53 = vstv %s354_s8 }
 0x416   : > { %v5089_v18 = vpop.f32.mrf.mxu0  ;;  %v5113_v55 = vpop.f32.mrf.mxu1 }
 0x417   : > { %10176 = vst [vmem:[#allocation35_spill] sm:$0xff] %v8708_v42  ;;  %v3936_v28 = vadd.f32 %v5112_v46, %v8594_v37  ;;  %v5090_v56 = vadd.f32 %v5089_v18, %v5088_v1 }
 0x418   : > { %v5219_v58 = vpop.f32.mrf.mxu0  ;;  %v5114_v57 = vpop.f32.mrf.mxu1 }
 0x419   : > { %v8711_v22 = vadd.f32 %v5090_v56, %v4978_v2  ;;  %v5115_v30 = vadd.f32 %v5114_v57, %v5113_v55  ;;  %v6192_v55 = vld [vmem:[#allocation2 + $0x30] sm:$0xff]  ;;  %v8751_v57 = vstv %s6552_s10 }
 0x41a   : > { %v5220_v41 = vpop.f32.mrf.mxu0  ;;  %v5116_v59 = vpop.f32.mrf.mxu1 }
 0x41b   : > { %10177 = vst [vmem:[#allocation36_spill] sm:$0xff] %v8711_v22  ;;  %v8714_v24 = vadd.f32 %v5115_v30, %v8607_v0  ;;  %v5221_v16 = vadd.f32 %v5220_v41, %v5219_v58 }
 0x41c   : > { %v5222_v60 = vpop.f32.mrf.mxu0  ;;  %v5117_v14 = vpop.f32.mrf.mxu1 }
 0x41d   : > { %v5118_v62 = vadd.f32 %v5117_v14, %v5116_v59  ;;  %v8716_v36 = vadd.f32 %v5221_v16, %v3933_v51  ;;  %v6193_v14 = vld [vmem:[#allocation2 + $0x20] sm:$0xff] }
 0x41e   : > { %v5223_v32 = vpop.f32.mrf.mxu0  ;;  %v5119_v17 = vpop.f32.mrf.mxu1 }
 0x41f   : > { %10178 = vst [vmem:[#allocation37_spill] sm:$0xff] %v8716_v36  ;;  %v8719_v37 = vadd.f32 %v5118_v62, %v8609_v12  ;;  %v5224_v34 = vadd.f32 %v5223_v32, %v5222_v60  ;;  %v356_v62 = vmax.f32 %v8738_v53, %v6193_v14  ;;  %v6196_v14 = vld [vmem:[#allocation2 + $0x40] sm:$0xff]  ;;  %v8812_v36 = vld [vmem:[#allocation2 + $0x70] sm:$0xff] }
 0x420   : > { %v8721_v29 = vpop.f32.mrf.mxu0  ;;  %v5120_v2 = vpop.f32.mrf.mxu1 }
 0x421   : > { %v5121_v5 = vadd.f32 %v5120_v2, %v5119_v17  ;;  %v8725_v26 = vadd.f32 %v5224_v34, %v3936_v28  ;;  %v358_v28 = vmax.f32 %v8738_v53, %v6192_v55  ;;  %v8763_v17 = vstv %s6556_s13  ;;  %v6194_v34 = vld [vmem:[#allocation2 + $0x38] sm:$0xff] }
 0x422   : > { %v8723_v40 = vpop.f32.mrf.mxu0  ;;  %v5122_v0 = vpop.f32.mrf.mxu1  ;;  %v359_v2 = vmax.f32 %v8738_v53, %v6194_v34 }
 0x423   : > { %10179 = vst [vmem:[#allocation38_spill] sm:$0xff] %v8725_v26  ;;  %v8728_v6 = vadd.f32 %v5121_v5, %v8619_v8  ;;  %v391_v60 = vmin.f32 %v8751_v57, %v358_v28 }
 0x424   : > { %v8731_v39 = vpop.f32.mrf.mxu0  ;;  %v5123_v31 = vpop.f32.mrf.mxu1 }
 0x425   : > { %v5124_v12 = vadd.f32 %v5123_v31, %v5122_v0 }
 0x426   : > { %v8733_v7 = vpop.f32.mrf.mxu0  ;;  %v5125_v9 = vpop.f32.mrf.mxu1 }
 0x427   : > { %v8736_v51 = vadd.f32 %v5124_v12, %v8621_v10  ;;  %v8772_v12 = vmul.f32 %v8763_v17, %v391_v60 }
 0x428   : > { %v8740_v1 = vpop.f32.mrf.mxu0  ;;  %v5126_v38 = vpop.f32.mrf.mxu1 }
 0x429   : > { %v5127_v46 = vadd.f32 %v5126_v38, %v5125_v9 }
 0x42a   : > { %v8742_v8 = vpop.f32.mrf.mxu0  ;;  %v5128_v18 = vpop.f32.mrf.mxu1 }
 0x42b   : > { %v8746_v56 = vadd.f32 %v5127_v46, %v8631_v49  ;;  %v389_v46 = vmin.f32 %v8751_v57, %v356_v62  ;;  %v5457_v62 = vcvt.f32.s32 %v8772_v12 }
 0x42c   : > { %v8748_v58 = vpop.f32.mrf.mxu0  ;;  %v5129_v10 = vpop.f32.mrf.mxu1 }
 0x42d   : > { %10180 = vst [vmem:[#allocation39_spill] sm:$0xff] %v8746_v56  ;;  %v5130_v30 = vadd.f32 %v5129_v10, %v5128_v18  ;;  %v6195_v18 = vld [vmem:[#allocation2 + $0x28] sm:$0xff]  ;;  %v392_v10 = vmin.f32 %v8751_v57, %v359_v2  ;;  %v8791_v2 = vld [vmem:[#allocation2 + $0x58] sm:$0xff]  ;;  %v5458_v19 = vcvt.s32.f32 %v5457_v62 }
 0x42e   : > { %v8753_v41 = vpop.f32.mrf.mxu0  ;;  %v5131_v59 = vpop.f32.mrf.mxu1  ;;  %v357_v55 = vmax.f32 %v8738_v53, %v6195_v18  ;;  %v8795_v18 = vld [vmem:[#allocation2 + $0x60] sm:$0xff] }
 0x42f   : > { %v8756_v16 = vadd.f32 %v5130_v30, %v8633_v11  ;;  %v8809_v26 = vmul.f32 %v8763_v17, %v392_v10  ;;  %v5459_v61 = vand.u32 2147483647, %v5458_v19  ;;  %v8894_v19 = vld [vmem:[#allocation2 + $0xe0] sm:$0xff] }
 0x430   : > { %v8760_v32 = vpop.f32.mrf.mxu0  ;;  %v5132_v49 = vpop.f32.mrf.mxu1  ;;  %10201 = vst [vmem:[#allocation60_spill] sm:$0xff] %v8894_v19 }
 0x431   : > { %10181 = vst [vmem:[#allocation40_spill] sm:$0xff] %v8756_v16  ;;  %v5133_v5 = vadd.f32 %v5132_v49, %v5131_v59  ;;  %v8782_v49 = vld [vmem:[#allocation2 + $0x48] sm:$0xff] }
 0x432   : > { %v8766_v0 = vpop.f32.mrf.mxu0  ;;  %v5134_v31 = vpop.f32.mrf.mxu1 }
 0x433   : > { %v8769_v11 = vadd.f32 %v5133_v5, %v8639_v45  ;;  %v360_v45 = vmax.f32 %v8738_v53, %v6196_v14  ;;  %v6198_v5 = vld [vmem:[#allocation2 + $0x50] sm:$0xff] }
 0x434   : > { %v8774_v9 = vpop.f32.mrf.mxu0  ;;  %v5135_v38 = vpop.f32.mrf.mxu1 }
 0x435   : > { %10182 = vst [vmem:[#allocation41_spill] sm:$0xff] %v8769_v11  ;;  %v5136_v28 = vadd.f32 %v5135_v38, %v5134_v31  ;;  %v362_v31 = vmax.f32 %v8738_v53, %v6198_v5  ;;  %v390_v38 = vmin.f32 %v8751_v57, %v357_v55  ;;  %v5465_v55 = vcvt.f32.s32 %v8809_v26 }
 0x436   : > { %v8779_v30 = vpop.f32.mrf.mxu0  ;;  %v5137_v59 = vpop.f32.mrf.mxu1 }
 0x437   : > { %v8787_v34 = vadd.f32 %v5136_v28, %v8644_v52  ;;  %v8802_v52 = vmul.f32 %v8763_v17, %v389_v46  ;;  %v8804_v28 = vld [vmem:[#allocation2 + $0x68] sm:$0xff]  ;;  %v395_v46 = vmin.f32 %v8751_v57, %v362_v31 }
 0x438   : > { %v8799_v22 = vpop.f32.mrf.mxu0  ;;  %v5138_v60 = vpop.f32.mrf.mxu1 }
 0x439   : > { %10183 = vst [vmem:[#allocation42_spill] sm:$0xff] %v8787_v34  ;;  %10184 = vst [vmem:[#allocation43_spill] sm:$0xff] %v8799_v22  ;;  %v5139_v42 = vadd.f32 %v5138_v60, %v5137_v59  ;;  %v8824_v60 = vld [vmem:[#allocation2 + $0x88] sm:$0xff]  ;;  %v5441_v44 = vcvt.f32.s32 %v8802_v52  ;;  %v5455_v34 = vand.u32 2147483647, %v8772_v12 }
 0x43a   : > { %10185 = vst [vmem:[#allocation44_spill] sm:$0xff] %v8824_v60  ;;  %v8828_v10 = vpop.f32.mrf.mxu0  ;;  %v5140_v5 = vpop.f32.mrf.mxu1  ;;  %v5460_v60 = vand.u32 2147483648, %v8772_v12  ;;  %v5439_v35 = vand.u32 2147483647, %v8802_v52 }
 0x43b   : > { %10186 = vst [vmem:[#allocation45_spill] sm:$0xff] %v8828_v10  ;;  %v8839_v59 = vadd.f32 %v5139_v42, %v8647_v15  ;;  %v8853_v15 = vld [vmem:[#allocation2 + $0xb0] sm:$0xff]  ;;  %v5466_v10 = vcvt.s32.f32 %v5465_v55  ;;  %vm8923_vm1 = vcmp.lt.f32.partialorder %v5455_v34, 8388608.0 }
 0x43c   : > { %v8849_v14 = vpop.f32.mrf.mxu0  ;;  %v5141_v11 = vpop.f32.mrf.mxu1  ;;  %10192 = vst [vmem:[#allocation51_spill] sm:$0xff] %v8853_v15  ;;  %v5461_v19 = vor.u32 %v5460_v60, %v5459_v61  ;;  %vm8964_vm2 = vcmp.lt.f32.partialorder %v5439_v35, 8388608.0 }
 0x43d   : > { %10188 = vst [vmem:[#allocation47_spill] sm:$0xff] %v8839_v59  ;;  %10191 = vst [vmem:[#allocation50_spill] sm:$0xff] %v8849_v14  ;;  %v5142_v62 = vadd.f32 %v5141_v11, %v5140_v5  ;;  %v8859_v59 = vmul.f32 %v8763_v17, %v390_v38  ;;  %v8869_v14 = vld [vmem:[#allocation2 + $0xc8] sm:$0xff]  ;;  %v393_v38 = vmin.f32 %v8751_v57, %v360_v45  ;;  %v5467_v11 = vand.u32 2147483647, %v5466_v10 }
 0x43e   : > { %10195 = vst [vmem:[#allocation54_spill] sm:$0xff] %v8869_v14  ;;  %v8873_v5 = vpop.f32.mrf.mxu0  ;;  %v5143_v42 = vpop.f32.mrf.mxu1 }
 0x43f   : > { %10196 = vst [vmem:[#allocation55_spill] sm:$0xff] %v8873_v5  ;;  %v8877_v15 = vadd.f32 %v5142_v62, %v8652_v23  ;;  %v5442_v23 = vcvt.s32.f32 %v5441_v44  ;;  %v8892_v62 = vmul.f32 %v8763_v17, %v395_v46  ;;  %v5449_v31 = vcvt.f32.s32 %v8859_v59  ;;  %v8907_v46 = vld [vmem:[#allocation2 + $0xf8] sm:$0xff] }
 0x440   : > { %v8889_v14 = vpop.f32.mrf.mxu0  ;;  %v5144_v45 = vpop.f32.mrf.mxu1  ;;  %10204 = vst [vmem:[#allocation63_spill] sm:$0xff] %v8907_v46 }
 0x441   : > { %10197 = vst [vmem:[#allocation56_spill] sm:$0xff] %v8877_v15  ;;  %10200 = vst [vmem:[#allocation59_spill] sm:$0xff] %v8889_v14  ;;  %v5145_v5 = vadd.f32 %v5144_v45, %v5143_v42  ;;  %v8914_v42 = vmul.f32 %v8763_v17, %v393_v38  ;;  %v8916_v45 = vld [vmem:[#allocation2 + $0x100] sm:$0xff]  ;;  %v5443_v38 = vand.u32 2147483647, %v5442_v23  ;;  %v5489_v22 = vcvt.f32.s32 %v8892_v62 }
 0x442   : > { %v8911_v15 = vpop.f32.mrf.mxu0  ;;  %v5146_v55 = vpop.f32.mrf.mxu1  ;;  %10206 = vst [vmem:[#allocation65_spill] sm:$0xff] %v8916_v45  ;;  %v5450_v34 = vcvt.s32.f32 %v5449_v31  ;;  %v5463_v23 = vand.u32 2147483647, %v8809_v26 }
 0x443   : > { %10205 = vst [vmem:[#allocation64_spill] sm:$0xff] %v8911_v15  ;;  %v8921_v54 = vadd.f32 %v5145_v5, %v8655_v4  ;;  %v5444_v15 = vand.u32 2147483648, %v8802_v52  ;;  %v5468_v4 = vand.u32 2147483648, %v8809_v26  ;;  %v8933_v5 = vld [vmem:[#allocation2 + $0x108] sm:$0xff] }
 0x444   : > { %v8927_v14 = vpop.f32.mrf.mxu0  ;;  %v5147_v46 = vpop.f32.mrf.mxu1  ;;  %10211 = vst [vmem:[#allocation68_spill] sm:$0xff] %v8933_v5  ;;  %vm8971_vm12 = vcmp.lt.f32.partialorder %v5463_v23, 8388608.0 }
 0x445   : > { %10207 = vst [vmem:[#allocation66_spill] sm:$0xff] %v8921_v54  ;;  %10210 = vst [vmem:[#allocation67_spill] sm:$0xff] %v8927_v14  ;;  %v5148_v16 = vadd.f32 %v5147_v46, %v5146_v55  ;;  %v5473_v54 = vcvt.f32.s32 %v8914_v42  ;;  %v10213_v46 = vmax.f32 %v8738_v53, %v8791_v2  ;;  %v8945_v55 = vld [vmem:[#allocation2 + $0x110] sm:$0xff]  ;;  %v8949_v14 = vld [vmem:[#allocation2 + $0x118] sm:$0xff]  ;;  %v5445_v31 = vor.u32 %v5444_v15, %v5443_v38 }
 0x446   : > { %v8937_v60 = vpop.f32.mrf.mxu0  ;;  %v5149_v45 = vpop.f32.mrf.mxu1  ;;  %10214 = vst [vmem:[#allocation70_spill] sm:$0xff] %v8945_v55  ;;  %10215 = vst [vmem:[#allocation71_spill] sm:$0xff] %v8949_v14  ;;  %v5490_v55 = vcvt.s32.f32 %v5489_v22  ;;  %v5469_v61 = vor.u32 %v5468_v4, %v5467_v11  ;;  %v5451_v14 = vand.u32 2147483647, %v5450_v34  ;;  %v5227_v38 = vadd.f32 %v8723_v40, %v8721_v29 }
 0x447   : > { %10212 = vst [vmem:[#allocation69_spill] sm:$0xff] %v8937_v60  ;;  %v396_v10 = vmin.f32 %v8751_v57, %v10213_v46  ;;  %v8954_v5 = vadd.f32 %v5148_v16, %v8660_v48  ;;  %v8957_v60 = vstv %s6558_s15  ;;  %v5462_v46 = vsel %vm8923_vm1, %v5461_v19, %v8772_v12 }
 0x448   : > { %v8959_v3 = vpop.f32.mrf.mxu0  ;;  %v5150_v2 = vpop.f32.mrf.mxu1  ;;  %v5452_v48 = vand.u32 2147483648, %v8859_v59  ;;  %v5474_v44 = vcvt.s32.f32 %v5473_v54  ;;  %v10222_v12 = vmax.f32 %v8738_v53, %v8782_v49  ;;  %v8986_v11 = vmul.f32 %v5462_v46, %v8957_v60 }
 0x449   : > { %10216 = vst [vmem:[#allocation72_spill] sm:$0xff] %v8954_v5  ;;  %10217 = vst [vmem:[#allocation73_spill] sm:$0xff] %v8959_v3  ;;  %v5151_v56 = vadd.f32 %v5150_v2, %v5149_v45  ;;  %v8976_v35 = vmul.f32 %v8763_v17, %v396_v10  ;;  %v5447_v19 = vand.u32 2147483647, %v8859_v59  ;;  %v10223_v45 = vmax.f32 %v8738_v53, %v8812_v36 }
 0x44a   : > { %v8969_v16 = vpop.f32.mrf.mxu0  ;;  %v5152_v5 = vpop.f32.mrf.mxu1  ;;  %v394_v22 = vmin.f32 %v8751_v57, %v10222_v12  ;;  %v5492_v34 = vand.u32 2147483648, %v8892_v62  ;;  %v5470_v36 = vsel %vm8971_vm12, %v5469_v61, %v8809_v26  ;;  %v5453_v10 = vor.u32 %v5452_v48, %v5451_v14 }
 0x44b   : > { %v8983_v15 = vadd.f32 %v5151_v56, %v8662_v50  ;;  %v399_v54 = vmin.f32 %v8751_v57, %v10223_v45  ;;  %v5446_v50 = vsel %vm8964_vm2, %v5445_v31, %v8802_v52  ;;  %v5491_v56 = vand.u32 2147483647, %v5490_v55 }
 0x44c   : > { %v8995_v4 = vpop.f32.mrf.mxu0  ;;  %v5153_v49 = vpop.f32.mrf.mxu1  ;;  %v5487_v2 = vand.u32 2147483647, %v8892_v62  ;;  %v5475_v40 = vand.u32 2147483647, %v5474_v44  ;;  %v5476_v12 = vand.u32 2147483648, %v8914_v42  ;;  %v5497_v47 = vcvt.f32.s32 %v8976_v35 }
 0x44d   : > { %v5154_v23 = vadd.f32 %v5153_v49, %v5152_v5  ;;  %v9010_v52 = vmul.f32 %v8763_v17, %v394_v22  ;;  %vm9015_vm13 = vcmp.lt.f32.partialorder %v5447_v19, 8388608.0  ;;  %v5471_v26 = vand.u32 2147483647, %v8914_v42 }
 0x44e   : > { %v9005_v46 = vpop.f32.mrf.mxu0  ;;  %v5155_v29 = vpop.f32.mrf.mxu1  ;;  %v9021_v14 = vmul.f32 %v8763_v17, %v399_v54  ;;  %v5230_v61 = vadd.f32 %v8733_v7, %v8731_v39  ;;  %v9028_v48 = vmul.f32 %v5446_v50, %v8957_v60  ;;  %v10227_v44 = vmax.f32 %v8738_v53, %v8795_v18 }
 0x44f   : > { %v9013_v5 = vadd.f32 %v5154_v23, %v8666_v20  ;;  %v5493_v20 = vor.u32 %v5492_v34, %v5491_v56  ;;  %v9035_v45 = vadd.f32 %v5227_v38, %v8714_v24  ;;  %v9038_v54 = vmul.f32 %v5470_v36, %v8957_v60 }
 0x450   : > { %v9025_v55 = vpop.f32.mrf.mxu0  ;;  %v5156_v31 = vpop.f32.mrf.mxu1  ;;  %10226 = vst [vmem:[#allocation74_spill] sm:$0xff] %v9028_v48  ;;  %v397_v22 = vmin.f32 %v8751_v57, %v10227_v44  ;;  %vm9040_vm14 = vcmp.lt.f32.partialorder %v5487_v2, 8388608.0  ;;  %v5454_v18 = vsel %vm9015_vm13, %v5453_v10, %v8859_v59  ;;  %v5477_v50 = vor.u32 %v5476_v12, %v5475_v40 }
 0x451   : > { %v5157_v19 = vadd.f32 %v5156_v31, %v5155_v29  ;;  %10228 = vst [vmem:[#allocation75_spill] sm:$0xff] %v9038_v54  ;;  %v5498_v56 = vcvt.s32.f32 %v5497_v47  ;;  %v5481_v34 = vcvt.f32.s32 %v9010_v52  ;;  %v5233_v24 = vadd.f32 %v8742_v8, %v8740_v1  ;;  %v10272_v54 = vld [vmem:[#allocation59_spill] sm:$0xff] }
 0x452   : > { %v9044_v7 = vpop.f32.mrf.mxu0  ;;  %v5158_v49 = vpop.f32.mrf.mxu1  ;;  %vm9055_vm15 = vcmp.lt.f32.partialorder %v5471_v26, 8388608.0  ;;  %v5521_v36 = vcvt.f32.s32 %v9021_v14  ;;  %v9063_v59 = vadd.f32 %v5230_v61, %v8719_v37  ;;  %v5494_v10 = vsel %vm9040_vm14, %v5493_v20, %v8892_v62 }
 0x453   : > { %v9053_v38 = vadd.f32 %v5157_v19, %v8668_v27  ;;  %v9069_v1 = vmul.f32 %v8763_v17, %v397_v22  ;;  %v10233_v27 = vmax.f32 %v8738_v53, %v8816_v13  ;;  %v9076_v12 = vmul.f32 %v5454_v18, %v8957_v60 }
 0x454   : > { %v9060_v2 = vpop.f32.mrf.mxu0  ;;  %v5159_v29 = vpop.f32.mrf.mxu1  ;;  %v5495_v47 = vand.u32 2147483647, %v8976_v35  ;;  %v10235_v37 = vmax.f32 %v8738_v53, %v8804_v28  ;;  %v5478_v13 = vsel %vm9055_vm15, %v5477_v50, %v8914_v42  ;;  %v5499_v61 = vand.u32 2147483647, %v5498_v56 }
 0x455   : > { %v400_v8 = vmin.f32 %v8751_v57, %v10233_v27  ;;  %v5160_v40 = vadd.f32 %v5159_v29, %v5158_v49  ;;  %10234 = vst [vmem:[#allocation76_spill] sm:$0xff] %v9076_v12  ;;  %v5500_v31 = vand.u32 2147483648, %v8976_v35  ;;  %v5482_v20 = vcvt.s32.f32 %v5481_v34 }
 0x456   : > { %v398_v3 = vmin.f32 %v8751_v57, %v10235_v37  ;;  %v9083_v62 = vpop.f32.mrf.mxu0  ;;  %v5161_v26 = vpop.f32.mrf.mxu1  ;;  %v9093_v22 = vmul.f32 %v5494_v10, %v8957_v60  ;;  %v9096_v28 = vadd.f32 %v5233_v24, %v8728_v6  ;;  %v5522_v19 = vcvt.s32.f32 %v5521_v36 }
 0x457   : > { %v9090_v44 = vadd.f32 %v5160_v40, %v8672_v63  ;;  %v5236_v39 = vadd.f32 %v8753_v41, %v8748_v58  ;;  %v5479_v18 = vand.u32 2147483647, %v9010_v52  ;;  %v5505_v50 = vcvt.f32.s32 %v9069_v1 }
 0x458   : > { %10236 = vst [vmem:[#allocation77_spill] sm:$0xff] %v9093_v22  ;;  %10237 = vst [vmem:[#allocation78_spill] sm:$0xff] %v9096_v28  ;;  %v9100_v49 = vpop.f32.mrf.mxu0  ;;  %v5162_v42 = vpop.f32.mrf.mxu1  ;;  %v9105_v63 = vmul.f32 %v8763_v17, %v400_v8  ;;  %v9108_v34 = vmul.f32 %v5478_v13, %v8957_v60  ;;  %vm9110_vm0 = vcmp.lt.f32.partialorder %v5495_v47, 8388608.0  ;;  %v9115_v58 = vmul.f32 %v8763_v17, %v398_v3 }
 0x459   : > { %v5163_v56 = vadd.f32 %v5162_v42, %v5161_v26  ;;  %v5501_v23 = vor.u32 %v5500_v31, %v5499_v61  ;;  %v5483_v36 = vand.u32 2147483647, %v5482_v20  ;;  %v5484_v29 = vand.u32 2147483648, %v9010_v52 }
 0x45a   : > { %10238 = vst [vmem:[#allocation79_spill] sm:$0xff] %v9108_v34  ;;  %v9117_v41 = vpop.f32.mrf.mxu0  ;;  %v5164_v24 = vpop.f32.mrf.mxu1  ;;  %v10241_v10 = vmax.f32 %v8738_v53, %v8830_v43  ;;  %v5239_v8 = vadd.f32 %v8766_v0, %v8760_v32  ;;  %v5523_v47 = vand.u32 2147483647, %v5522_v19  ;;  %v5524_v37 = vand.u32 2147483648, %v9021_v14 }
 0x45b   : > { %v9127_v40 = vadd.f32 %v5163_v56, %v8674_v33  ;;  %vm9132_vm3 = vcmp.lt.f32.partialorder %v5479_v18, 8388608.0  ;;  %v5519_v43 = vand.u32 2147483647, %v9021_v14  ;;  %v5506_v61 = vcvt.s32.f32 %v5505_v50 }
 0x45c   : > { %v403_v27 = vmin.f32 %v8751_v57, %v10241_v10  ;;  %v9130_v3 = vpop.f32.mrf.mxu0  ;;  %v5165_v26 = vpop.f32.mrf.mxu1  ;;  %v5529_v31 = vcvt.f32.s32 %v9105_v63  ;;  %v9139_v32 = vadd.f32 %v5236_v39, %v8736_v51  ;;  %v5503_v33 = vand.u32 2147483647, %v9069_v1 }
 0x45d   : > { %v5166_v20 = vadd.f32 %v5165_v26, %v5164_v24  ;;  %v5513_v0 = vcvt.f32.s32 %v9115_v58  ;;  %v5502_v18 = vsel %vm9110_vm0, %v5501_v23, %v8976_v35  ;;  %v5485_v56 = vor.u32 %v5484_v29, %v5483_v36  ;;  %v10246_v26 = vld [vmem:[#allocation39_spill] sm:$0xff] }
 0x45e   : > { %10244 = vst [vmem:[#allocation80_spill] sm:$0xff] %v9139_v32  ;;  %v9143_v19 = vpop.f32.mrf.mxu0  ;;  %v5167_v42 = vpop.f32.mrf.mxu1  ;;  %v9149_v50 = vmul.f32 %v8763_v17, %v403_v27  ;;  %v10245_v24 = vmax.f32 %v8738_v53, %v8820_v21  ;;  %v5242_v39 = vadd.f32 %v8779_v30, %v8774_v9  ;;  %v9161_v34 = vadd.f32 %v5239_v8, %v10246_v26  ;;  %v10251_v30 = vld [vmem:[#allocation46_spill] sm:$0xff]  ;;  %v10256_v26 = vld [vmem:[#allocation40_spill] sm:$0xff]  ;;  %v10258_v36 = vld [vmem:[#allocation43_spill] sm:$0xff] }
 0x45f   : > { %v9158_v10 = vadd.f32 %v5166_v20, %v8678_v25  ;;  %v5525_v6 = vor.u32 %v5524_v37, %v5523_v47  ;;  %vm9165_vm4 = vcmp.lt.f32.partialorder %v5519_v43, 8388608.0  ;;  %v5507_v21 = vand.u32 2147483647, %v5506_v61 }
 0x460   : > { %v401_v51 = vmin.f32 %v8751_v57, %v10245_v24  ;;  %10247 = vst [vmem:[#allocation39_spill] sm:$0xff] %v9161_v34  ;;  %v9163_v35 = vpop.f32.mrf.mxu0  ;;  %v5168_v23 = vpop.f32.mrf.mxu1  ;;  %v5508_v29 = vand.u32 2147483648, %v9069_v1  ;;  %v5530_v27 = vcvt.s32.f32 %v5529_v31  ;;  %v9171_v9 = vmul.f32 %v5502_v18, %v8957_v60 }
 0x461   : > { %v5169_v24 = vadd.f32 %v5168_v23, %v5167_v42  ;;  %v5514_v25 = vcvt.s32.f32 %v5513_v0  ;;  %v10252_v8 = vmax.f32 %v8738_v53, %v10251_v30  ;;  %v5486_v61 = vsel %vm9132_vm3, %v5485_v56, %v9010_v52  ;;  %v10255_v42 = vld [vmem:[#allocation29_spill] sm:$0xff] }
 0x462   : > { %10250 = vst [vmem:[#allocation81_spill] sm:$0xff] %v9171_v9  ;;  %v9177_v37 = vpop.f32.mrf.mxu0  ;;  %v5170_v43 = vpop.f32.mrf.mxu1  ;;  %vm9182_vm5 = vcmp.lt.f32.partialorder %v5503_v33, 8388608.0  ;;  %v5553_v31 = vcvt.f32.s32 %v9149_v50  ;;  %v9188_v0 = vmul.f32 %v8763_v17, %v401_v51  ;;  %v9194_v23 = vadd.f32 %v5242_v39, %v10256_v26 }
 0x463   : > { %v404_v47 = vmin.f32 %v8751_v57, %v10252_v8  ;;  %v9191_v18 = vadd.f32 %v5169_v24, %v10255_v42  ;;  %v5526_v13 = vsel %vm9165_vm4, %v5525_v6, %v9021_v14  ;;  %v5527_v52 = vand.u32 2147483647, %v9105_v63  ;;  %v10259_v14 = vld [vmem:[#allocation45_spill] sm:$0xff] }
 0x464   : > { %10257 = vst [vmem:[#allocation46_spill] sm:$0xff] %v9194_v23  ;;  %v9200_v33 = vpop.f32.mrf.mxu0  ;;  %v5171_v56 = vpop.f32.mrf.mxu1  ;;  %v5509_v30 = vor.u32 %v5508_v29, %v5507_v21  ;;  %v5531_v8 = vand.u32 2147483647, %v5530_v27  ;;  %v5532_v51 = vand.u32 2147483648, %v9105_v63  ;;  %v5511_v9 = vand.u32 2147483647, %v9115_v58 }
 0x465   : > { %v5172_v24 = vadd.f32 %v5171_v56, %v5170_v43  ;;  %v5515_v42 = vand.u32 2147483647, %v5514_v25  ;;  %v5516_v39 = vand.u32 2147483648, %v9115_v58  ;;  %v9206_v26 = vmul.f32 %v8763_v17, %v404_v47  ;;  %v10261_v23 = vld [vmem:[#allocation31_spill] sm:$0xff]  ;;  %v10266_v56 = vld [vmem:[#allocation44_spill] sm:$0xff] }
 0x466   : > { %v5245_v6 = vadd.f32 %v10259_v14, %v10258_v36  ;;  %v9210_v22 = vpop.f32.mrf.mxu0  ;;  %v5173_v32 = vpop.f32.mrf.mxu1  ;;  %v9213_v21 = vmul.f32 %v5486_v61, %v8957_v60  ;;  %v5554_v29 = vcvt.s32.f32 %v5553_v31  ;;  %v5537_v27 = vcvt.f32.s32 %v9188_v0  ;;  %v10268_v61 = vld [vmem:[#allocation50_spill] sm:$0xff] }
 0x467   : > { %v9217_v43 = vadd.f32 %v5172_v24, %v10261_v23  ;;  %v9220_v25 = vmul.f32 %v5526_v13, %v8957_v60  ;;  %vm9222_vm6 = vcmp.lt.f32.partialorder %v5527_v52, 8388608.0  ;;  %v10267_v36 = vmax.f32 %v8738_v53, %v10266_v56 }
 0x468   : > { %10260 = vst [vmem:[#allocation29_spill] sm:$0xff] %v9213_v21  ;;  %v10269_v21 = vld [vmem:[#allocation55_spill] sm:$0xff]  ;;  %v9232_v12 = vpop.f32.mrf.mxu0  ;;  %v5174_v28 = vpop.f32.mrf.mxu1  ;;  %v5510_v23 = vsel %vm9182_vm5, %v5509_v30, %v9069_v1  ;;  %v5533_v13 = vor.u32 %v5532_v51, %v5531_v8  ;;  %v5551_v52 = vand.u32 2147483647, %v9149_v50  ;;  %vm9238_vm7 = vcmp.lt.f32.partialorder %v5511_v9, 8388608.0  ;;  %v10274_v30 = vld [vmem:[#allocation32_spill] sm:$0xff] }
 0x469   : > { %10262 = vst [vmem:[#allocation40_spill] sm:$0xff] %v9217_v43  ;;  %10263 = vst [vmem:[#allocation43_spill] sm:$0xff] %v9220_v25  ;;  %v402_v14 = vmin.f32 %v8751_v57, %v10267_v36  ;;  %v5248_v31 = vadd.f32 %v10269_v21, %v10268_v61  ;;  %v5175_v24 = vadd.f32 %v5174_v28, %v5173_v32  ;;  %v5561_v36 = vcvt.f32.s32 %v9206_v26  ;;  %v10273_v21 = vld [vmem:[#allocation64_spill] sm:$0xff]  ;;  %v10277_v32 = vld [vmem:[#allocation41_spill] sm:$0xff] }
 0x46a   : > { %v5517_v56 = vor.u32 %v5516_v39, %v5515_v42  ;;  %v5251_v61 = vadd.f32 %v10273_v21, %v10272_v54  ;;  %v9245_v43 = vpop.f32.mrf.mxu0  ;;  %v5176_v34 = vpop.f32.mrf.mxu1  ;;  %v5555_v48 = vand.u32 2147483647, %v5554_v29  ;;  %v5556_v1 = vand.u32 2147483648, %v9149_v50  ;;  %v10279_v39 = vld [vmem:[#allocation42_spill] sm:$0xff] }
 0x46b   : > { %v5538_v20 = vcvt.s32.f32 %v5537_v27  ;;  %v9249_v8 = vadd.f32 %v5175_v24, %v10274_v30  ;;  %v9252_v28 = vmul.f32 %v5510_v23, %v8957_v60  ;;  %v9255_v9 = vadd.f32 %v5245_v6, %v10277_v32  ;;  %v10283_v23 = vld [vmem:[#allocation51_spill] sm:$0xff]  ;;  %v10311_v27 = vld [vmem:[#allocation66_spill] sm:$0xff] }
 0x46c   : > { %v9258_v51 = vmul.f32 %v8763_v17, %v402_v14  ;;  %v5177_v54 = vpop.f32.mrf.mxu1  ;;  %v5534_v42 = vsel %vm9222_vm6, %v5533_v13, %v9105_v63  ;;  %v9264_v29 = vadd.f32 %v5248_v31, %v10279_v39  ;;  %vm9266_vm8 = vcmp.lt.f32.partialorder %v5551_v52, 8388608.0  ;;  %v9274_v21 = vpop.f32.mrf.mxu0  ;;  %v10285_v31 = vld [vmem:[#allocation48_spill] sm:$0xff]  ;;  %v10287_v32 = vld [vmem:[#allocation47_spill] sm:$0xff] }
 0x46d   : > { %10275 = vst [vmem:[#allocation45_spill] sm:$0xff] %v9249_v8  ;;  %10276 = vst [vmem:[#allocation31_spill] sm:$0xff] %v9252_v28  ;;  %v10284_v24 = vmax.f32 %v8738_v53, %v10283_v23  ;;  %v5178_v14 = vadd.f32 %v5177_v54, %v5176_v34  ;;  %v5518_v47 = vsel %vm9238_vm7, %v5517_v56, %v9115_v58  ;;  %v5562_v63 = vcvt.s32.f32 %v5561_v36  ;;  %v10289_v34 = vld [vmem:[#allocation69_spill] sm:$0xff] }
 0x46e   : > { %10278 = vst [vmem:[#allocation44_spill] sm:$0xff] %v9255_v9  ;;  %10280 = vst [vmem:[#allocation50_spill] sm:$0xff] %v9264_v29  ;;  %v10286_v13 = vmax.f32 %v8738_v53, %v10285_v31  ;;  %v5179_v30 = vpop.f32.mrf.mxu1  ;;  %v9284_v39 = vadd.f32 %v5251_v61, %v10287_v32  ;;  %v5557_v23 = vor.u32 %v5556_v1, %v5555_v48  ;;  %v5539_v28 = vand.u32 2147483647, %v5538_v20  ;;  %v10288_v29 = vld [vmem:[#allocation67_spill] sm:$0xff]  ;;  %v10290_v9 = vld [vmem:[#allocation26_spill] sm:$0xff]  ;;  %v9304_v20 = vpop.f32.mrf.mxu0 }
 0x46f   : > { %v407_v6 = vmin.f32 %v8751_v57, %v10284_v24  ;;  %v5540_v24 = vand.u32 2147483648, %v9188_v0  ;;  %v5254_v54 = vadd.f32 %v10289_v34, %v10288_v29  ;;  %v9290_v25 = vadd.f32 %v5178_v14, %v10290_v9  ;;  %v10294_v34 = vld [vmem:[#allocation52_spill] sm:$0xff] }
 0x470   : > { %v405_v52 = vmin.f32 %v8751_v57, %v10286_v13  ;;  %v5535_v58 = vand.u32 2147483647, %v9188_v0  ;;  %v5545_v56 = vcvt.f32.s32 %v9258_v51  ;;  %v5180_v36 = vpop.f32.mrf.mxu1  ;;  %v9295_v31 = vmul.f32 %v5534_v42, %v8957_v60 }
 0x471   : > { %10291 = vst [vmem:[#allocation55_spill] sm:$0xff] %v9290_v25  ;;  %v9298_v61 = vmul.f32 %v5518_v47, %v8957_v60  ;;  %v5559_v48 = vand.u32 2147483647, %v9206_v26  ;;  %v9302_v1 = vmul.f32 %v8763_v17, %v407_v6  ;;  %v5181_v9 = vadd.f32 %v5180_v36, %v5179_v30  ;;  %v10298_v36 = vld [vmem:[#allocation33_spill] sm:$0xff] }
 0x472   : > { %10292 = vst [vmem:[#allocation59_spill] sm:$0xff] %v9295_v31  ;;  %v5563_v29 = vand.u32 2147483647, %v5562_v63  ;;  %v5564_v14 = vand.u32 2147483648, %v9206_v26  ;;  %v9308_v13 = vmul.f32 %v8763_v17, %v405_v52  ;;  %v5182_v32 = vpop.f32.mrf.mxu1  ;;  %v5558_v42 = vsel %vm9266_vm8, %v5557_v23, %v9149_v50  ;;  %v10296_v31 = vld [vmem:[#allocation49_spill] sm:$0xff]  ;;  %v10300_v52 = vld [vmem:[#allocation56_spill] sm:$0xff] }
 0x473   : > { %10293 = vst [vmem:[#allocation64_spill] sm:$0xff] %v9298_v61  ;;  %v5541_v47 = vor.u32 %v5540_v24, %v5539_v28  ;;  %v10295_v61 = vmax.f32 %v8738_v53, %v10294_v34  ;;  %v10297_v30 = vmax.f32 %v8738_v53, %v10296_v31  ;;  %v9322_v25 = vadd.f32 %v5181_v9, %v10298_v36  ;;  %v10303_v28 = vld [vmem:[#allocation73_spill] sm:$0xff]  ;;  %v9339_v34 = vpop.f32.mrf.mxu0 }
 0x474   : > { %v9325_v8 = vadd.f32 %v5254_v54, %v10300_v52  ;;  %vm9327_vm9 = vcmp.lt.f32.partialorder %v5535_v58, 8388608.0  ;;  %v5546_v50 = vcvt.s32.f32 %v5545_v56  ;;  %v5257_v23 = vadd.f32 %v8969_v16, %v10303_v28  ;;  %v5183_v24 = vpop.f32.mrf.mxu1 }
 0x475   : > { %v408_v6 = vmin.f32 %v8751_v57, %v10295_v61  ;;  %v406_v63 = vmin.f32 %v8751_v57, %v10297_v30  ;;  %10299 = vst [vmem:[#allocation32_spill] sm:$0xff] %v9322_v25  ;;  %vm9333_vm10 = vcmp.lt.f32.partialorder %v5559_v48, 8388608.0  ;;  %v5543_v31 = vand.u32 2147483647, %v9258_v51 }
 0x476   : > { %v5585_v9 = vcvt.f32.s32 %v9302_v1  ;;  %v5184_v54 = vadd.f32 %v5183_v24, %v5182_v32  ;;  %v9342_v58 = vmul.f32 %v5558_v42, %v8957_v60  ;;  %v5565_v30 = vor.u32 %v5564_v14, %v5563_v29  ;;  %v5185_v48 = vpop.f32.mrf.mxu1  ;;  %v10307_v32 = vld [vmem:[#allocation28_spill] sm:$0xff]  ;;  %v10309_v24 = vld [vmem:[#allocation57_spill] sm:$0xff] }
 0x477   : > { %v5569_v56 = vcvt.f32.s32 %v9308_v13  ;;  %v5260_v16 = vadd.f32 %v9005_v46, %v8995_v4  ;;  %v5542_v36 = vsel %vm9327_vm9, %v5541_v47, %v9188_v0  ;;  %v9351_v52 = vmul.f32 %v8763_v17, %v408_v6 }
 0x478   : > { %10306 = vst [vmem:[#allocation41_spill] sm:$0xff] %v9342_v58  ;;  %v9354_v28 = vmul.f32 %v8763_v17, %v406_v63  ;;  %v9357_v42 = vadd.f32 %v5184_v54, %v10307_v32  ;;  %v5547_v29 = vand.u32 2147483647, %v5546_v50  ;;  %v5548_v14 = vand.u32 2147483648, %v9258_v51  ;;  %v5186_v58 = vpop.f32.mrf.mxu1  ;;  %v10315_v63 = vld [vmem:[#allocation53_spill] sm:$0xff]  ;;  %v9375_v32 = vpop.f32.mrf.mxu0 }
 0x479   : > { %v10310_v4 = vmax.f32 %v8738_v53, %v10309_v24  ;;  %v9365_v0 = vadd.f32 %v5257_v23, %v10311_v27  ;;  %vm9367_vm11 = vcmp.lt.f32.partialorder %v5543_v31, 8388608.0  ;;  %v5586_v6 = vcvt.s32.f32 %v5585_v9  ;;  %v10318_v27 = vld [vmem:[#allocation72_spill] sm:$0xff] }
 0x47a   : > { %10308 = vst [vmem:[#allocation42_spill] sm:$0xff] %v9357_v42  ;;  %v10316_v54 = vmax.f32 %v8738_v53, %v10315_v63  ;;  %v5187_v42 = vadd.f32 %v5186_v58, %v5185_v48  ;;  %v9378_v24 = vmul.f32 %v5542_v36, %v8957_v60  ;;  %v5566_v23 = vsel %vm9333_vm10, %v5565_v30, %v9206_v26  ;;  %v10320_v48 = vld [vmem:[#allocation30_spill] sm:$0xff] }
 0x47b   : > { %v411_v46 = vmin.f32 %v8751_v57, %v10310_v4  ;;  %10312 = vst [vmem:[#allocation51_spill] sm:$0xff] %v9365_v0  ;;  %v5570_v31 = vcvt.s32.f32 %v5569_v56  ;;  %v5188_v4 = vpop.f32.mrf.mxu1  ;;  %v9384_v25 = vadd.f32 %v5260_v16, %v10318_v27  ;;  %v5583_v9 = vand.u32 2147483647, %v9302_v1  ;;  %v10322_v27 = vld [vmem:[#allocation58_spill] sm:$0xff] }
 0x47c   : > { %v409_v50 = vmin.f32 %v8751_v57, %v10316_v54  ;;  %10317 = vst [vmem:[#allocation48_spill] sm:$0xff] %v9378_v24  ;;  %v5593_v63 = vcvt.f32.s32 %v9351_v52  ;;  %v5577_v54 = vcvt.f32.s32 %v9354_v28  ;;  %v5263_v58 = vadd.f32 %v9044_v7, %v9025_v55  ;;  %v9405_v55 = vpop.f32.mrf.mxu0 }
 0x47d   : > { %10319 = vst [vmem:[#allocation47_spill] sm:$0xff] %v9384_v25  ;;  %v9392_v36 = vadd.f32 %v5187_v42, %v10320_v48  ;;  %v5549_v24 = vor.u32 %v5548_v14, %v5547_v29  ;;  %v9395_v26 = vmul.f32 %v8763_v17, %v411_v46  ;;  %v5189_v61 = vpop.f32.mrf.mxu1  ;;  %v5587_v30 = vand.u32 2147483647, %v5586_v6 }
 0x47e   : > { %v5588_v56 = vand.u32 2147483648, %v9302_v1  ;;  %v9399_v16 = vmul.f32 %v8763_v17, %v409_v50  ;;  %v10323_v25 = vmax.f32 %v8738_v53, %v10322_v27  ;;  %v5190_v7 = vadd.f32 %v5189_v61, %v5188_v4 }
 0x47f   : > { %10321 = vst [vmem:[#allocation67_spill] sm:$0xff] %v9392_v36  ;;  %v9408_v42 = vmul.f32 %v5566_v23, %v8957_v60  ;;  %v5571_v29 = vand.u32 2147483647, %v5570_v31  ;;  %v5572_v14 = vand.u32 2147483648, %v9308_v13  ;;  %v5191_v46 = vpop.f32.mrf.mxu1  ;;  %vm9411_vm1 = vcmp.lt.f32.partialorder %v5583_v9, 8388608.0  ;;  %v10327_v36 = vld [vmem:[#allocation25_spill] sm:$0xff] }
 0x480   : > { %v412_v0 = vmin.f32 %v8751_v57, %v10323_v25  ;;  %v5567_v50 = vand.u32 2147483647, %v9308_v13  ;;  %v5594_v48 = vcvt.s32.f32 %v5593_v63  ;;  %v5578_v27 = vcvt.s32.f32 %v5577_v54 }
 0x481   : > { %10324 = vst [vmem:[#allocation69_spill] sm:$0xff] %v9408_v42  ;;  %v9417_v25 = vadd.f32 %v5190_v7, %v10327_v36  ;;  %v9420_v4 = vadd.f32 %v5263_v58, %v8983_v15  ;;  %v5550_v23 = vsel %vm9367_vm11, %v5549_v24, %v9258_v51  ;;  %v5617_v31 = vcvt.f32.s32 %v9395_v26  ;;  %v5192_v61 = vpop.f32.mrf.mxu1  ;;  %v9432_v36 = vpop.f32.mrf.mxu0 }
 0x482   : > { %v5266_v9 = vadd.f32 %v9083_v62, %v9060_v2  ;;  %v5589_v42 = vor.u32 %v5588_v56, %v5587_v30  ;;  %v5601_v63 = vcvt.f32.s32 %v9399_v16  ;;  %v9430_v54 = vmul.f32 %v8763_v17, %v412_v0  ;;  %v10330_v62 = vld [vmem:[#allocation54_spill] sm:$0xff]  ;;  %v10332_v0 = vld [vmem:[#allocation27_spill] sm:$0xff] }
 0x483   : > { %10328 = vst [vmem:[#allocation26_spill] sm:$0xff] %v9417_v25  ;;  %10329 = vst [vmem:[#allocation52_spill] sm:$0xff] %v9420_v4  ;;  %v5193_v15 = vadd.f32 %v5192_v61, %v5191_v46  ;;  %v5573_v58 = vor.u32 %v5572_v14, %v5571_v29  ;;  %v5591_v7 = vand.u32 2147483647, %v9351_v52  ;;  %v5596_v51 = vand.u32 2147483648, %v9351_v52  ;;  %v5194_v47 = vpop.f32.mrf.mxu1 }
 0x484   : > { %v5595_v24 = vand.u32 2147483647, %v5594_v48  ;;  %v5579_v25 = vand.u32 2147483647, %v5578_v27  ;;  %v5580_v2 = vand.u32 2147483648, %v9354_v28  ;;  %v10331_v30 = vmax.f32 %v8738_v53, %v10330_v62 }
 0x485   : > { %v9442_v4 = vadd.f32 %v5193_v15, %v10332_v0  ;;  %v9445_v46 = vmul.f32 %v5550_v23, %v8957_v60  ;;  %vm9447_vm2 = vcmp.lt.f32.partialorder %v5567_v50, 8388608.0  ;;  %v5618_v14 = vcvt.s32.f32 %v5617_v31  ;;  %v5195_v48 = vpop.f32.mrf.mxu1  ;;  %v9458_v0 = vpop.f32.mrf.mxu0 }
 0x486   : > { %v410_v56 = vmin.f32 %v8751_v57, %v10331_v30  ;;  %v9452_v27 = vadd.f32 %v5266_v9, %v9013_v5  ;;  %v5575_v61 = vand.u32 2147483647, %v9354_v28  ;;  %v5602_v62 = vcvt.s32.f32 %v5601_v63 }
 0x487   : > { %10333 = vst [vmem:[#allocation49_spill] sm:$0xff] %v9442_v4  ;;  %v5625_v30 = vcvt.f32.s32 %v9430_v54  ;;  %v5269_v15 = vadd.f32 %v9117_v41, %v9100_v49  ;;  %v5196_v23 = vadd.f32 %v5195_v48, %v5194_v47  ;;  %v5590_v50 = vsel %vm9411_vm1, %v5589_v42, %v9302_v1  ;;  %v9467_v5 = vpop.f32.mrf.mxu1  ;;  %v10338_v41 = vld [vmem:[#allocation34_spill] sm:$0xff]  ;;  %v9541_v48 = vld [vmem:[%s10018_s4 + $0x2] ss:$0 sm:$0xff] }
 0x488   : > { %vm9463_vm12 = vcmp.lt.f32.partialorder %v5591_v7, 8388608.0  ;;  %v5574_v9 = vsel %vm9447_vm2, %v5573_v58, %v9308_v13  ;;  %v5597_v63 = vor.u32 %v5596_v51, %v5595_v24  ;;  %v5581_v4 = vor.u32 %v5580_v2, %v5579_v25  ;;  %v9489_v24 = vpop.f32.mrf.mxu0 }
 0x489   : > { %v9473_v49 = vmul.f32 %v8763_v17, %v410_v56  ;;  %v9476_v47 = vadd.f32 %v5196_v23, %v10338_v41  ;;  %v5615_v1 = vand.u32 2147483647, %v9395_v26  ;;  %v5619_v42 = vand.u32 2147483647, %v5618_v14  ;;  %v9480_v7 = vpop.f32.mrf.mxu1 }
 0x48a   : > { %v5620_v6 = vand.u32 2147483648, %v9395_v26  ;;  %vm9482_vm13 = vcmp.lt.f32.partialorder %v5575_v61, 8388608.0  ;;  %v5603_v13 = vand.u32 2147483647, %v5602_v62  ;;  %v5604_v25 = vand.u32 2147483648, %v9399_v16 }
 0x48b   : > { %10339 = vst [vmem:[#allocation33_spill] sm:$0xff] %v9476_v47  ;;  %v5626_v58 = vcvt.s32.f32 %v5625_v30  ;;  %v5272_v51 = vadd.f32 %v9143_v19, %v9130_v3  ;;  %v9492_v2 = vmul.f32 %v5590_v50, %v8957_v60  ;;  %v9495_v56 = vmul.f32 %v5574_v9, %v8957_v60  ;;  %v9500_v61 = vpop.f32.mrf.mxu1 }
 0x48c   : > { %v5599_v29 = vand.u32 2147483647, %v9399_v16  ;;  %v5275_v14 = vadd.f32 %v9177_v37, %v9163_v35  ;;  %v9503_v62 = vadd.f32 %v5269_v15, %v9053_v38  ;;  %v5598_v3 = vsel %vm9463_vm12, %v5597_v63, %v9351_v52  ;;  %v10344_v52 = vld [vmem:[#allocation62_spill] sm:$0xff] }
 0x48d   : > { %v5609_v19 = vcvt.f32.s32 %v9473_v49  ;;  %v5582_v30 = vsel %vm9482_vm13, %v5581_v4, %v9354_v28  ;;  %vm9512_vm14 = vcmp.lt.f32.partialorder %v5615_v1, 8388608.0  ;;  %v5621_v35 = vor.u32 %v5620_v6, %v5619_v42  ;;  %v9517_v50 = vpop.f32.mrf.mxu1  ;;  %v9526_v4 = vpop.f32.mrf.mxu0 }
 0x48e   : > { %v5623_v37 = vand.u32 2147483647, %v9430_v54  ;;  %v5605_v38 = vor.u32 %v5604_v25, %v5603_v13  ;;  %v5627_v15 = vand.u32 2147483647, %v5626_v58  ;;  %v5628_v31 = vand.u32 2147483648, %v9430_v54  ;;  %v10348_v25 = vld [vmem:[#allocation60_spill] sm:$0xff] }
 0x48f   : > { %v10345_v9 = vmax.f32 %v8738_v53, %v10344_v52  ;;  %v5278_v28 = vadd.f32 %v9210_v22, %v9200_v33  ;;  %v9529_v41 = vmul.f32 %v5598_v3, %v8957_v60  ;;  %v9532_v1 = vadd.f32 %v5272_v51, %v9090_v44  ;;  %v5409_v6 = vpop.f32.mrf.mxu1  ;;  %v9575_v23 = vpop.f32.mrf.mxu0 }
 0x490   : > { %vm9534_vm15 = vcmp.lt.f32.partialorder %v5599_v29, 8388608.0  ;;  %v9544_v22 = vadd.f32 %v5275_v14, %v9127_v40  ;;  %v5607_v33 = vand.u32 2147483647, %v9473_v49  ;;  %v5610_v13 = vcvt.s32.f32 %v5609_v19  ;;  %v9567_v19 = vld [vmem:[%s10018_s4 + $0x3] ss:$0 sm:$0xff] }
 0x491   : > { %v415_v63 = vmin.f32 %v8751_v57, %v10345_v9  ;;  %v10349_v44 = vmax.f32 %v8738_v53, %v10348_v25  ;;  %v4263_v51 = vadd.f32 %v5409_v6, %v9035_v45  ;;  %v9553_v29 = vmul.f32 %v5582_v30, %v8957_v60  ;;  %v4254_v45 = vpop.f32.mrf.mxu1 }
 0x492   : > { %v5622_v3 = vsel %vm9512_vm14, %v5621_v35, %v9395_v26  ;;  %vm9558_vm0 = vcmp.lt.f32.partialorder %v5623_v37, 8388608.0  ;;  %v5281_v14 = vadd.f32 %v9245_v43, %v9232_v12  ;;  %v5606_v30 = vsel %vm9534_vm15, %v5605_v38, %v9399_v16  ;;  %v10352_v37 = vld [vmem:[#allocation37_spill] sm:$0xff] }
 0x493   : > { %v413_v58 = vmin.f32 %v8751_v57, %v10349_v44  ;;  %v5629_v52 = vor.u32 %v5628_v31, %v5627_v15  ;;  %v9573_v26 = vmul.f32 %v8763_v17, %v415_v63  ;;  %v4388_v35 = vmul.f32 %v9541_v48, %v4263_v51  ;;  %v5410_v6 = vpop.f32.mrf.mxu1  ;;  %v9608_v51 = vpop.f32.mrf.mxu0 }
 0x494   : > { %v4255_v12 = vadd.f32 %v4254_v45, %v10352_v37  ;;  %v9580_v43 = vadd.f32 %v5278_v28, %v9158_v10  ;;  %v5612_v9 = vand.u32 2147483648, %v9473_v49  ;;  %v9584_v25 = vmul.f32 %v5622_v3, %v8957_v60 }
 0x495   : > { %vm9586_vm3 = vcmp.lt.f32.partialorder %v5607_v33, 8388608.0  ;;  %v5611_v38 = vand.u32 2147483647, %v5610_v13  ;;  %v9591_v15 = vmul.f32 %v8763_v17, %v413_v58  ;;  %v4425_v31 = vadd.f32 %v9567_v19, %v4388_v35  ;;  %v4257_v33 = vpop.f32.mrf.mxu1 }
 0x496   : > { %v4386_v63 = vmul.f32 %v9541_v48, %v4255_v12  ;;  %v4266_v10 = vadd.f32 %v5410_v6, %v9063_v59  ;;  %v9597_v28 = vmul.f32 %v5606_v30, %v8957_v60  ;;  %v5284_v42 = vadd.f32 %v9304_v20, %v9274_v21  ;;  %v10355_v30 = vld [vmem:[#allocation38_spill] sm:$0xff] }
 0x497   : > { %v9602_v44 = vadd.f32 %v5281_v14, %v9191_v18  ;;  %v5630_v13 = vsel %vm9558_vm0, %v5629_v52, %v9430_v54  ;;  %v5649_v58 = vcvt.f32.s32 %v9573_v26  ;;  %v4457_v59 = vadd.f32 %v4425_v31, %v8986_v11  ;;  %v5413_v20 = vpop.f32.mrf.mxu1  ;;  %v10356_v54 = vld [vmem:[#allocation63_spill] sm:$0xff]  ;;  %v10358_v11 = vld [vmem:[#allocation74_spill] sm:$0xff] }
 0x498   : > { %v4423_v3 = vadd.f32 %v9567_v19, %v4386_v63  ;;  %v4389_v45 = vmul.f32 %v9541_v48, %v4266_v10  ;;  %v4258_v21 = vadd.f32 %v4257_v33, %v10355_v30  ;;  %v5613_v18 = vor.u32 %v5612_v9, %v5611_v38  ;;  %v10359_v9 = vld [vmem:[#allocation39_spill] sm:$0xff]  ;;  %v10360_v10 = vld [vmem:[#allocation40_spill] sm:$0xff] }
 0x499   : > { %v5647_v14 = vand.u32 2147483647, %v9573_v26  ;;  %v5633_v40 = vcvt.f32.s32 %v9591_v15  ;;  %v10357_v52 = vmax.f32 %v8738_v53, %v10356_v54  ;;  %4489 = vst [vmem:[%s6576_s25 + $0x10] sm:$0xff] %v4457_v59  ;;  %v9625_v31 = vmul.f32 %v5630_v13, %v8957_v60  ;;  %v4270_v63 = vpop.f32.mrf.mxu1  ;;  %v9632_v59 = vpop.f32.mrf.mxu0 }
 0x49a   : > { %v4455_v37 = vadd.f32 %v4423_v3, %v10358_v11  ;;  %v4426_v12 = vadd.f32 %v9567_v19, %v4389_v45  ;;  %v4387_v6 = vmul.f32 %v9541_v48, %v4258_v21  ;;  %v4279_v38 = vadd.f32 %v5413_v20, %v10359_v9  ;;  %v10361_v3 = vld [vmem:[#allocation75_spill] sm:$0xff] }
 0x49b   : > { %v416_v35 = vmin.f32 %v8751_v57, %v10357_v52  ;;  %v9629_v33 = vadd.f32 %v5284_v42, %v10360_v10  ;;  %v5650_v30 = vcvt.s32.f32 %v5649_v58  ;;  %v5652_v54 = vand.u32 2147483648, %v9573_v26  ;;  %v10362_v52 = vld [vmem:[#allocation78_spill] sm:$0xff]  ;;  %v5414_v9 = vpop.f32.mrf.mxu1 }
 0x49c   : > { %4487 = vst [vmem:[%s6576_s25] sm:$0xff] %v4455_v37  ;;  %v4458_v45 = vadd.f32 %v4426_v12, %v10361_v3  ;;  %v4424_v21 = vadd.f32 %v9567_v19, %v4387_v6  ;;  %v4271_v13 = vadd.f32 %v4270_v63, %v10362_v52  ;;  %v5631_v11 = vand.u32 2147483647, %v9591_v15  ;;  %v10365_v12 = vld [vmem:[#allocation76_spill] sm:$0xff]  ;;  %v10366_v10 = vld [vmem:[#allocation46_spill] sm:$0xff] }
 0x49d   : > { %v4392_v20 = vmul.f32 %v9541_v48, %v4279_v38  ;;  %v5614_v42 = vsel %vm9586_vm3, %v5613_v18, %v9473_v49  ;;  %vm9643_vm4 = vcmp.lt.f32.partialorder %v5647_v14, 8388608.0  ;;  %v5634_v37 = vcvt.s32.f32 %v5633_v40  ;;  %v4273_v49 = vpop.f32.mrf.mxu1  ;;  %v9658_v40 = vpop.f32.mrf.mxu0  ;;  %v10384_v58 = vld [vmem:[#allocation50_spill] sm:$0xff] }
 0x49e   : > { %4490 = vst [vmem:[%s6576_s25 + $0x18] sm:$0xff] %v4458_v45  ;;  %v4456_v6 = vadd.f32 %v4424_v21, %v10365_v12  ;;  %v4390_v63 = vmul.f32 %v9541_v48, %v4271_v13  ;;  %v4282_v3 = vadd.f32 %v5414_v9, %v10366_v10  ;;  %v5636_v38 = vand.u32 2147483648, %v9591_v15  ;;  %v10367_v13 = vld [vmem:[#allocation80_spill] sm:$0xff] }
 0x49f   : > { %v5287_v52 = vadd.f32 %v9375_v32, %v9339_v34  ;;  %v4429_v16 = vadd.f32 %v9567_v19, %v4392_v20  ;;  %v5651_v18 = vand.u32 2147483647, %v5650_v30  ;;  %v9656_v14 = vmul.f32 %v8763_v17, %v416_v35  ;;  %v10369_v34 = vld [vmem:[#allocation77_spill] sm:$0xff]  ;;  %v5417_v30 = vpop.f32.mrf.mxu1 }
 0x4a0   : > { %4488 = vst [vmem:[%s6576_s25 + $0x8] sm:$0xff] %v4456_v6  ;;  %v4427_v45 = vadd.f32 %v9567_v19, %v4390_v63  ;;  %v4393_v21 = vmul.f32 %v9541_v48, %v4282_v3  ;;  %v4274_v9 = vadd.f32 %v4273_v49, %v10367_v13  ;;  %v9665_v12 = vmul.f32 %v5614_v42, %v8957_v60  ;;  %v10372_v6 = vld [vmem:[#allocation61_spill] sm:$0xff]  ;;  %v10374_v3 = vld [vmem:[#allocation79_spill] sm:$0xff] }
 0x4a1   : > { %v4461_v32 = vadd.f32 %v4429_v16, %v10369_v34  ;;  %vm9668_vm5 = vcmp.lt.f32.partialorder %v5631_v11, 8388608.0  ;;  %v5635_v20 = vand.u32 2147483647, %v5634_v37  ;;  %v10373_v10 = vmax.f32 %v8738_v53, %v10372_v6  ;;  %v4286_v13 = vpop.f32.mrf.mxu1  ;;  %v10375_v11 = vld [vmem:[#allocation45_spill] sm:$0xff] }
 0x4a2   : > { %10368 = vst [vmem:[#allocation56_spill] sm:$0xff] %v9665_v12  ;;  %v4459_v47 = vadd.f32 %v4427_v45, %v10374_v3  ;;  %v4430_v49 = vadd.f32 %v9567_v19, %v4393_v21  ;;  %v4391_v42 = vmul.f32 %v9541_v48, %v4274_v9  ;;  %v4295_v16 = vadd.f32 %v5417_v30, %v9284_v39  ;;  %v10376_v45 = vld [vmem:[#allocation81_spill] sm:$0xff] }
 0x4a3   : > { %v414_v63 = vmin.f32 %v8751_v57, %v10373_v10  ;;  %4493 = vst [vmem:[%s6576_s25 + $0x30] sm:$0xff] %v4461_v32  ;;  %v9682_v34 = vadd.f32 %v5287_v52, %v10375_v11  ;;  %v5653_v37 = vor.u32 %v5652_v54, %v5651_v18  ;;  %v5655_v12 = vand.u32 2147483647, %v9656_v14  ;;  %v9686_v10 = vpop.f32.mrf.mxu0  ;;  %v10377_v32 = vld [vmem:[#allocation44_spill] sm:$0xff]  ;;  %v5418_v54 = vpop.f32.mrf.mxu1  ;;  %v10378_v11 = vld [vmem:[#allocation70_spill] sm:$0xff] }
 0x4a4   : > { %v5657_v6 = vcvt.f32.s32 %v9656_v14  ;;  %4491 = vst [vmem:[%s6576_s25 + $0x20] sm:$0xff] %v4459_v47  ;;  %v4462_v21 = vadd.f32 %v4430_v49, %v10376_v45  ;;  %v4428_v9 = vadd.f32 %v9567_v19, %v4391_v42  ;;  %v4396_v39 = vmul.f32 %v9541_v48, %v4295_v16  ;;  %v10380_v42 = vld [vmem:[#allocation29_spill] sm:$0xff] }
 0x4a5   : > { %v4287_v30 = vadd.f32 %v4286_v13, %v10377_v32  ;;  %v5290_v52 = vadd.f32 %v9432_v36, %v9405_v55  ;;  %v5637_v18 = vor.u32 %v5636_v38, %v5635_v20  ;;  %v9696_v3 = vmul.f32 %v8763_v17, %v414_v63  ;;  %v4289_v36 = vpop.f32.mrf.mxu1  ;;  %v10381_v32 = vld [vmem:[#allocation65_spill] sm:$0xff] }
 0x4a6   : > { %v10379_v47 = vmax.f32 %v8738_v53, %v10378_v11  ;;  %4494 = vst [vmem:[%s6576_s25 + $0x38] sm:$0xff] %v4462_v21  ;;  %v4460_v45 = vadd.f32 %v4428_v9, %v10380_v42  ;;  %v4433_v16 = vadd.f32 %v9567_v19, %v4396_v39  ;;  %v4298_v55 = vadd.f32 %v5418_v54, %v9325_v8  ;;  %v9715_v11 = vpop.f32.mrf.mxu0  ;;  %v10383_v39 = vld [vmem:[#allocation43_spill] sm:$0xff] }
 0x4a7   : > { %v4394_v13 = vmul.f32 %v9541_v48, %v4287_v30  ;;  %v5654_v38 = vsel %vm9643_vm4, %v5653_v37, %v9573_v26  ;;  %v5658_v20 = vcvt.s32.f32 %v5657_v6  ;;  %v5660_v63 = vand.u32 2147483648, %v9656_v14  ;;  %v5421_v6 = vpop.f32.mrf.mxu1 }
 0x4a8   : > { %v419_v49 = vmin.f32 %v8751_v57, %v10379_v47  ;;  %v10382_v21 = vmax.f32 %v8738_v53, %v10381_v32  ;;  %4492 = vst [vmem:[%s6576_s25 + $0x28] sm:$0xff] %v4460_v45  ;;  %v4465_v30 = vadd.f32 %v4433_v16, %v10383_v39  ;;  %v4397_v54 = vmul.f32 %v9541_v48, %v4298_v55  ;;  %v10387_v47 = vld [vmem:[#allocation55_spill] sm:$0xff] }
 0x4a9   : > { %v4431_v8 = vadd.f32 %v9567_v19, %v4394_v13  ;;  %v4290_v26 = vadd.f32 %v4289_v36, %v10384_v58  ;;  %vm9722_vm6 = vcmp.lt.f32.partialorder %v5655_v12, 8388608.0  ;;  %v9727_v42 = vadd.f32 %v5290_v52, %v10387_v47  ;;  %v10388_v55 = vld [vmem:[#allocation31_spill] sm:$0xff]  ;;  %v4302_v35 = vpop.f32.mrf.mxu1 }
 0x4aa   : > { %v417_v9 = vmin.f32 %v8751_v57, %v10382_v21  ;;  %v5638_v45 = vsel %vm9668_vm5, %v5637_v18, %v9591_v15  ;;  %v5641_v16 = vcvt.f32.s32 %v9696_v3  ;;  %v9734_v13 = vmul.f32 %v8763_v17, %v419_v49  ;;  %4497 = vst [vmem:[%s6576_s25 + $0x50] sm:$0xff] %v4465_v30  ;;  %v10389_v21 = vld [vmem:[#allocation52_spill] sm:$0xff]  ;;  %v9747_v30 = vpop.f32.mrf.mxu0 }
 0x4ab   : > { %v4463_v12 = vadd.f32 %v4431_v8, %v10388_v55  ;;  %v4434_v36 = vadd.f32 %v9567_v19, %v4397_v54  ;;  %v4395_v32 = vmul.f32 %v9541_v48, %v4290_v26  ;;  %v4311_v39 = vadd.f32 %v5421_v6, %v10389_v21  ;;  %v10390_v8 = vld [vmem:[#allocation59_spill] sm:$0xff] }
 0x4ac   : > { %v5293_v52 = vadd.f32 %v9489_v24, %v9458_v0  ;;  %v9744_v15 = vmul.f32 %v5654_v38, %v8957_v60  ;;  %v5659_v18 = vand.u32 2147483647, %v5658_v20  ;;  %v5639_v49 = vand.u32 2147483647, %v9696_v3  ;;  %v10391_v6 = vld [vmem:[#allocation51_spill] sm:$0xff]  ;;  %v5422_v0 = vpop.f32.mrf.mxu1 }
 0x4ad   : > { %4495 = vst [vmem:[%s6576_s25 + $0x40] sm:$0xff] %v4463_v12  ;;  %v4466_v54 = vadd.f32 %v4434_v36, %v10390_v8  ;;  %v4432_v58 = vadd.f32 %v9567_v19, %v4395_v32  ;;  %v4400_v26 = vmul.f32 %v9541_v48, %v4311_v39  ;;  %v4303_v47 = vadd.f32 %v4302_v35, %v10391_v6  ;;  %v10393_v12 = vld [vmem:[#allocation64_spill] sm:$0xff] }
 0x4ae   : > { %v9755_v24 = vmul.f32 %v5638_v45, %v8957_v60  ;;  %v5642_v38 = vcvt.s32.f32 %v5641_v16  ;;  %v5644_v20 = vand.u32 2147483648, %v9696_v3  ;;  %v5681_v55 = vcvt.f32.s32 %v9734_v13  ;;  %v4305_v35 = vpop.f32.mrf.mxu1  ;;  %v10394_v8 = vld [vmem:[#allocation32_spill] sm:$0xff] }
 0x4af   : > { %4498 = vst [vmem:[%s6576_s25 + $0x58] sm:$0xff] %v4466_v54  ;;  %v4464_v21 = vadd.f32 %v4432_v58, %v10393_v12  ;;  %v4437_v36 = vadd.f32 %v9567_v19, %v4400_v26  ;;  %v4398_v32 = vmul.f32 %v9541_v48, %v4303_v47  ;;  %v4314_v39 = vadd.f32 %v5422_v0, %v9452_v27  ;;  %v9774_v58 = vpop.f32.mrf.mxu0  ;;  %v10398_v26 = vld [vmem:[#allocation41_spill] sm:$0xff]  ;;  %v10399_v12 = vld [vmem:[#allocation47_spill] sm:$0xff] }
 0x4b0   : > { %10392 = vst [vmem:[#allocation73_spill] sm:$0xff] %v9755_v24  ;;  %v9765_v6 = vadd.f32 %v5293_v52, %v10394_v8  ;;  %v5661_v45 = vor.u32 %v5660_v63, %v5659_v18  ;;  %vm9767_vm7 = vcmp.lt.f32.partialorder %v5639_v49, 8388608.0  ;;  %v9772_v54 = vmul.f32 %v8763_v17, %v417_v9  ;;  %10397 = vst [vmem:[#allocation28_spill] sm:$0xff] %v9774_v58  ;;  %v5425_v8 = vpop.f32.mrf.mxu1  ;;  %v10400_v49 = vld [vmem:[#allocation71_spill] sm:$0xff]  ;;  %v10402_v58 = vld [vmem:[#allocation68_spill] sm:$0xff] }
 0x4b1   : > { %4496 = vst [vmem:[%s6576_s25 + $0x48] sm:$0xff] %v4464_v21  ;;  %v4469_v47 = vadd.f32 %v4437_v36, %v10398_v26  ;;  %v4435_v27 = vadd.f32 %v9567_v19, %v4398_v32  ;;  %v4401_v0 = vmul.f32 %v9541_v48, %v4314_v39  ;;  %v4306_v52 = vadd.f32 %v4305_v35, %v10399_v12  ;;  %v10404_v32 = vld [vmem:[#allocation48_spill] sm:$0xff] }
 0x4b2   : > { %v5643_v63 = vand.u32 2147483647, %v5642_v38  ;;  %v5682_v18 = vcvt.s32.f32 %v5681_v55  ;;  %v10401_v24 = vmax.f32 %v8738_v53, %v10400_v49  ;;  %v10403_v21 = vmax.f32 %v8738_v53, %v10402_v58  ;;  %v4318_v12 = vpop.f32.mrf.mxu1  ;;  %v9801_v58 = vpop.f32.mrf.mxu0 }
 0x4b3   : > { %4501 = vst [vmem:[%s6576_s25 + $0x70] sm:$0xff] %v4469_v47  ;;  %v4467_v26 = vadd.f32 %v4435_v27, %v10404_v32  ;;  %v4438_v39 = vadd.f32 %v9567_v19, %v4401_v0  ;;  %v4399_v35 = vmul.f32 %v9541_v48, %v4306_v52  ;;  %v4327_v38 = vadd.f32 %v5425_v8, %v9544_v22  ;;  %v10405_v47 = vld [vmem:[#allocation69_spill] sm:$0xff] }
 0x4b4   : > { %v420_v9 = vmin.f32 %v8751_v57, %v10401_v24  ;;  %v418_v36 = vmin.f32 %v8751_v57, %v10403_v21  ;;  %v5296_v55 = vadd.f32 %v9575_v23, %v9526_v4  ;;  %v5662_v53 = vsel %vm9722_vm6, %v5661_v45, %v9656_v14  ;;  %v5426_v23 = vpop.f32.mrf.mxu1 }
 0x4b5   : > { %v5679_v57 = vand.u32 2147483647, %v9734_v13  ;;  %v5684_v24 = vand.u32 2147483648, %v9734_v13  ;;  %4499 = vst [vmem:[%s6576_s25 + $0x60] sm:$0xff] %v4467_v26  ;;  %v4470_v27 = vadd.f32 %v4438_v39, %v10405_v47  ;;  %v4436_v22 = vadd.f32 %v9567_v19, %v4399_v35 }
 0x4b6   : > { %v4404_v0 = vmul.f32 %v9541_v48, %v4327_v38  ;;  %v4319_v4 = vadd.f32 %v4318_v12, %v9503_v62  ;;  %v5645_v52 = vor.u32 %v5644_v20, %v5643_v63  ;;  %v5683_v37 = vand.u32 2147483647, %v5682_v18  ;;  %v4321_v26 = vpop.f32.mrf.mxu1  ;;  %v10406_v20 = vld [vmem:[#allocation42_spill] sm:$0xff] }
 0x4b7   : > { %v5665_v14 = vcvt.f32.s32 %v9772_v54  ;;  %v9810_v45 = vmul.f32 %v8763_v17, %v420_v9  ;;  %4502 = vst [vmem:[%s6576_s25 + $0x78] sm:$0xff] %v4470_v27  ;;  %v4468_v8 = vadd.f32 %v4436_v22, %v9445_v46  ;;  %v4330_v32 = vadd.f32 %v5426_v23, %v9580_v43  ;;  %v5309_v9 = vpop.f32.mrf.mxu0 }
 0x4b8   : > { %v4441_v49 = vadd.f32 %v9567_v19, %v4404_v0  ;;  %v4402_v21 = vmul.f32 %v9541_v48, %v4319_v4  ;;  %v9818_v62 = vmul.f32 %v5662_v53, %v8957_v60  ;;  %v9821_v63 = vadd.f32 %v5296_v55, %v10406_v20  ;;  %v5429_v12 = vpop.f32.mrf.mxu1 }
 0x4b9   : > { %vm9823_vm8 = vcmp.lt.f32.partialorder %v5679_v57, 8388608.0  ;;  %v5663_v46 = vand.u32 2147483647, %v9772_v54  ;;  %4500 = vst [vmem:[%s6576_s25 + $0x68] sm:$0xff] %v4468_v8  ;;  %v4405_v35 = vmul.f32 %v9541_v48, %v4330_v32  ;;  %v4322_v38 = vadd.f32 %v4321_v26, %v9532_v1  ;;  %v5310_v23 = vpop.f32.mrf.mxu0 }
 0x4ba   : > { %v4473_v39 = vadd.f32 %v4441_v49, %v9492_v2  ;;  %v4439_v43 = vadd.f32 %v9567_v19, %v4402_v21  ;;  %v5646_v55 = vsel %vm9767_vm7, %v5645_v52, %v9696_v3  ;;  %v5685_v53 = vor.u32 %v5684_v24, %v5683_v37  ;;  %v4334_v16 = vpop.f32.mrf.mxu1 }
 0x4bb   : > { %v5666_v57 = vcvt.s32.f32 %v5665_v14  ;;  %v5689_v47 = vcvt.f32.s32 %v9810_v45  ;;  %v4442_v2 = vadd.f32 %v9567_v19, %v4405_v35  ;;  %v4403_v22 = vmul.f32 %v9541_v48, %v4322_v38 }
 0x4bc   : > { %4505 = vst [vmem:[%s6576_s25 + $0x90] sm:$0xff] %v4473_v39  ;;  %v4471_v27 = vadd.f32 %v4439_v43, %v9495_v56  ;;  %v4343_v0 = vadd.f32 %v5429_v12, %v9682_v34  ;;  %v5299_v1 = vadd.f32 %v9632_v59, %v9608_v51  ;;  %v5668_v3 = vand.u32 2147483648, %v9772_v54  ;;  %v5430_v51 = vpop.f32.mrf.mxu1  ;;  %v5312_v39 = vpop.f32.mrf.mxu0 }
 0x4bd   : > { %v5687_v24 = vand.u32 2147483647, %v9810_v45  ;;  %v9847_v4 = vmul.f32 %v8763_v17, %v418_v36  ;;  %v4474_v56 = vadd.f32 %v4442_v2, %v9529_v41  ;;  %v4440_v52 = vadd.f32 %v9567_v19, %v4403_v22  ;;  %v10414_v22 = vld [vmem:[#allocation26_spill] sm:$0xff] }
 0x4be   : > { %4503 = vst [vmem:[%s6576_s25 + $0x80] sm:$0xff] %v4471_v27  ;;  %v4408_v34 = vmul.f32 %v9541_v48, %v4343_v0  ;;  %v4335_v37 = vadd.f32 %v4334_v16, %v9602_v44  ;;  %v9855_v59 = vmul.f32 %v5646_v55, %v8957_v60  ;;  %v5686_v17 = vsel %vm9823_vm8, %v5685_v53, %v9734_v13  ;;  %v4337_v26 = vpop.f32.mrf.mxu1  ;;  %v10411_v13 = vld [vmem:[#allocation67_spill] sm:$0xff] }
 0x4bf   : > { %v5667_v36 = vand.u32 2147483647, %v5666_v57  ;;  %v5690_v14 = vcvt.s32.f32 %v5689_v47  ;;  %4506 = vst [vmem:[%s6576_s25 + $0x98] sm:$0xff] %v4474_v56  ;;  %v4472_v41 = vadd.f32 %v4440_v52, %v9553_v29  ;;  %v4346_v44 = vadd.f32 %v5430_v51, %v9727_v42  ;;  %v10415_v56 = vld [vmem:[#allocation35_spill] sm:$0xff] }
 0x4c0   : > { %v4445_v8 = vadd.f32 %v9567_v19, %v4408_v34  ;;  %v4406_v49 = vmul.f32 %v9541_v48, %v4335_v37  ;;  %vm9865_vm9 = vcmp.lt.f32.partialorder %v5663_v46, 8388608.0  ;;  %v5302_v32 = vadd.f32 %v9686_v10, %v9658_v40  ;;  %v5433_v38 = vpop.f32.mrf.mxu1 }
 0x4c1   : > { %v4198_v20 = vadd.f32 %v5299_v1, %v10411_v13  ;;  %v5692_v18 = vand.u32 2147483648, %v9810_v45  ;;  %v5673_v29 = vcvt.f32.s32 %v9847_v4  ;;  %4504 = vst [vmem:[%s6576_s25 + $0x88] sm:$0xff] %v4472_v41  ;;  %v4409_v46 = vmul.f32 %v9541_v48, %v4346_v44  ;;  %v5313_v1 = vpop.f32.mrf.mxu0  ;;  %v10418_v13 = vld [vmem:[#allocation28_spill] sm:$0xff] }
 0x4c2   : > { %v4477_v43 = vadd.f32 %v4445_v8, %v9584_v25  ;;  %v4443_v42 = vadd.f32 %v9567_v19, %v4406_v49  ;;  %v4338_v35 = vadd.f32 %v4337_v26, %v9629_v33  ;;  %vm9879_vm10 = vcmp.lt.f32.partialorder %v5687_v24, 8388608.0  ;;  %v4350_v2 = vpop.f32.mrf.mxu1 }
 0x4c3   : > { %v5199_v10 = vadd.f32 %v9480_v7, %v9467_v5  ;;  %v9886_v12 = vmul.f32 %v5686_v17, %v8957_v60  ;;  %v5669_v55 = vor.u32 %v5668_v3, %v5667_v36  ;;  %v5691_v25 = vand.u32 2147483647, %v5690_v14 }
 0x4c4   : > { %4509 = vst [vmem:[%s6576_s25 + $0xb0] sm:$0xff] %v4477_v43  ;;  %v4475_v53 = vadd.f32 %v4443_v42, %v9597_v28  ;;  %v4446_v57 = vadd.f32 %v9567_v19, %v4409_v46  ;;  %v4407_v33 = vmul.f32 %v9541_v48, %v4338_v35  ;;  %v4359_v47 = vadd.f32 %v5433_v38, %v4198_v20  ;;  %v5434_v34 = vpop.f32.mrf.mxu1 }
 0x4c5   : > { %v5311_v27 = vadd.f32 %v5310_v23, %v5309_v9  ;;  %v4201_v5 = vadd.f32 %v5302_v32, %v10414_v22  ;;  %v5671_v7 = vand.u32 2147483647, %v9847_v4  ;;  %v5674_v0 = vcvt.s32.f32 %v5673_v29  ;;  %v10417_v32 = vld [vmem:[#allocation36_spill] sm:$0xff] }
 0x4c6   : > { %4507 = vst [vmem:[%s6576_s25 + $0xa0] sm:$0xff] %v4475_v53  ;;  %v4478_v16 = vadd.f32 %v4446_v57, %v9625_v31  ;;  %v4444_v3 = vadd.f32 %v9567_v19, %v4407_v33  ;;  %v4412_v28 = vmul.f32 %v9541_v48, %v4359_v47  ;;  %v4351_v24 = vadd.f32 %v4350_v2, %v9765_v6  ;;  %v10416_v31 = vld [vmem:[#allocation56_spill] sm:$0xff]  ;;  %v4353_v41 = vpop.f32.mrf.mxu1 }
 0x4c7   : > { %v4053_v9 = vadd.f32 %v5199_v10, %v10415_v56  ;;  %v5305_v23 = vadd.f32 %v9747_v30, %v9715_v11  ;;  %v5202_v52 = vadd.f32 %v9517_v50, %v9500_v61  ;;  %v5676_v37 = vand.u32 2147483648, %v9847_v4 }
 0x4c8   : > { %4510 = vst [vmem:[%s6576_s25 + $0xb8] sm:$0xff] %v4478_v16  ;;  %v4476_v51 = vadd.f32 %v4444_v3, %v10416_v31  ;;  %v4449_v17 = vadd.f32 %v9567_v19, %v4412_v28  ;;  %v4410_v36 = vmul.f32 %v9541_v48, %v4351_v24  ;;  %v4362_v6 = vadd.f32 %v5434_v34, %v4201_v5  ;;  %v5437_v29 = vpop.f32.mrf.mxu1 }
 0x4c9   : > { %v5314_v14 = vadd.f32 %v5313_v1, %v5312_v39  ;;  %v4214_v8 = vadd.f32 %v5311_v27, %v4053_v9  ;;  %v5693_v49 = vor.u32 %v5692_v18, %v5691_v25  ;;  %v5675_v11 = vand.u32 2147483647, %v5674_v0  ;;  %v10419_v39 = vld [vmem:[#allocation49_spill] sm:$0xff] }
 0x4ca   : > { %4508 = vst [vmem:[%s6576_s25 + $0xa8] sm:$0xff] %v4476_v51  ;;  %v4481_v61 = vadd.f32 %v4449_v17, %v9744_v15  ;;  %v4447_v50 = vadd.f32 %v9567_v19, %v4410_v36  ;;  %v4413_v30 = vmul.f32 %v9541_v48, %v4362_v6  ;;  %v4354_v44 = vadd.f32 %v4353_v41, %v9821_v63  ;;  %v10420_v15 = vld [vmem:[#allocation73_spill] sm:$0xff]  ;;  %v4366_v10 = vpop.f32.mrf.mxu1 }
 0x4cb   : > { %v4056_v26 = vadd.f32 %v5202_v52, %v10417_v32  ;;  %v5308_v20 = vadd.f32 %v9801_v58, %v10418_v13  ;;  %v5670_v18 = vsel %vm9865_vm9, %v5669_v55, %v9772_v54  ;;  %v4206_v43 = vadd.f32 %v5305_v23, %v10419_v39 }
 0x4cc   : > { %4513 = vst [vmem:[%s6576_s25 + $0xd0] sm:$0xff] %v4481_v61  ;;  %v4479_v42 = vadd.f32 %v4447_v50, %v10420_v15  ;;  %v4450_v46 = vadd.f32 %v9567_v19, %v4413_v30  ;;  %v4411_v63 = vmul.f32 %v9541_v48, %v4354_v44  ;;  %v4375_v35 = vadd.f32 %v5437_v29, %v4214_v8  ;;  %v5438_v40 = vpop.f32.mrf.mxu1 }
 0x4cd   : > { %v5694_v58 = vsel %vm9879_vm10, %v5693_v49, %v9810_v45  ;;  %v4217_v38 = vadd.f32 %v5314_v14, %v4056_v26  ;;  %vm9928_vm11 = vcmp.lt.f32.partialorder %v5671_v7, 8388608.0  ;;  %v5677_v54 = vor.u32 %v5676_v37, %v5675_v11  ;;  %v10423_v45 = vld [vmem:[#allocation33_spill] sm:$0xff] }
 0x4ce   : > { %4511 = vst [vmem:[%s6576_s25 + $0xc0] sm:$0xff] %v4479_v42  ;;  %v4482_v55 = vadd.f32 %v4450_v46, %v9818_v62  ;;  %v4448_v25 = vadd.f32 %v9567_v19, %v4411_v63  ;;  %v4416_v53 = vmul.f32 %v9541_v48, %v4375_v35  ;;  %v4367_v57 = vadd.f32 %v4366_v10, %v4206_v43  ;;  %v4369_v0 = vpop.f32.mrf.mxu1 }
 0x4cf   : > { %v515_v33 = vmul.f32 %v5670_v18, %v8957_v60  ;;  %v4209_v47 = vadd.f32 %v5308_v20, %v10423_v45  ;;  %v4378_v62 = vadd.f32 %v5438_v40, %v4217_v38  ;;  %v518_v5 = vmul.f32 %v5694_v58, %v8957_v60 }
 0x4d0   : > { %4514 = vst [vmem:[%s6576_s25 + $0xd8] sm:$0xff] %v4482_v55  ;;  %v4480_v27 = vadd.f32 %v4448_v25, %v9855_v59  ;;  %v4453_v2 = vadd.f32 %v9567_v19, %v4416_v53  ;;  %v4414_v22 = vmul.f32 %v9541_v48, %v4367_v57  ;;  %v5678_v7 = vsel %vm9928_vm11, %v5677_v54, %v9847_v4 }
 0x4d1   : > { %v4417_v16 = vmul.f32 %v9541_v48, %v4378_v62  ;;  %v4370_v3 = vadd.f32 %v4369_v0, %v4209_v47  ;;  %v516_v56 = vmul.f32 %v5678_v7, %v8957_v60 }
 0x4d2   : > { %4512 = vst [vmem:[%s6576_s25 + $0xc8] sm:$0xff] %v4480_v27  ;;  %v4485_v1 = vadd.f32 %v4453_v2, %v9886_v12  ;;  %v4451_v59 = vadd.f32 %v9567_v19, %v4414_v22 }
 0x4d3   : > { %v4454_v24 = vadd.f32 %v9567_v19, %v4417_v16  ;;  %v4415_v4 = vmul.f32 %v9541_v48, %v4370_v3 }
 0x4d4   : > { %4517 = vst [vmem:[%s6576_s25 + $0xf0] sm:$0xff] %v4485_v1  ;;  %v4483_v28 = vadd.f32 %v4451_v59, %v515_v33 }
 0x4d5   : > { %v4486_v12 = vadd.f32 %v4454_v24, %v518_v5  ;;  %v4452_v9 = vadd.f32 %v9567_v19, %v4415_v4 }
 0x4d6   : > { %4515 = vst [vmem:[%s6576_s25 + $0xe0] sm:$0xff] %v4483_v28 }
 0x4d7   : > { %4518 = vst [vmem:[%s6576_s25 + $0xf8] sm:$0xff] %v4486_v12  ;;  %v4484_v60 = vadd.f32 %v4452_v9, %v516_v56 }
 0x4d9   : > { %4516 = vst [vmem:[%s6576_s25 + $0xe8] sm:$0xff] %v4484_v60 }
 0x4da   : > { %6322 = shalt.err (!%p6319_p13)
}
 0x4db   : > { %s6323_s25 = scalar_lea.hbm %s9961_s17, 4096  ;;  %s6327_s16 = scalar_lea.hbm %s10019_s5, 8192 }
 0x4dc   : > { %p6324_p0 = scmp.ne.s32.totalorder %s9961_s17, %s6323_s25  ;;  %p6328_p12 = scmp.lt.s32.totalorder %s9961_s17, %s10019_s5 }
 0x4dd   : > { %p6329_p1 = scmp.lt.s32.totalorder %s6327_s16, %s6323_s25 }
 0x4de   : > { %p6325_p7 = pnand %p6324_p0, %p6483_p4 }
 0x4df   : > { %p6330_p2 = por %p6329_p1, %p6328_p12 }
 0x4e0   : > { %p6326_p9 = pneg %p6325_p7 }
 0x4e2   : > { %p6331_p5 = pnand %p6330_p2, %p6326_p9 }
 0x4e4   : > { %6334 = shalt.err (!%p6331_p5)
}
 0x4e5   : > { %s6411_s10 = smov 128   ;;  %s6412_s13 = smov 8  }
 0x4e6   : > { %5963 = dma.vmem_to_hbm [thread:$0]  (%p6483_p4), %s9963_s9, 4096, %s9961_s17, %s9969_s21, %s6411_s10, %s6411_s10, %s6412_s13  }
 0x4e7 PF: > { %p5985_p3 = scmp.ge.s32.totalorder %s6399_s23, 2  ;;  %s4551_s15 = sand.u32 1, %s6379_s18  }
 0x4e8   : > { %p10425_p6 = scmp.ne.s32.totalorder %s10073_s30, 0  ;;  %s4552_s27 = scalar_lea.sflag [#allocation6], %s4551_s15 }
 0x4ea   : > { %p5976_p8 = pnand %p5985_p3, %p10425_p6 }
 0x4ec   : > { %p5977_p10 = pneg %p5976_p8 }
 0x4ee   : > { %6374 = dma.done.wait (%p5977_p10), %s4552_s27, 4096  }
 0x4ef   : > { %6376 = vsyncadd (%p5977_p10), %s4552_s27, 4294963200  ;;  %s21_s23 = sadd.s32 1, %s6399_s23   ;;  %s10426_s21 = sld [smem:[#allocation23_spill]] }
 0x4f0   : > { %p18_p11 = scmp.ge.s32.totalorder %s21_s23, 4   ;;  %s10427_s22 = sld [smem:[#allocation24_spill]] }
 0x4f1   : > { %s10428_s18 = smov %s6383_s19  ;;  %s10429_s19 = smov %s6387_s20 }
 0x4f2   : > { %s10430_s20 = smov %s6496_s6  ;;  %20 = sbr.rel (!%p18_p11) target bundleno = 11 (0xb), region = 107 }
 0x4f7   :  { %4557 = vsyncpa [#allocation5], 1 }
 0x4f8   :  { %4559 = vsyncpa [#allocation5 + $0x1], 1 }
 0x4f9   :  { %4560 = vsyncpa [#allocation10], 1 }
 0x4fa   :  { %4561 = vsyncpa [#allocation6], 1 }
 0x4fb   :  { %4563 = vsyncpa [#allocation6 + $0x1], 1 }
 0x4fc   :  { %4564 = vsyncpa [#allocation7], 1 }
 0x4fd   :  { %4566 = vsyncpa [#allocation7 + $0x1], 1 }
 0x4fe   :  { %4567 = vsyncmov [#allocation3] }
 0x501   :  { %s4568_s28 = vpop.sfrf %4567 }
 0x502   :  { %p4837_p4 = scmp.ne.s32.totalorder %s4568_s28, 0 }
 0x504   :  { %4572 = shalt.err (%p4837_p4)  }
 0x505   :  { %4574 = vsyncmov [#allocation3 + $0x1] }
 0x508   :  { %s4575_s30 = vpop.sfrf %4574 }
 0x509   :  { %p4838_p13 = scmp.ne.s32.totalorder %s4575_s30, 0 }
 0x50b   :  { %4579 = shalt.err (%p4838_p13)  }

</bundles_post_ra>
